<compile_context>
chip_gen: v5e
topology: v5e:2x2
jax: 0.10.0
libtpu: 0.0.40
codegen_flags: <defaults>
</compile_context>

<pallas_src>
import functools

import jax
import jax.numpy as jnp
from jax.experimental import pallas as pl
from jax.experimental.pallas import tpu as pltpu

VMEM = pltpu.MemorySpace.VMEM

# MXU operand dtype (f32 accumulation is always kept via preferred_element_type).
MXU_DTYPE = jnp.bfloat16

CHUNK = 8  # timesteps per grid iteration in the recurrent kernels


def _mxu(x):
    return x.astype(MXU_DTYPE)


# --------------------------- tiled linear: y = x @ w + b ---------------------
def _linear_kernel(x_ref, w_ref, b_ref, o_ref):
    o_ref[...] = (
        jnp.dot(_mxu(x_ref[...]), _mxu(w_ref[...]),
                preferred_element_type=jnp.float32)
        + b_ref[...]
    )


def linear(x2d, w, b, *, tm=256, tn=512):
    """x2d: [M, K] f32, w: [K, N], b: [N].  Tiled over (M, N); K whole."""
    M, K = x2d.shape
    _, N = w.shape
    bm = tm if M >= tm else M          # 8-aligned tile or full extent
    bn = tn if N >= tn else N          # 128-aligned tile or full extent
    grid = (pl.cdiv(M, bm), pl.cdiv(N, bn))
    return pl.pallas_call(
        _linear_kernel,
        out_shape=jax.ShapeDtypeStruct((M, N), jnp.float32),
        grid_spec=pltpu.PrefetchScalarGridSpec(
            num_scalar_prefetch=0,
            grid=grid,
            in_specs=[
                pl.BlockSpec((bm, K), lambda i, j: (i, 0)),
                pl.BlockSpec((K, bn), lambda i, j: (0, j)),
                pl.BlockSpec((1, bn), lambda i, j: (0, j)),
            ],
            out_specs=pl.BlockSpec((bm, bn), lambda i, j: (i, j)),
        ),
        compiler_params=pltpu.CompilerParams(
            dimension_semantics=("parallel", "parallel")),
    )(x2d, w.astype(MXU_DTYPE), b.reshape(1, N).astype(jnp.float32))


# ------------------------- shared LSTM gate math (i,f,g,o) -------------------
def _lstm_gates(gates, c_prev, hidden):
    i = jax.nn.sigmoid(gates[:, 0 * hidden:1 * hidden])
    f = jax.nn.sigmoid(gates[:, 1 * hidden:2 * hidden])
    g = jnp.tanh(gates[:, 2 * hidden:3 * hidden])
    o = jax.nn.sigmoid(gates[:, 3 * hidden:4 * hidden])
    c_new = f * c_prev + i * g
    h_new = o * jnp.tanh(c_new)
    return h_new, c_new


# ------------- fused bidirectional encoder (emits only Σ_t h_t) --------------
def _bi_encoder_kernel(gx_ref, whh_ref, sum_ref, h_sc, c_sc, *,
                       hidden, chunk, seq_len):
    c_idx = pl.program_id(1)

    @pl.when(c_idx == 0)
    def _():
        h_sc[...] = jnp.zeros_like(h_sc)
        c_sc[...] = jnp.zeros_like(c_sc)
        sum_ref[...] = jnp.zeros_like(sum_ref)

    w_hh = whh_ref[0]                                   # (H, 4H), bf16 resident
    h = h_sc[...]
    c = c_sc[...]
    acc = sum_ref[0]
    for j in range(chunk):                              # statically unrolled
        t = c_idx * chunk + j
        gates = gx_ref[0, :, j, :] + jnp.dot(
            _mxu(h), w_hh, preferred_element_type=jnp.float32)
        h, c = _lstm_gates(gates, c, hidden)
        # Mask out the (garbage) tail of a partial last chunk.
        acc = acc + jnp.where(t < seq_len, h, jnp.zeros_like(h))
    h_sc[...] = h
    c_sc[...] = c
    sum_ref[0] = acc


def bidirectional_encoder_sums(gates_enc, w_hh_stacked, *, chunk=CHUNK):
    """gates_enc: [2, B, L, 4H] precomputed x-side gate pre-activations
       (direction 1 already time-reversed).  Returns Σ_t h_t per direction,
       shape [2, B, H]."""
    _, B, L, H4 = gates_enc.shape
    H = H4 // 4
    C = min(chunk, L)
    nc = pl.cdiv(L, C)
    kern = functools.partial(_bi_encoder_kernel, hidden=H, chunk=C, seq_len=L)
    return pl.pallas_call(
        kern,
        out_shape=jax.ShapeDtypeStruct((2, B, H), jnp.float32),
        grid_spec=pltpu.PrefetchScalarGridSpec(
            num_scalar_prefetch=0,
            grid=(2, nc),
            in_specs=[
                pl.BlockSpec((1, B, C, H4), lambda d, c: (d, 0, c, 0)),
                pl.BlockSpec((1, H, H4), lambda d, c: (d, 0, 0)),   # resident
            ],
            out_specs=pl.BlockSpec((1, B, H), lambda d, c: (d, 0, 0)),
            scratch_shapes=[pltpu.VMEM((B, H), jnp.float32),
                            pltpu.VMEM((B, H), jnp.float32)],
        ),
        compiler_params=pltpu.CompilerParams(
            dimension_semantics=("parallel", "arbitrary")),
    )(gates_enc, w_hh_stacked.astype(MXU_DTYPE))


# ---------------- constant attention context -> decoder gate bias -------------
def _ctx_gate_kernel(s_ref, wctx_ref, b_ref, o_ref):
    # torch.softmax(et, dim=2) over a size-1 axis ⇒ weights ≡ 1 ⇒
    # context = Σ_t enc_out[:,t,:] (constant, independent of decoder state).
    # Only its matmul with the ctx rows of the decoder w_ih (+ LSTM bias)
    # matters downstream.
    o_ref[...] = (
        jnp.dot(_mxu(s_ref[0]), wctx_ref[0], preferred_element_type=jnp.float32)
        + jnp.dot(_mxu(s_ref[1]), wctx_ref[1], preferred_element_type=jnp.float32)
        + b_ref[...]
    )


# --------------------------- fused decoder LSTM kernel ------------------------
def _decoder_kernel(gx_ref, ctx_ref, whh_ref, h_out_ref, h_sc, c_sc, *,
                    hidden, chunk):
    c_idx = pl.program_id(0)

    @pl.when(c_idx == 0)
    def _():
        h_sc[...] = jnp.zeros_like(h_sc)
        c_sc[...] = jnp.zeros_like(c_sc)

    w_hh = whh_ref[...]                                 # (H, 4H), bf16 resident
    ctx = ctx_ref[...]                                  # (B, 4H), ctx + bias
    h = h_sc[...]
    c = c_sc[...]
    for j in range(chunk):                              # statically unrolled
        gates = gx_ref[:, j, :] + ctx + jnp.dot(
            _mxu(h), w_hh, preferred_element_type=jnp.float32)
        h, c = _lstm_gates(gates, c, hidden)
        h_out_ref[:, j, :] = h          # OOB tail of a partial chunk is dropped
    h_sc[...] = h
    c_sc[...] = c


def decoder_hidden_states(gx_dec, ctx_gate, w_hh, *, chunk=CHUNK):
    """gx_dec: [B, T, 4H] precomputed emb-side gate pre-activations.
       Returns all decoder hidden states [B, T, H]."""
    B, T, H4 = gx_dec.shape
    H = H4 // 4
    C = min(chunk, T)
    nc = pl.cdiv(T, C)
    kern = functools.partial(_decoder_kernel, hidden=H, chunk=C)
    return pl.pallas_call(
        kern,
        out_shape=jax.ShapeDtypeStruct((B, T, H), jnp.float32),
        grid_spec=pltpu.PrefetchScalarGridSpec(
            num_scalar_prefetch=0,
            grid=(nc,),
            in_specs=[
                pl.BlockSpec((B, C, H4), lambda c: (0, c, 0)),
                pl.BlockSpec((B, H4), lambda c: (0, 0)),            # resident
                pl.BlockSpec((H, H4), lambda c: (0, 0)),            # resident
            ],
            out_specs=pl.BlockSpec((B, C, H), lambda c: (0, c, 0)),
            scratch_shapes=[pltpu.VMEM((B, H), jnp.float32),
                            pltpu.VMEM((B, H), jnp.float32)],
        ),
        compiler_params=pltpu.CompilerParams(
            dimension_semantics=("arbitrary",)),
    )(gx_dec, ctx_gate, w_hh.astype(MXU_DTYPE))


# ----------------------------- Full forward pass ------------------------------
def base_attention_forward_train(params, features, targets):
    """features: [B, L, dim_feature] f32, targets: [B, L] int32.
       Returns probs: [B, L-1, vocab] (matches torch.cat(probs, dim=1))."""
    B, L, F = features.shape
    H = params['w_feat'].shape[1]
    E = params['emb'].shape[1]
    V = params['w_out'].shape[1]
    T = L - 1

    # feature_dropout(p=0) / out_drop(p=0) are identity in forward.
    # 1) feature projection, batched over all B*L positions (tiled matmul).
    feats_h = linear(features.reshape(B * L, F),
                     params['w_feat'], params['b_feat'])             # [B*L, H]

    # 2) encoder input-side gate pre-activations, both directions in ONE matmul.
    w_ih_enc = jnp.concatenate([params['enc_f']['w_ih'],
                                params['enc_b']['w_ih']], axis=1)    # [H, 8H]
    b_enc = jnp.concatenate([params['enc_f']['b'],
                             params['enc_b']['b']], axis=0)          # [8H]
    gx_enc = linear(feats_h, w_ih_enc, b_enc).reshape(B, L, 8 * H)
    gx_f = gx_enc[..., :4 * H]
    gx_b = jnp.flip(gx_enc[..., 4 * H:], axis=1)     # backward dir: reversed time
    gates_enc = jnp.stack([gx_f, gx_b], axis=0)      # [2, B, L, 4H]

    # 3) recurrent encoder: h@W_hh + gates per step; emits only Σ_t h_t per dir.
    w_hh_enc = jnp.stack([params['enc_f']['w_hh'],
                          params['enc_b']['w_hh']], axis=0)          # [2, H, 4H]
    enc_sum = bidirectional_encoder_sums(gates_enc, w_hh_enc)        # [2, B, H]

    # 4) degenerate attention: constant context's gate contribution (+ dec bias).
    w_ctx = params['dec']['w_ih'][E:].reshape(2, H, 4 * H)
    ctx_gate = pl.pallas_call(
        _ctx_gate_kernel,
        out_shape=jax.ShapeDtypeStruct((B, 4 * H), jnp.float32),
        in_specs=[pl.BlockSpec(memory_space=VMEM)] * 3,
        out_specs=pl.BlockSpec(memory_space=VMEM),
    )(enc_sum, w_ctx.astype(MXU_DTYPE),
      params['dec']['b'].reshape(1, 4 * H).astype(jnp.float32))

    # 5) decoder input-side gate pre-activations (teacher forcing), one matmul.
    emb = jnp.take(params['emb'], targets[:, :T], axis=0)            # [B, T, E]
    gx_dec = linear(emb.reshape(B * T, E), params['dec']['w_ih'][:E],
                    jnp.zeros((4 * H,), jnp.float32)).reshape(B, T, 4 * H)

    # 6) recurrent decoder (ctx_gate added per step inside the kernel).
    h_all = decoder_hidden_states(gx_dec, ctx_gate, params['dec']['w_hh'])  # [B,T,H]

    # 7) batched output projection — already in [B, T, V] layout, no transpose.
    logits = linear(h_all.reshape(B * T, H), params['w_out'], params['b_out'])
    return logits.reshape(B, T, V)


# ------------------------------ Param init (synthetic) ------------------------
def init_params(key, dim_feature, dim_hidden, dim_embedding, vocab_size):
    H, E, F, V = dim_hidden, dim_embedding, dim_feature, vocab_size
    ks = iter(jax.random.split(key, 32))

    def w(shape):
        return jax.random.normal(next(ks), shape, jnp.float32) * 0.1

    def lstm(in_dim):
        return {'w_ih': w((in_dim, 4 * H)),
                'w_hh': w((H, 4 * H)),
                'b': w((4 * H,)) + w((4 * H,))}   # b_ih + b_hh

    emb = w((V, E)).at[0].set(0.0)                # padding_idx=0
    return {
        'w_feat': w((F, H)), 'b_feat': w((H,)),
        'enc_f': lstm(H), 'enc_b': lstm(H),
        'dec': lstm(E + 2 * H),
        'emb': emb,
        'w_out': w((H, V)), 'b_out': w((V,)),
        # Attention params kept for module parity; forward-dead because the
        # reference softmax over a size-1 axis makes the weights identically 1.
        'w_att_enc': w((2 * H, H)), 'b_att_enc': w((H,)),
        'w_att_hid': w((H, H)), 'b_att_hid': w((H,)),
        'w_att_app': w((H, 1)),
    }


if __name__ == "__main__":
    # Small, module-consistent shapes.
    B, length = 2, 8
    dim_feature, dim_hidden, dim_embedding, vocab_size = 8, 32, 32, 16

    key = jax.random.PRNGKey(0)
    kp, kf, kt = jax.random.split(key, 3)

    params = init_params(kp, dim_feature, dim_hidden, dim_embedding, vocab_size)
    features = jax.random.normal(kf, (B, length, dim_feature), dtype=jnp.float32)
    targets = jax.random.randint(kt, (B, length), 0, vocab_size, dtype=jnp.int32)

    fwd = jax.jit(base_attention_forward_train)
    probs = fwd(params, features, targets)
    probs = jax.block_until_ready(probs)

    assert probs.shape == (B, length - 1, vocab_size), probs.shape
    assert probs.dtype == jnp.float32
    assert bool(jnp.all(jnp.isfinite(probs)))
    # TODO(synk): 'test' mode (greedy argmax decode with data-dependent
    # embedding feedback) is not implemented; only the 'train' forward path is.
    print("KERNEL_OK")
</pallas_src>

<mosaic_0001>
module attributes {stable_mosaic.version = 11 : i64} {
  func.func @_linear_kernel(%arg0: i32, %arg1: i32, %arg2: memref<16x32xf32, #tpu.memory_space<vmem>>, %arg3: memref<32x256xbf16, #tpu.memory_space<vmem>>, %arg4: memref<1x256xf32, #tpu.memory_space<vmem>>, %arg5: memref<16x256xf32, #tpu.memory_space<vmem>>) attributes {dimension_semantics = [#tpu.dimension_semantics<parallel>, #tpu.dimension_semantics<parallel>], iteration_bounds = array<i64: 1, 1>, scalar_prefetch = 0 : i64, scratch_operands = 0 : i64, tpu.core_type = #tpu.core_type<tc>, window_params = [{transform_indices = @transform_0, window_bounds = array<i64: 16, 32>}, {transform_indices = @transform_1, window_bounds = array<i64: 32, 256>}, {transform_indices = @transform_2, window_bounds = array<i64: 1, 256>}, {transform_indices = @transform_3, window_bounds = array<i64: 16, 256>}]} {
    %c0 = arith.constant 0 : index
    %c0_0 = arith.constant 0 : index
    %0 = vector.load %arg2[%c0, %c0_0] : memref<16x32xf32, #tpu.memory_space<vmem>>, vector<16x32xf32>
    %1 = arith.truncf %0 : vector<16x32xf32> to vector<16x32xbf16>
    %c0_1 = arith.constant 0 : index
    %c0_2 = arith.constant 0 : index
    %2 = vector.load %arg3[%c0_1, %c0_2] : memref<32x256xbf16, #tpu.memory_space<vmem>>, vector<32x256xbf16>
    %cst = arith.constant dense<0.000000e+00> : vector<16x256xf32>
    %3 = tpu.matmul %1, %2, %cst {dimension_numbers = #tpu.dot_dimension_numbers<[1], [0], [0], [1], [0, 0, 1, 1], [], []>} : vector<16x32xbf16>, vector<32x256xbf16>, vector<16x256xf32> -> vector<16x256xf32>
    %c0_3 = arith.constant 0 : index
    %c0_4 = arith.constant 0 : index
    %4 = vector.load %arg4[%c0_3, %c0_4] : memref<1x256xf32, #tpu.memory_space<vmem>>, vector<1x256xf32>
    %5 = vector.broadcast %4 : vector<1x256xf32> to vector<16x256xf32>
    %6 = arith.addf %3, %5 : vector<16x256xf32>
    %c0_5 = arith.constant 0 : index
    %c0_6 = arith.constant 0 : index
    %7 = vector.load %arg5[%c0_5, %c0_6] : memref<16x256xf32, #tpu.memory_space<vmem>>, vector<16x256xf32>
    tpu.vector_store %arg5[%c0_5, %c0_6], %6 {strides = array<i32>} : memref<16x256xf32, #tpu.memory_space<vmem>>, vector<16x256xf32>,
    return
  }
  func.func @transform_0(%arg0: i32, %arg1: i32) -> (i32, i32) {
    %c0_i32 = arith.constant 0 : i32
    %c0_i32_0 = arith.constant 0 : i32
    return %arg0, %c0_i32 : i32, i32
  }
  func.func @transform_1(%arg0: i32, %arg1: i32) -> (i32, i32) {
    %c0_i32 = arith.constant 0 : i32
    %c0_i32_0 = arith.constant 0 : i32
    return %c0_i32, %arg1 : i32, i32
  }
  func.func @transform_2(%arg0: i32, %arg1: i32) -> (i32, i32) {
    %c0_i32 = arith.constant 0 : i32
    %c0_i32_0 = arith.constant 0 : i32
    return %c0_i32, %arg1 : i32, i32
  }
  func.func @transform_3(%arg0: i32, %arg1: i32) -> (i32, i32) {
    %c0_i32 = arith.constant 0 : i32
    return %arg0, %arg1 : i32, i32
  }
}

module attributes {stable_mosaic.version = 11 : i64} {
  func.func @_linear_kernel(%arg0: i32, %arg1: i32, %arg2: memref<16x8xf32, #tpu.memory_space<vmem>>, %arg3: memref<8x32xbf16, #tpu.memory_space<vmem>>, %arg4: memref<1x32xf32, #tpu.memory_space<vmem>>, %arg5: memref<16x32xf32, #tpu.memory_space<vmem>>) attributes {dimension_semantics = [#tpu.dimension_semantics<parallel>, #tpu.dimension_semantics<parallel>], iteration_bounds = array<i64: 1, 1>, scalar_prefetch = 0 : i64, scratch_operands = 0 : i64, tpu.core_type = #tpu.core_type<tc>, window_params = [{transform_indices = @transform_0, window_bounds = array<i64: 16, 8>}, {transform_indices = @transform_1, window_bounds = array<i64: 8, 32>}, {transform_indices = @transform_2, window_bounds = array<i64: 1, 32>}, {transform_indices = @transform_3, window_bounds = array<i64: 16, 32>}]} {
    %c0 = arith.constant 0 : index
    %c0_0 = arith.constant 0 : index
    %0 = vector.load %arg2[%c0, %c0_0] : memref<16x8xf32, #tpu.memory_space<vmem>>, vector<16x8xf32>
    %1 = arith.truncf %0 : vector<16x8xf32> to vector<16x8xbf16>
    %c0_1 = arith.constant 0 : index
    %c0_2 = arith.constant 0 : index
    %2 = vector.load %arg3[%c0_1, %c0_2] : memref<8x32xbf16, #tpu.memory_space<vmem>>, vector<8x32xbf16>
    %cst = arith.constant dense<0.000000e+00> : vector<16x32xf32>
    %3 = tpu.matmul %1, %2, %cst {dimension_numbers = #tpu.dot_dimension_numbers<[1], [0], [0], [1], [0, 0, 1, 1], [], []>} : vector<16x8xbf16>, vector<8x32xbf16>, vector<16x32xf32> -> vector<16x32xf32>
    %c0_3 = arith.constant 0 : index
    %c0_4 = arith.constant 0 : index
    %4 = vector.load %arg4[%c0_3, %c0_4] : memref<1x32xf32, #tpu.memory_space<vmem>>, vector<1x32xf32>
    %5 = vector.broadcast %4 : vector<1x32xf32> to vector<16x32xf32>
    %6 = arith.addf %3, %5 : vector<16x32xf32>
    %c0_5 = arith.constant 0 : index
    %c0_6 = arith.constant 0 : index
    %7 = vector.load %arg5[%c0_5, %c0_6] : memref<16x32xf32, #tpu.memory_space<vmem>>, vector<16x32xf32>
    tpu.vector_store %arg5[%c0_5, %c0_6], %6 {strides = array<i32>} : memref<16x32xf32, #tpu.memory_space<vmem>>, vector<16x32xf32>,
    return
  }
  func.func @transform_0(%arg0: i32, %arg1: i32) -> (i32, i32) {
    %c0_i32 = arith.constant 0 : i32
    %c0_i32_0 = arith.constant 0 : i32
    return %arg0, %c0_i32 : i32, i32
  }
  func.func @transform_1(%arg0: i32, %arg1: i32) -> (i32, i32) {
    %c0_i32 = arith.constant 0 : i32
    %c0_i32_0 = arith.constant 0 : i32
    return %c0_i32, %arg1 : i32, i32
  }
  func.func @transform_2(%arg0: i32, %arg1: i32) -> (i32, i32) {
    %c0_i32 = arith.constant 0 : i32
    %c0_i32_0 = arith.constant 0 : i32
    return %c0_i32, %arg1 : i32, i32
  }
  func.func @transform_3(%arg0: i32, %arg1: i32) -> (i32, i32) {
    %c0_i32 = arith.constant 0 : i32
    return %arg0, %arg1 : i32, i32
  }
}

module attributes {stable_mosaic.version = 11 : i64} {
  func.func @_ctx_gate_kernel(%arg0: memref<2x2x32xf32, #tpu.memory_space<vmem>>, %arg1: memref<2x32x128xbf16, #tpu.memory_space<vmem>>, %arg2: memref<1x128xf32, #tpu.memory_space<vmem>>, %arg3: memref<2x128xf32, #tpu.memory_space<vmem>>) attributes {dimension_semantics = [], scalar_prefetch = 0 : i64, scratch_operands = 0 : i64, tpu.core_type = #tpu.core_type<tc>} {
    %c0 = arith.constant 0 : index
    %c0_0 = arith.constant 0 : index
    %c0_1 = arith.constant 0 : index
    %0 = vector.load %arg0[%c0, %c0_0, %c0_1] : memref<2x2x32xf32, #tpu.memory_space<vmem>>, vector<1x2x32xf32>
    %1 = vector.shape_cast %0 : vector<1x2x32xf32> to vector<2x32xf32>
    %2 = arith.truncf %1 : vector<2x32xf32> to vector<2x32xbf16>
    %c0_2 = arith.constant 0 : index
    %c0_3 = arith.constant 0 : index
    %c0_4 = arith.constant 0 : index
    %3 = vector.load %arg1[%c0_2, %c0_3, %c0_4] : memref<2x32x128xbf16, #tpu.memory_space<vmem>>, vector<1x32x128xbf16>
    %4 = vector.shape_cast %3 : vector<1x32x128xbf16> to vector<32x128xbf16>
    %cst = arith.constant dense<0.000000e+00> : vector<2x128xf32>
    %5 = tpu.matmul %2, %4, %cst {dimension_numbers = #tpu.dot_dimension_numbers<[1], [0], [0], [1], [0, 0, 1, 1], [], []>} : vector<2x32xbf16>, vector<32x128xbf16>, vector<2x128xf32> -> vector<2x128xf32>
    %c1 = arith.constant 1 : index
    %c0_5 = arith.constant 0 : index
    %c0_6 = arith.constant 0 : index
    %6 = vector.load %arg0[%c1, %c0_5, %c0_6] : memref<2x2x32xf32, #tpu.memory_space<vmem>>, vector<1x2x32xf32>
    %7 = vector.shape_cast %6 : vector<1x2x32xf32> to vector<2x32xf32>
    %8 = arith.truncf %7 : vector<2x32xf32> to vector<2x32xbf16>
    %c1_7 = arith.constant 1 : index
    %c0_8 = arith.constant 0 : index
    %c0_9 = arith.constant 0 : index
    %9 = vector.load %arg1[%c1_7, %c0_8, %c0_9] : memref<2x32x128xbf16, #tpu.memory_space<vmem>>, vector<1x32x128xbf16>
    %10 = vector.shape_cast %9 : vector<1x32x128xbf16> to vector<32x128xbf16>
    %cst_10 = arith.constant dense<0.000000e+00> : vector<2x128xf32>
    %11 = tpu.matmul %8, %10, %cst_10 {dimension_numbers = #tpu.dot_dimension_numbers<[1], [0], [0], [1], [0, 0, 1, 1], [], []>} : vector<2x32xbf16>, vector<32x128xbf16>, vector<2x128xf32> -> vector<2x128xf32>
    %12 = arith.addf %5, %11 : vector<2x128xf32>
    %c0_11 = arith.constant 0 : index
    %c0_12 = arith.constant 0 : index
    %13 = vector.load %arg2[%c0_11, %c0_12] : memref<1x128xf32, #tpu.memory_space<vmem>>, vector<1x128xf32>
    %14 = vector.broadcast %13 : vector<1x128xf32> to vector<2x128xf32>
    %15 = arith.addf %12, %14 : vector<2x128xf32>
    %c0_13 = arith.constant 0 : index
    %c0_14 = arith.constant 0 : index
    %16 = vector.load %arg3[%c0_13, %c0_14] : memref<2x128xf32, #tpu.memory_space<vmem>>, vector<2x128xf32>
    tpu.vector_store %arg3[%c0_13, %c0_14], %15 {strides = array<i32>} : memref<2x128xf32, #tpu.memory_space<vmem>>, vector<2x128xf32>,
    return
  }
}

module attributes {stable_mosaic.version = 11 : i64} {
  func.func @_bi_encoder_kernel(%arg0: i32, %arg1: i32, %arg2: memref<1x2x8x128xf32, #tpu.memory_space<vmem>>, %arg3: memref<1x32x128xbf16, #tpu.memory_space<vmem>>, %arg4: memref<1x2x32xf32, #tpu.memory_space<vmem>>, %arg5: memref<2x32xf32, #tpu.memory_space<vmem>>, %arg6: memref<2x32xf32, #tpu.memory_space<vmem>>) attributes {dimension_semantics = [#tpu.dimension_semantics<parallel>, #tpu.dimension_semantics<arbitrary>], iteration_bounds = array<i64: 2, 1>, scalar_prefetch = 0 : i64, scratch_operands = 2 : i64, tpu.core_type = #tpu.core_type<tc>, window_params = [{transform_indices = @transform_0, window_bounds = array<i64: 1, 2, 8, 128>}, {transform_indices = @transform_1, window_bounds = array<i64: 1, 32, 128>}, {transform_indices = @transform_2, window_bounds = array<i64: 1, 2, 32>}]} {
    %c0_i32 = arith.constant 0 : i32
    %0 = arith.cmpi eq, %arg1, %c0_i32 : i32
    %1 = arith.extui %0 : i1 to i32
    %c0_i32_0 = arith.constant 0 : i32
    %2 = arith.cmpi ne, %1, %c0_i32_0 : i32
    scf.if %2 {
      %cst_97 = arith.constant 0.000000e+00 : f32
      %302 = vector.broadcast %cst_97 : f32 to vector<2x32xf32>
      %c0_98 = arith.constant 0 : index
      %c0_99 = arith.constant 0 : index
      %303 = vector.load %arg5[%c0_98, %c0_99] : memref<2x32xf32, #tpu.memory_space<vmem>>, vector<2x32xf32>
      tpu.vector_store %arg5[%c0_98, %c0_99], %302 {strides = array<i32>} : memref<2x32xf32, #tpu.memory_space<vmem>>, vector<2x32xf32>,
      %cst_100 = arith.constant 0.000000e+00 : f32
      %304 = vector.broadcast %cst_100 : f32 to vector<2x32xf32>
      %c0_101 = arith.constant 0 : index
      %c0_102 = arith.constant 0 : index
      %305 = vector.load %arg6[%c0_101, %c0_102] : memref<2x32xf32, #tpu.memory_space<vmem>>, vector<2x32xf32>
      tpu.vector_store %arg6[%c0_101, %c0_102], %304 {strides = array<i32>} : memref<2x32xf32, #tpu.memory_space<vmem>>, vector<2x32xf32>,
      %cst_103 = arith.constant 0.000000e+00 : f32
      %306 = vector.broadcast %cst_103 : f32 to vector<1x2x32xf32>
      %c0_104 = arith.constant 0 : index
      %c0_105 = arith.constant 0 : index
      %c0_106 = arith.constant 0 : index
      %307 = vector.load %arg4[%c0_104, %c0_105, %c0_106] : memref<1x2x32xf32, #tpu.memory_space<vmem>>, vector<1x2x32xf32>
      tpu.vector_store %arg4[%c0_104, %c0_105, %c0_106], %306 {strides = array<i32>} : memref<1x2x32xf32, #tpu.memory_space<vmem>>, vector<1x2x32xf32>,
    } else {
    }
    %c0 = arith.constant 0 : index
    %c0_1 = arith.constant 0 : index
    %c0_2 = arith.constant 0 : index
    %3 = vector.load %arg3[%c0, %c0_1, %c0_2] : memref<1x32x128xbf16, #tpu.memory_space<vmem>>, vector<1x32x128xbf16>
    %4 = vector.shape_cast %3 : vector<1x32x128xbf16> to vector<32x128xbf16>
    %c0_3 = arith.constant 0 : index
    %c0_4 = arith.constant 0 : index
    %5 = vector.load %arg5[%c0_3, %c0_4] : memref<2x32xf32, #tpu.memory_space<vmem>>, vector<2x32xf32>
    %c0_5 = arith.constant 0 : index
    %c0_6 = arith.constant 0 : index
    %6 = vector.load %arg6[%c0_5, %c0_6] : memref<2x32xf32, #tpu.memory_space<vmem>>, vector<2x32xf32>
    %c0_7 = arith.constant 0 : index
    %c0_8 = arith.constant 0 : index
    %c0_9 = arith.constant 0 : index
    %7 = vector.load %arg4[%c0_7, %c0_8, %c0_9] : memref<1x2x32xf32, #tpu.memory_space<vmem>>, vector<1x2x32xf32>
    %8 = vector.shape_cast %7 : vector<1x2x32xf32> to vector<2x32xf32>
    %c8_i32 = arith.constant 8 : i32
    %9 = arith.muli %arg1, %c8_i32 : i32
    %c0_i32_10 = arith.constant 0 : i32
    %10 = arith.addi %9, %c0_i32_10 : i32
    %c0_11 = arith.constant 0 : index
    %c0_12 = arith.constant 0 : index
    %c0_13 = arith.constant 0 : index
    %c0_14 = arith.constant 0 : index
    %11 = vector.load %arg2[%c0_11, %c0_12, %c0_13, %c0_14] : memref<1x2x8x128xf32, #tpu.memory_space<vmem>>, vector<1x2x1x128xf32>
    %12 = vector.shape_cast %11 : vector<1x2x1x128xf32> to vector<2x128xf32>
    %13 = arith.truncf %5 : vector<2x32xf32> to vector<2x32xbf16>
    %cst = arith.constant dense<0.000000e+00> : vector<2x128xf32>
    %14 = tpu.matmul %13, %4, %cst {dimension_numbers = #tpu.dot_dimension_numbers<[1], [0], [0], [1], [0, 0, 1, 1], [], []>} : vector<2x32xbf16>, vector<32x128xbf16>, vector<2x128xf32> -> vector<2x128xf32>
    %15 = arith.addf %12, %14 : vector<2x128xf32>
    %16 = vector.extract_strided_slice %15 {offsets = [0, 0], sizes = [2, 32], strides = [1, 1]} : vector<2x128xf32> to vector<2x32xf32>
    %17 = arith.negf %16 : vector<2x32xf32>
    %18 = math.exp %17 : vector<2x32xf32>
    %cst_15 = arith.constant 1.000000e+00 : f32
    %19 = vector.broadcast %cst_15 : f32 to vector<2x32xf32>
    %20 = arith.addf %19, %18 : vector<2x32xf32>
    %21 = arith.divf %19, %20 : vector<2x32xf32>
    %22 = vector.extract_strided_slice %15 {offsets = [0, 32], sizes = [2, 32], strides = [1, 1]} : vector<2x128xf32> to vector<2x32xf32>
    %23 = arith.negf %22 : vector<2x32xf32>
    %24 = math.exp %23 : vector<2x32xf32>
    %cst_16 = arith.constant 1.000000e+00 : f32
    %25 = vector.broadcast %cst_16 : f32 to vector<2x32xf32>
    %26 = arith.addf %25, %24 : vector<2x32xf32>
    %27 = arith.divf %25, %26 : vector<2x32xf32>
    %28 = vector.extract_strided_slice %15 {offsets = [0, 64], sizes = [2, 32], strides = [1, 1]} : vector<2x128xf32> to vector<2x32xf32>
    %29 = math.tanh %28 : vector<2x32xf32>
    %30 = vector.extract_strided_slice %15 {offsets = [0, 96], sizes = [2, 32], strides = [1, 1]} : vector<2x128xf32> to vector<2x32xf32>
    %31 = arith.negf %30 : vector<2x32xf32>
    %32 = math.exp %31 : vector<2x32xf32>
    %cst_17 = arith.constant 1.000000e+00 : f32
    %33 = vector.broadcast %cst_17 : f32 to vector<2x32xf32>
    %34 = arith.addf %33, %32 : vector<2x32xf32>
    %35 = arith.divf %33, %34 : vector<2x32xf32>
    %36 = arith.mulf %27, %6 : vector<2x32xf32>
    %37 = arith.mulf %21, %29 : vector<2x32xf32>
    %38 = arith.addf %36, %37 : vector<2x32xf32>
    %39 = math.tanh %38 : vector<2x32xf32>
    %40 = arith.mulf %35, %39 : vector<2x32xf32>
    %c8_i32_18 = arith.constant 8 : i32
    %41 = arith.cmpi slt, %10, %c8_i32_18 : i32
    %cst_19 = arith.constant 0.000000e+00 : f32
    %42 = vector.broadcast %cst_19 : f32 to vector<2x32xf32>
    %43 = arith.select %41, %40, %42 : vector<2x32xf32>
    %44 = arith.addf %8, %43 : vector<2x32xf32>
    %c8_i32_20 = arith.constant 8 : i32
    %45 = arith.muli %arg1, %c8_i32_20 : i32
    %c1_i32 = arith.constant 1 : i32
    %46 = arith.addi %45, %c1_i32 : i32
    %c0_21 = arith.constant 0 : index
    %c0_22 = arith.constant 0 : index
    %c1 = arith.constant 1 : index
    %c0_23 = arith.constant 0 : index
    %47 = vector.load %arg2[%c0_21, %c0_22, %c1, %c0_23] : memref<1x2x8x128xf32, #tpu.memory_space<vmem>>, vector<1x2x1x128xf32>
    %48 = vector.shape_cast %47 : vector<1x2x1x128xf32> to vector<2x128xf32>
    %49 = arith.truncf %40 : vector<2x32xf32> to vector<2x32xbf16>
    %cst_24 = arith.constant dense<0.000000e+00> : vector<2x128xf32>
    %50 = tpu.matmul %49, %4, %cst_24 {dimension_numbers = #tpu.dot_dimension_numbers<[1], [0], [0], [1], [0, 0, 1, 1], [], []>} : vector<2x32xbf16>, vector<32x128xbf16>, vector<2x128xf32> -> vector<2x128xf32>
    %51 = arith.addf %48, %50 : vector<2x128xf32>
    %52 = vector.extract_strided_slice %51 {offsets = [0, 0], sizes = [2, 32], strides = [1, 1]} : vector<2x128xf32> to vector<2x32xf32>
    %53 = arith.negf %52 : vector<2x32xf32>
    %54 = math.exp %53 : vector<2x32xf32>
    %cst_25 = arith.constant 1.000000e+00 : f32
    %55 = vector.broadcast %cst_25 : f32 to vector<2x32xf32>
    %56 = arith.addf %55, %54 : vector<2x32xf32>
    %57 = arith.divf %55, %56 : vector<2x32xf32>
    %58 = vector.extract_strided_slice %51 {offsets = [0, 32], sizes = [2, 32], strides = [1, 1]} : vector<2x128xf32> to vector<2x32xf32>
    %59 = arith.negf %58 : vector<2x32xf32>
    %60 = math.exp %59 : vector<2x32xf32>
    %cst_26 = arith.constant 1.000000e+00 : f32
    %61 = vector.broadcast %cst_26 : f32 to vector<2x32xf32>
    %62 = arith.addf %61, %60 : vector<2x32xf32>
    %63 = arith.divf %61, %62 : vector<2x32xf32>
    %64 = vector.extract_strided_slice %51 {offsets = [0, 64], sizes = [2, 32], strides = [1, 1]} : vector<2x128xf32> to vector<2x32xf32>
    %65 = math.tanh %64 : vector<2x32xf32>
    %66 = vector.extract_strided_slice %51 {offsets = [0, 96], sizes = [2, 32], strides = [1, 1]} : vector<2x128xf32> to vector<2x32xf32>
    %67 = arith.negf %66 : vector<2x32xf32>
    %68 = math.exp %67 : vector<2x32xf32>
    %cst_27 = arith.constant 1.000000e+00 : f32
    %69 = vector.broadcast %cst_27 : f32 to vector<2x32xf32>
    %70 = arith.addf %69, %68 : vector<2x32xf32>
    %71 = arith.divf %69, %70 : vector<2x32xf32>
    %72 = arith.mulf %63, %38 : vector<2x32xf32>
    %73 = arith.mulf %57, %65 : vector<2x32xf32>
    %74 = arith.addf %72, %73 : vector<2x32xf32>
    %75 = math.tanh %74 : vector<2x32xf32>
    %76 = arith.mulf %71, %75 : vector<2x32xf32>
    %c8_i32_28 = arith.constant 8 : i32
    %77 = arith.cmpi slt, %46, %c8_i32_28 : i32
    %cst_29 = arith.constant 0.000000e+00 : f32
    %78 = vector.broadcast %cst_29 : f32 to vector<2x32xf32>
    %79 = arith.select %77, %76, %78 : vector<2x32xf32>
    %80 = arith.addf %44, %79 : vector<2x32xf32>
    %c8_i32_30 = arith.constant 8 : i32
    %81 = arith.muli %arg1, %c8_i32_30 : i32
    %c2_i32 = arith.constant 2 : i32
    %82 = arith.addi %81, %c2_i32 : i32
    %c0_31 = arith.constant 0 : index
    %c0_32 = arith.constant 0 : index
    %c2 = arith.constant 2 : index
    %c0_33 = arith.constant 0 : index
    %83 = vector.load %arg2[%c0_31, %c0_32, %c2, %c0_33] : memref<1x2x8x128xf32, #tpu.memory_space<vmem>>, vector<1x2x1x128xf32>
    %84 = vector.shape_cast %83 : vector<1x2x1x128xf32> to vector<2x128xf32>
    %85 = arith.truncf %76 : vector<2x32xf32> to vector<2x32xbf16>
    %cst_34 = arith.constant dense<0.000000e+00> : vector<2x128xf32>
    %86 = tpu.matmul %85, %4, %cst_34 {dimension_numbers = #tpu.dot_dimension_numbers<[1], [0], [0], [1], [0, 0, 1, 1], [], []>} : vector<2x32xbf16>, vector<32x128xbf16>, vector<2x128xf32> -> vector<2x128xf32>
    %87 = arith.addf %84, %86 : vector<2x128xf32>
    %88 = vector.extract_strided_slice %87 {offsets = [0, 0], sizes = [2, 32], strides = [1, 1]} : vector<2x128xf32> to vector<2x32xf32>
    %89 = arith.negf %88 : vector<2x32xf32>
    %90 = math.exp %89 : vector<2x32xf32>
    %cst_35 = arith.constant 1.000000e+00 : f32
    %91 = vector.broadcast %cst_35 : f32 to vector<2x32xf32>
    %92 = arith.addf %91, %90 : vector<2x32xf32>
    %93 = arith.divf %91, %92 : vector<2x32xf32>
    %94 = vector.extract_strided_slice %87 {offsets = [0, 32], sizes = [2, 32], strides = [1, 1]} : vector<2x128xf32> to vector<2x32xf32>
    %95 = arith.negf %94 : vector<2x32xf32>
    %96 = math.exp %95 : vector<2x32xf32>
    %cst_36 = arith.constant 1.000000e+00 : f32
    %97 = vector.broadcast %cst_36 : f32 to vector<2x32xf32>
    %98 = arith.addf %97, %96 : vector<2x32xf32>
    %99 = arith.divf %97, %98 : vector<2x32xf32>
    %100 = vector.extract_strided_slice %87 {offsets = [0, 64], sizes = [2, 32], strides = [1, 1]} : vector<2x128xf32> to vector<2x32xf32>
    %101 = math.tanh %100 : vector<2x32xf32>
    %102 = vector.extract_strided_slice %87 {offsets = [0, 96], sizes = [2, 32], strides = [1, 1]} : vector<2x128xf32> to vector<2x32xf32>
    %103 = arith.negf %102 : vector<2x32xf32>
    %104 = math.exp %103 : vector<2x32xf32>
    %cst_37 = arith.constant 1.000000e+00 : f32
    %105 = vector.broadcast %cst_37 : f32 to vector<2x32xf32>
    %106 = arith.addf %105, %104 : vector<2x32xf32>
    %107 = arith.divf %105, %106 : vector<2x32xf32>
    %108 = arith.mulf %99, %74 : vector<2x32xf32>
    %109 = arith.mulf %93, %101 : vector<2x32xf32>
    %110 = arith.addf %108, %109 : vector<2x32xf32>
    %111 = math.tanh %110 : vector<2x32xf32>
    %112 = arith.mulf %107, %111 : vector<2x32xf32>
    %c8_i32_38 = arith.constant 8 : i32
    %113 = arith.cmpi slt, %82, %c8_i32_38 : i32
    %cst_39 = arith.constant 0.000000e+00 : f32
    %114 = vector.broadcast %cst_39 : f32 to vector<2x32xf32>
    %115 = arith.select %113, %112, %114 : vector<2x32xf32>
    %116 = arith.addf %80, %115 : vector<2x32xf32>
    %c8_i32_40 = arith.constant 8 : i32
    %117 = arith.muli %arg1, %c8_i32_40 : i32
    %c3_i32 = arith.constant 3 : i32
    %118 = arith.addi %117, %c3_i32 : i32
    %c0_41 = arith.constant 0 : index
    %c0_42 = arith.constant 0 : index
    %c3 = arith.constant 3 : index
    %c0_43 = arith.constant 0 : index
    %119 = vector.load %arg2[%c0_41, %c0_42, %c3, %c0_43] : memref<1x2x8x128xf32, #tpu.memory_space<vmem>>, vector<1x2x1x128xf32>
    %120 = vector.shape_cast %119 : vector<1x2x1x128xf32> to vector<2x128xf32>
    %121 = arith.truncf %112 : vector<2x32xf32> to vector<2x32xbf16>
    %cst_44 = arith.constant dense<0.000000e+00> : vector<2x128xf32>
    %122 = tpu.matmul %121, %4, %cst_44 {dimension_numbers = #tpu.dot_dimension_numbers<[1], [0], [0], [1], [0, 0, 1, 1], [], []>} : vector<2x32xbf16>, vector<32x128xbf16>, vector<2x128xf32> -> vector<2x128xf32>
    %123 = arith.addf %120, %122 : vector<2x128xf32>
    %124 = vector.extract_strided_slice %123 {offsets = [0, 0], sizes = [2, 32], strides = [1, 1]} : vector<2x128xf32> to vector<2x32xf32>
    %125 = arith.negf %124 : vector<2x32xf32>
    %126 = math.exp %125 : vector<2x32xf32>
    %cst_45 = arith.constant 1.000000e+00 : f32
    %127 = vector.broadcast %cst_45 : f32 to vector<2x32xf32>
    %128 = arith.addf %127, %126 : vector<2x32xf32>
    %129 = arith.divf %127, %128 : vector<2x32xf32>
    %130 = vector.extract_strided_slice %123 {offsets = [0, 32], sizes = [2, 32], strides = [1, 1]} : vector<2x128xf32> to vector<2x32xf32>
    %131 = arith.negf %130 : vector<2x32xf32>
    %132 = math.exp %131 : vector<2x32xf32>
    %cst_46 = arith.constant 1.000000e+00 : f32
    %133 = vector.broadcast %cst_46 : f32 to vector<2x32xf32>
    %134 = arith.addf %133, %132 : vector<2x32xf32>
    %135 = arith.divf %133, %134 : vector<2x32xf32>
    %136 = vector.extract_strided_slice %123 {offsets = [0, 64], sizes = [2, 32], strides = [1, 1]} : vector<2x128xf32> to vector<2x32xf32>
    %137 = math.tanh %136 : vector<2x32xf32>
    %138 = vector.extract_strided_slice %123 {offsets = [0, 96], sizes = [2, 32], strides = [1, 1]} : vector<2x128xf32> to vector<2x32xf32>
    %139 = arith.negf %138 : vector<2x32xf32>
    %140 = math.exp %139 : vector<2x32xf32>
    %cst_47 = arith.constant 1.000000e+00 : f32
    %141 = vector.broadcast %cst_47 : f32 to vector<2x32xf32>
    %142 = arith.addf %141, %140 : vector<2x32xf32>
    %143 = arith.divf %141, %142 : vector<2x32xf32>
    %144 = arith.mulf %135, %110 : vector<2x32xf32>
    %145 = arith.mulf %129, %137 : vector<2x32xf32>
    %146 = arith.addf %144, %145 : vector<2x32xf32>
    %147 = math.tanh %146 : vector<2x32xf32>
    %148 = arith.mulf %143, %147 : vector<2x32xf32>
    %c8_i32_48 = arith.constant 8 : i32
    %149 = arith.cmpi slt, %118, %c8_i32_48 : i32
    %cst_49 = arith.constant 0.000000e+00 : f32
    %150 = vector.broadcast %cst_49 : f32 to vector<2x32xf32>
    %151 = arith.select %149, %148, %150 : vector<2x32xf32>
    %152 = arith.addf %116, %151 : vector<2x32xf32>
    %c8_i32_50 = arith.constant 8 : i32
    %153 = arith.muli %arg1, %c8_i32_50 : i32
    %c4_i32 = arith.constant 4 : i32
    %154 = arith.addi %153, %c4_i32 : i32
    %c0_51 = arith.constant 0 : index
    %c0_52 = arith.constant 0 : index
    %c4 = arith.constant 4 : index
    %c0_53 = arith.constant 0 : index
    %155 = vector.load %arg2[%c0_51, %c0_52, %c4, %c0_53] : memref<1x2x8x128xf32, #tpu.memory_space<vmem>>, vector<1x2x1x128xf32>
    %156 = vector.shape_cast %155 : vector<1x2x1x128xf32> to vector<2x128xf32>
    %157 = arith.truncf %148 : vector<2x32xf32> to vector<2x32xbf16>
    %cst_54 = arith.constant dense<0.000000e+00> : vector<2x128xf32>
    %158 = tpu.matmul %157, %4, %cst_54 {dimension_numbers = #tpu.dot_dimension_numbers<[1], [0], [0], [1], [0, 0, 1, 1], [], []>} : vector<2x32xbf16>, vector<32x128xbf16>, vector<2x128xf32> -> vector<2x128xf32>
    %159 = arith.addf %156, %158 : vector<2x128xf32>
    %160 = vector.extract_strided_slice %159 {offsets = [0, 0], sizes = [2, 32], strides = [1, 1]} : vector<2x128xf32> to vector<2x32xf32>
    %161 = arith.negf %160 : vector<2x32xf32>
    %162 = math.exp %161 : vector<2x32xf32>
    %cst_55 = arith.constant 1.000000e+00 : f32
    %163 = vector.broadcast %cst_55 : f32 to vector<2x32xf32>
    %164 = arith.addf %163, %162 : vector<2x32xf32>
    %165 = arith.divf %163, %164 : vector<2x32xf32>
    %166 = vector.extract_strided_slice %159 {offsets = [0, 32], sizes = [2, 32], strides = [1, 1]} : vector<2x128xf32> to vector<2x32xf32>
    %167 = arith.negf %166 : vector<2x32xf32>
    %168 = math.exp %167 : vector<2x32xf32>
    %cst_56 = arith.constant 1.000000e+00 : f32
    %169 = vector.broadcast %cst_56 : f32 to vector<2x32xf32>
    %170 = arith.addf %169, %168 : vector<2x32xf32>
    %171 = arith.divf %169, %170 : vector<2x32xf32>
    %172 = vector.extract_strided_slice %159 {offsets = [0, 64], sizes = [2, 32], strides = [1, 1]} : vector<2x128xf32> to vector<2x32xf32>
    %173 = math.tanh %172 : vector<2x32xf32>
    %174 = vector.extract_strided_slice %159 {offsets = [0, 96], sizes = [2, 32], strides = [1, 1]} : vector<2x128xf32> to vector<2x32xf32>
    %175 = arith.negf %174 : vector<2x32xf32>
    %176 = math.exp %175 : vector<2x32xf32>
    %cst_57 = arith.constant 1.000000e+00 : f32
    %177 = vector.broadcast %cst_57 : f32 to vector<2x32xf32>
    %178 = arith.addf %177, %176 : vector<2x32xf32>
    %179 = arith.divf %177, %178 : vector<2x32xf32>
    %180 = arith.mulf %171, %146 : vector<2x32xf32>
    %181 = arith.mulf %165, %173 : vector<2x32xf32>
    %182 = arith.addf %180, %181 : vector<2x32xf32>
    %183 = math.tanh %182 : vector<2x32xf32>
    %184 = arith.mulf %179, %183 : vector<2x32xf32>
    %c8_i32_58 = arith.constant 8 : i32
    %185 = arith.cmpi slt, %154, %c8_i32_58 : i32
    %cst_59 = arith.constant 0.000000e+00 : f32
    %186 = vector.broadcast %cst_59 : f32 to vector<2x32xf32>
    %187 = arith.select %185, %184, %186 : vector<2x32xf32>
    %188 = arith.addf %152, %187 : vector<2x32xf32>
    %c8_i32_60 = arith.constant 8 : i32
    %189 = arith.muli %arg1, %c8_i32_60 : i32
    %c5_i32 = arith.constant 5 : i32
    %190 = arith.addi %189, %c5_i32 : i32
    %c0_61 = arith.constant 0 : index
    %c0_62 = arith.constant 0 : index
    %c5 = arith.constant 5 : index
    %c0_63 = arith.constant 0 : index
    %191 = vector.load %arg2[%c0_61, %c0_62, %c5, %c0_63] : memref<1x2x8x128xf32, #tpu.memory_space<vmem>>, vector<1x2x1x128xf32>
    %192 = vector.shape_cast %191 : vector<1x2x1x128xf32> to vector<2x128xf32>
    %193 = arith.truncf %184 : vector<2x32xf32> to vector<2x32xbf16>
    %cst_64 = arith.constant dense<0.000000e+00> : vector<2x128xf32>
    %194 = tpu.matmul %193, %4, %cst_64 {dimension_numbers = #tpu.dot_dimension_numbers<[1], [0], [0], [1], [0, 0, 1, 1], [], []>} : vector<2x32xbf16>, vector<32x128xbf16>, vector<2x128xf32> -> vector<2x128xf32>
    %195 = arith.addf %192, %194 : vector<2x128xf32>
    %196 = vector.extract_strided_slice %195 {offsets = [0, 0], sizes = [2, 32], strides = [1, 1]} : vector<2x128xf32> to vector<2x32xf32>
    %197 = arith.negf %196 : vector<2x32xf32>
    %198 = math.exp %197 : vector<2x32xf32>
    %cst_65 = arith.constant 1.000000e+00 : f32
    %199 = vector.broadcast %cst_65 : f32 to vector<2x32xf32>
    %200 = arith.addf %199, %198 : vector<2x32xf32>
    %201 = arith.divf %199, %200 : vector<2x32xf32>
    %202 = vector.extract_strided_slice %195 {offsets = [0, 32], sizes = [2, 32], strides = [1, 1]} : vector<2x128xf32> to vector<2x32xf32>
    %203 = arith.negf %202 : vector<2x32xf32>
    %204 = math.exp %203 : vector<2x32xf32>
    %cst_66 = arith.constant 1.000000e+00 : f32
    %205 = vector.broadcast %cst_66 : f32 to vector<2x32xf32>
    %206 = arith.addf %205, %204 : vector<2x32xf32>
    %207 = arith.divf %205, %206 : vector<2x32xf32>
    %208 = vector.extract_strided_slice %195 {offsets = [0, 64], sizes = [2, 32], strides = [1, 1]} : vector<2x128xf32> to vector<2x32xf32>
    %209 = math.tanh %208 : vector<2x32xf32>
    %210 = vector.extract_strided_slice %195 {offsets = [0, 96], sizes = [2, 32], strides = [1, 1]} : vector<2x128xf32> to vector<2x32xf32>
    %211 = arith.negf %210 : vector<2x32xf32>
    %212 = math.exp %211 : vector<2x32xf32>
    %cst_67 = arith.constant 1.000000e+00 : f32
    %213 = vector.broadcast %cst_67 : f32 to vector<2x32xf32>
    %214 = arith.addf %213, %212 : vector<2x32xf32>
    %215 = arith.divf %213, %214 : vector<2x32xf32>
    %216 = arith.mulf %207, %182 : vector<2x32xf32>
    %217 = arith.mulf %201, %209 : vector<2x32xf32>
    %218 = arith.addf %216, %217 : vector<2x32xf32>
    %219 = math.tanh %218 : vector<2x32xf32>
    %220 = arith.mulf %215, %219 : vector<2x32xf32>
    %c8_i32_68 = arith.constant 8 : i32
    %221 = arith.cmpi slt, %190, %c8_i32_68 : i32
    %cst_69 = arith.constant 0.000000e+00 : f32
    %222 = vector.broadcast %cst_69 : f32 to vector<2x32xf32>
    %223 = arith.select %221, %220, %222 : vector<2x32xf32>
    %224 = arith.addf %188, %223 : vector<2x32xf32>
    %c8_i32_70 = arith.constant 8 : i32
    %225 = arith.muli %arg1, %c8_i32_70 : i32
    %c6_i32 = arith.constant 6 : i32
    %226 = arith.addi %225, %c6_i32 : i32
    %c0_71 = arith.constant 0 : index
    %c0_72 = arith.constant 0 : index
    %c6 = arith.constant 6 : index
    %c0_73 = arith.constant 0 : index
    %227 = vector.load %arg2[%c0_71, %c0_72, %c6, %c0_73] : memref<1x2x8x128xf32, #tpu.memory_space<vmem>>, vector<1x2x1x128xf32>
    %228 = vector.shape_cast %227 : vector<1x2x1x128xf32> to vector<2x128xf32>
    %229 = arith.truncf %220 : vector<2x32xf32> to vector<2x32xbf16>
    %cst_74 = arith.constant dense<0.000000e+00> : vector<2x128xf32>
    %230 = tpu.matmul %229, %4, %cst_74 {dimension_numbers = #tpu.dot_dimension_numbers<[1], [0], [0], [1], [0, 0, 1, 1], [], []>} : vector<2x32xbf16>, vector<32x128xbf16>, vector<2x128xf32> -> vector<2x128xf32>
    %231 = arith.addf %228, %230 : vector<2x128xf32>
    %232 = vector.extract_strided_slice %231 {offsets = [0, 0], sizes = [2, 32], strides = [1, 1]} : vector<2x128xf32> to vector<2x32xf32>
    %233 = arith.negf %232 : vector<2x32xf32>
    %234 = math.exp %233 : vector<2x32xf32>
    %cst_75 = arith.constant 1.000000e+00 : f32
    %235 = vector.broadcast %cst_75 : f32 to vector<2x32xf32>
    %236 = arith.addf %235, %234 : vector<2x32xf32>
    %237 = arith.divf %235, %236 : vector<2x32xf32>
    %238 = vector.extract_strided_slice %231 {offsets = [0, 32], sizes = [2, 32], strides = [1, 1]} : vector<2x128xf32> to vector<2x32xf32>
    %239 = arith.negf %238 : vector<2x32xf32>
    %240 = math.exp %239 : vector<2x32xf32>
    %cst_76 = arith.constant 1.000000e+00 : f32
    %241 = vector.broadcast %cst_76 : f32 to vector<2x32xf32>
    %242 = arith.addf %241, %240 : vector<2x32xf32>
    %243 = arith.divf %241, %242 : vector<2x32xf32>
    %244 = vector.extract_strided_slice %231 {offsets = [0, 64], sizes = [2, 32], strides = [1, 1]} : vector<2x128xf32> to vector<2x32xf32>
    %245 = math.tanh %244 : vector<2x32xf32>
    %246 = vector.extract_strided_slice %231 {offsets = [0, 96], sizes = [2, 32], strides = [1, 1]} : vector<2x128xf32> to vector<2x32xf32>
    %247 = arith.negf %246 : vector<2x32xf32>
    %248 = math.exp %247 : vector<2x32xf32>
    %cst_77 = arith.constant 1.000000e+00 : f32
    %249 = vector.broadcast %cst_77 : f32 to vector<2x32xf32>
    %250 = arith.addf %249, %248 : vector<2x32xf32>
    %251 = arith.divf %249, %250 : vector<2x32xf32>
    %252 = arith.mulf %243, %218 : vector<2x32xf32>
    %253 = arith.mulf %237, %245 : vector<2x32xf32>
    %254 = arith.addf %252, %253 : vector<2x32xf32>
    %255 = math.tanh %254 : vector<2x32xf32>
    %256 = arith.mulf %251, %255 : vector<2x32xf32>
    %c8_i32_78 = arith.constant 8 : i32
    %257 = arith.cmpi slt, %226, %c8_i32_78 : i32
    %cst_79 = arith.constant 0.000000e+00 : f32
    %258 = vector.broadcast %cst_79 : f32 to vector<2x32xf32>
    %259 = arith.select %257, %256, %258 : vector<2x32xf32>
    %260 = arith.addf %224, %259 : vector<2x32xf32>
    %c8_i32_80 = arith.constant 8 : i32
    %261 = arith.muli %arg1, %c8_i32_80 : i32
    %c7_i32 = arith.constant 7 : i32
    %262 = arith.addi %261, %c7_i32 : i32
    %c0_81 = arith.constant 0 : index
    %c0_82 = arith.constant 0 : index
    %c7 = arith.constant 7 : index
    %c0_83 = arith.constant 0 : index
    %263 = vector.load %arg2[%c0_81, %c0_82, %c7, %c0_83] : memref<1x2x8x128xf32, #tpu.memory_space<vmem>>, vector<1x2x1x128xf32>
    %264 = vector.shape_cast %263 : vector<1x2x1x128xf32> to vector<2x128xf32>
    %265 = arith.truncf %256 : vector<2x32xf32> to vector<2x32xbf16>
    %cst_84 = arith.constant dense<0.000000e+00> : vector<2x128xf32>
    %266 = tpu.matmul %265, %4, %cst_84 {dimension_numbers = #tpu.dot_dimension_numbers<[1], [0], [0], [1], [0, 0, 1, 1], [], []>} : vector<2x32xbf16>, vector<32x128xbf16>, vector<2x128xf32> -> vector<2x128xf32>
    %267 = arith.addf %264, %266 : vector<2x128xf32>
    %268 = vector.extract_strided_slice %267 {offsets = [0, 0], sizes = [2, 32], strides = [1, 1]} : vector<2x128xf32> to vector<2x32xf32>
    %269 = arith.negf %268 : vector<2x32xf32>
    %270 = math.exp %269 : vector<2x32xf32>
    %cst_85 = arith.constant 1.000000e+00 : f32
    %271 = vector.broadcast %cst_85 : f32 to vector<2x32xf32>
    %272 = arith.addf %271, %270 : vector<2x32xf32>
    %273 = arith.divf %271, %272 : vector<2x32xf32>
    %274 = vector.extract_strided_slice %267 {offsets = [0, 32], sizes = [2, 32], strides = [1, 1]} : vector<2x128xf32> to vector<2x32xf32>
    %275 = arith.negf %274 : vector<2x32xf32>
    %276 = math.exp %275 : vector<2x32xf32>
    %cst_86 = arith.constant 1.000000e+00 : f32
    %277 = vector.broadcast %cst_86 : f32 to vector<2x32xf32>
    %278 = arith.addf %277, %276 : vector<2x32xf32>
    %279 = arith.divf %277, %278 : vector<2x32xf32>
    %280 = vector.extract_strided_slice %267 {offsets = [0, 64], sizes = [2, 32], strides = [1, 1]} : vector<2x128xf32> to vector<2x32xf32>
    %281 = math.tanh %280 : vector<2x32xf32>
    %282 = vector.extract_strided_slice %267 {offsets = [0, 96], sizes = [2, 32], strides = [1, 1]} : vector<2x128xf32> to vector<2x32xf32>
    %283 = arith.negf %282 : vector<2x32xf32>
    %284 = math.exp %283 : vector<2x32xf32>
    %cst_87 = arith.constant 1.000000e+00 : f32
    %285 = vector.broadcast %cst_87 : f32 to vector<2x32xf32>
    %286 = arith.addf %285, %284 : vector<2x32xf32>
    %287 = arith.divf %285, %286 : vector<2x32xf32>
    %288 = arith.mulf %279, %254 : vector<2x32xf32>
    %289 = arith.mulf %273, %281 : vector<2x32xf32>
    %290 = arith.addf %288, %289 : vector<2x32xf32>
    %291 = math.tanh %290 : vector<2x32xf32>
    %292 = arith.mulf %287, %291 : vector<2x32xf32>
    %c8_i32_88 = arith.constant 8 : i32
    %293 = arith.cmpi slt, %262, %c8_i32_88 : i32
    %cst_89 = arith.constant 0.000000e+00 : f32
    %294 = vector.broadcast %cst_89 : f32 to vector<2x32xf32>
    %295 = arith.select %293, %292, %294 : vector<2x32xf32>
    %296 = arith.addf %260, %295 : vector<2x32xf32>
    %c0_90 = arith.constant 0 : index
    %c0_91 = arith.constant 0 : index
    %297 = vector.load %arg5[%c0_90, %c0_91] : memref<2x32xf32, #tpu.memory_space<vmem>>, vector<2x32xf32>
    tpu.vector_store %arg5[%c0_90, %c0_91], %292 {strides = array<i32>} : memref<2x32xf32, #tpu.memory_space<vmem>>, vector<2x32xf32>,
    %c0_92 = arith.constant 0 : index
    %c0_93 = arith.constant 0 : index
    %298 = vector.load %arg6[%c0_92, %c0_93] : memref<2x32xf32, #tpu.memory_space<vmem>>, vector<2x32xf32>
    tpu.vector_store %arg6[%c0_92, %c0_93], %290 {strides = array<i32>} : memref<2x32xf32, #tpu.memory_space<vmem>>, vector<2x32xf32>,
    %c0_94 = arith.constant 0 : index
    %c0_95 = arith.constant 0 : index
    %c0_96 = arith.constant 0 : index
    %299 = vector.load %arg4[%c0_94, %c0_95, %c0_96] : memref<1x2x32xf32, #tpu.memory_space<vmem>>, vector<1x2x32xf32>
    %300 = vector.shape_cast %299 : vector<1x2x32xf32> to vector<2x32xf32>
    %301 = vector.shape_cast %296 : vector<2x32xf32> to vector<1x2x32xf32>
    tpu.vector_store %arg4[%c0_94, %c0_95, %c0_96], %301 {strides = array<i32>} : memref<1x2x32xf32, #tpu.memory_space<vmem>>, vector<1x2x32xf32>,
    return
  }
  func.func @transform_0(%arg0: i32, %arg1: i32) -> (i32, i32, i32, i32) {
    %c0_i32 = arith.constant 0 : i32
    %c0_i32_0 = arith.constant 0 : i32
    %c0_i32_1 = arith.constant 0 : i32
    return %arg0, %c0_i32, %arg1, %c0_i32_0 : i32, i32, i32, i32
  }
  func.func @transform_1(%arg0: i32, %arg1: i32) -> (i32, i32, i32) {
    %c0_i32 = arith.constant 0 : i32
    %c0_i32_0 = arith.constant 0 : i32
    %c0_i32_1 = arith.constant 0 : i32
    return %arg0, %c0_i32, %c0_i32_0 : i32, i32, i32
  }
  func.func @transform_2(%arg0: i32, %arg1: i32) -> (i32, i32, i32) {
    %c0_i32 = arith.constant 0 : i32
    %c0_i32_0 = arith.constant 0 : i32
    %c0_i32_1 = arith.constant 0 : i32
    return %arg0, %c0_i32, %c0_i32_0 : i32, i32, i32
  }
}

module attributes {stable_mosaic.version = 11 : i64} {
  func.func @_linear_kernel(%arg0: i32, %arg1: i32, %arg2: memref<14x32xf32, #tpu.memory_space<vmem>>, %arg3: memref<32x128xbf16, #tpu.memory_space<vmem>>, %arg4: memref<1x128xf32, #tpu.memory_space<vmem>>, %arg5: memref<14x128xf32, #tpu.memory_space<vmem>>) attributes {dimension_semantics = [#tpu.dimension_semantics<parallel>, #tpu.dimension_semantics<parallel>], iteration_bounds = array<i64: 1, 1>, scalar_prefetch = 0 : i64, scratch_operands = 0 : i64, tpu.core_type = #tpu.core_type<tc>, window_params = [{transform_indices = @transform_0, window_bounds = array<i64: 14, 32>}, {transform_indices = @transform_1, window_bounds = array<i64: 32, 128>}, {transform_indices = @transform_2, window_bounds = array<i64: 1, 128>}, {transform_indices = @transform_3, window_bounds = array<i64: 14, 128>}]} {
    %c0 = arith.constant 0 : index
    %c0_0 = arith.constant 0 : index
    %0 = vector.load %arg2[%c0, %c0_0] : memref<14x32xf32, #tpu.memory_space<vmem>>, vector<14x32xf32>
    %1 = arith.truncf %0 : vector<14x32xf32> to vector<14x32xbf16>
    %c0_1 = arith.constant 0 : index
    %c0_2 = arith.constant 0 : index
    %2 = vector.load %arg3[%c0_1, %c0_2] : memref<32x128xbf16, #tpu.memory_space<vmem>>, vector<32x128xbf16>
    %cst = arith.constant dense<0.000000e+00> : vector<14x128xf32>
    %3 = tpu.matmul %1, %2, %cst {dimension_numbers = #tpu.dot_dimension_numbers<[1], [0], [0], [1], [0, 0, 1, 1], [], []>} : vector<14x32xbf16>, vector<32x128xbf16>, vector<14x128xf32> -> vector<14x128xf32>
    %c0_3 = arith.constant 0 : index
    %c0_4 = arith.constant 0 : index
    %4 = vector.load %arg4[%c0_3, %c0_4] : memref<1x128xf32, #tpu.memory_space<vmem>>, vector<1x128xf32>
    %5 = vector.broadcast %4 : vector<1x128xf32> to vector<14x128xf32>
    %6 = arith.addf %3, %5 : vector<14x128xf32>
    %c0_5 = arith.constant 0 : index
    %c0_6 = arith.constant 0 : index
    %7 = vector.load %arg5[%c0_5, %c0_6] : memref<14x128xf32, #tpu.memory_space<vmem>>, vector<14x128xf32>
    tpu.vector_store %arg5[%c0_5, %c0_6], %6 {strides = array<i32>} : memref<14x128xf32, #tpu.memory_space<vmem>>, vector<14x128xf32>,
    return
  }
  func.func @transform_0(%arg0: i32, %arg1: i32) -> (i32, i32) {
    %c0_i32 = arith.constant 0 : i32
    %c0_i32_0 = arith.constant 0 : i32
    return %arg0, %c0_i32 : i32, i32
  }
  func.func @transform_1(%arg0: i32, %arg1: i32) -> (i32, i32) {
    %c0_i32 = arith.constant 0 : i32
    %c0_i32_0 = arith.constant 0 : i32
    return %c0_i32, %arg1 : i32, i32
  }
  func.func @transform_2(%arg0: i32, %arg1: i32) -> (i32, i32) {
    %c0_i32 = arith.constant 0 : i32
    %c0_i32_0 = arith.constant 0 : i32
    return %c0_i32, %arg1 : i32, i32
  }
  func.func @transform_3(%arg0: i32, %arg1: i32) -> (i32, i32) {
    %c0_i32 = arith.constant 0 : i32
    return %arg0, %arg1 : i32, i32
  }
}

module attributes {stable_mosaic.version = 11 : i64} {
  func.func @_decoder_kernel(%arg0: i32, %arg1: memref<2x7x128xf32, #tpu.memory_space<vmem>>, %arg2: memref<2x128xf32, #tpu.memory_space<vmem>>, %arg3: memref<32x128xbf16, #tpu.memory_space<vmem>>, %arg4: memref<2x7x32xf32, #tpu.memory_space<vmem>>, %arg5: memref<2x32xf32, #tpu.memory_space<vmem>>, %arg6: memref<2x32xf32, #tpu.memory_space<vmem>>) attributes {dimension_semantics = [#tpu.dimension_semantics<arbitrary>], iteration_bounds = array<i64: 1>, scalar_prefetch = 0 : i64, scratch_operands = 2 : i64, tpu.core_type = #tpu.core_type<tc>, window_params = [{transform_indices = @transform_0, window_bounds = array<i64: 2, 7, 128>}, {pipeline_mode = #tpu.pipeline_mode<synchronous>, transform_indices = @transform_1, window_bounds = array<i64: 2, 128>}, {pipeline_mode = #tpu.pipeline_mode<synchronous>, transform_indices = @transform_2, window_bounds = array<i64: 32, 128>}, {transform_indices = @transform_3, window_bounds = array<i64: 2, 7, 32>}]} {
    %c0_i32 = arith.constant 0 : i32
    %0 = arith.cmpi eq, %arg0, %c0_i32 : i32
    %1 = arith.extui %0 : i1 to i32
    %c0_i32_0 = arith.constant 0 : i32
    %2 = arith.cmpi ne, %1, %c0_i32_0 : i32
    scf.if %2 {
      %cst_75 = arith.constant 0.000000e+00 : f32
      %247 = vector.broadcast %cst_75 : f32 to vector<2x32xf32>
      %c0_76 = arith.constant 0 : index
      %c0_77 = arith.constant 0 : index
      %248 = vector.load %arg5[%c0_76, %c0_77] : memref<2x32xf32, #tpu.memory_space<vmem>>, vector<2x32xf32>
      tpu.vector_store %arg5[%c0_76, %c0_77], %247 {strides = array<i32>} : memref<2x32xf32, #tpu.memory_space<vmem>>, vector<2x32xf32>,
      %cst_78 = arith.constant 0.000000e+00 : f32
      %249 = vector.broadcast %cst_78 : f32 to vector<2x32xf32>
      %c0_79 = arith.constant 0 : index
      %c0_80 = arith.constant 0 : index
      %250 = vector.load %arg6[%c0_79, %c0_80] : memref<2x32xf32, #tpu.memory_space<vmem>>, vector<2x32xf32>
      tpu.vector_store %arg6[%c0_79, %c0_80], %249 {strides = array<i32>} : memref<2x32xf32, #tpu.memory_space<vmem>>, vector<2x32xf32>,
    } else {
    }
    %c0 = arith.constant 0 : index
    %c0_1 = arith.constant 0 : index
    %3 = vector.load %arg3[%c0, %c0_1] : memref<32x128xbf16, #tpu.memory_space<vmem>>, vector<32x128xbf16>
    %c0_2 = arith.constant 0 : index
    %c0_3 = arith.constant 0 : index
    %4 = vector.load %arg2[%c0_2, %c0_3] : memref<2x128xf32, #tpu.memory_space<vmem>>, vector<2x128xf32>
    %c0_4 = arith.constant 0 : index
    %c0_5 = arith.constant 0 : index
    %5 = vector.load %arg5[%c0_4, %c0_5] : memref<2x32xf32, #tpu.memory_space<vmem>>, vector<2x32xf32>
    %c0_6 = arith.constant 0 : index
    %c0_7 = arith.constant 0 : index
    %6 = vector.load %arg6[%c0_6, %c0_7] : memref<2x32xf32, #tpu.memory_space<vmem>>, vector<2x32xf32>
    %c0_8 = arith.constant 0 : index
    %c0_9 = arith.constant 0 : index
    %c0_10 = arith.constant 0 : index
    %7 = vector.load %arg1[%c0_8, %c0_9, %c0_10] : memref<2x7x128xf32, #tpu.memory_space<vmem>>, vector<2x1x128xf32>
    %8 = vector.shape_cast %7 : vector<2x1x128xf32> to vector<2x128xf32>
    %9 = arith.addf %8, %4 : vector<2x128xf32>
    %10 = arith.truncf %5 : vector<2x32xf32> to vector<2x32xbf16>
    %cst = arith.constant dense<0.000000e+00> : vector<2x128xf32>
    %11 = tpu.matmul %10, %3, %cst {dimension_numbers = #tpu.dot_dimension_numbers<[1], [0], [0], [1], [0, 0, 1, 1], [], []>} : vector<2x32xbf16>, vector<32x128xbf16>, vector<2x128xf32> -> vector<2x128xf32>
    %12 = arith.addf %9, %11 : vector<2x128xf32>
    %13 = vector.extract_strided_slice %12 {offsets = [0, 0], sizes = [2, 32], strides = [1, 1]} : vector<2x128xf32> to vector<2x32xf32>
    %14 = arith.negf %13 : vector<2x32xf32>
    %15 = math.exp %14 : vector<2x32xf32>
    %cst_11 = arith.constant 1.000000e+00 : f32
    %16 = vector.broadcast %cst_11 : f32 to vector<2x32xf32>
    %17 = arith.addf %16, %15 : vector<2x32xf32>
    %18 = arith.divf %16, %17 : vector<2x32xf32>
    %19 = vector.extract_strided_slice %12 {offsets = [0, 32], sizes = [2, 32], strides = [1, 1]} : vector<2x128xf32> to vector<2x32xf32>
    %20 = arith.negf %19 : vector<2x32xf32>
    %21 = math.exp %20 : vector<2x32xf32>
    %cst_12 = arith.constant 1.000000e+00 : f32
    %22 = vector.broadcast %cst_12 : f32 to vector<2x32xf32>
    %23 = arith.addf %22, %21 : vector<2x32xf32>
    %24 = arith.divf %22, %23 : vector<2x32xf32>
    %25 = vector.extract_strided_slice %12 {offsets = [0, 64], sizes = [2, 32], strides = [1, 1]} : vector<2x128xf32> to vector<2x32xf32>
    %26 = math.tanh %25 : vector<2x32xf32>
    %27 = vector.extract_strided_slice %12 {offsets = [0, 96], sizes = [2, 32], strides = [1, 1]} : vector<2x128xf32> to vector<2x32xf32>
    %28 = arith.negf %27 : vector<2x32xf32>
    %29 = math.exp %28 : vector<2x32xf32>
    %cst_13 = arith.constant 1.000000e+00 : f32
    %30 = vector.broadcast %cst_13 : f32 to vector<2x32xf32>
    %31 = arith.addf %30, %29 : vector<2x32xf32>
    %32 = arith.divf %30, %31 : vector<2x32xf32>
    %33 = arith.mulf %24, %6 : vector<2x32xf32>
    %34 = arith.mulf %18, %26 : vector<2x32xf32>
    %35 = arith.addf %33, %34 : vector<2x32xf32>
    %36 = math.tanh %35 : vector<2x32xf32>
    %37 = arith.mulf %32, %36 : vector<2x32xf32>
    %c0_14 = arith.constant 0 : index
    %c0_15 = arith.constant 0 : index
    %c0_16 = arith.constant 0 : index
    %38 = vector.load %arg4[%c0_14, %c0_15, %c0_16] : memref<2x7x32xf32, #tpu.memory_space<vmem>>, vector<2x1x32xf32>
    %39 = vector.shape_cast %38 : vector<2x1x32xf32> to vector<2x32xf32>
    %40 = vector.shape_cast %37 : vector<2x32xf32> to vector<2x1x32xf32>
    tpu.vector_store %arg4[%c0_14, %c0_15, %c0_16], %40 {strides = array<i32>} : memref<2x7x32xf32, #tpu.memory_space<vmem>>, vector<2x1x32xf32>,
    %c0_17 = arith.constant 0 : index
    %c1 = arith.constant 1 : index
    %c0_18 = arith.constant 0 : index
    %41 = vector.load %arg1[%c0_17, %c1, %c0_18] : memref<2x7x128xf32, #tpu.memory_space<vmem>>, vector<2x1x128xf32>
    %42 = vector.shape_cast %41 : vector<2x1x128xf32> to vector<2x128xf32>
    %43 = arith.addf %42, %4 : vector<2x128xf32>
    %44 = arith.truncf %37 : vector<2x32xf32> to vector<2x32xbf16>
    %cst_19 = arith.constant dense<0.000000e+00> : vector<2x128xf32>
    %45 = tpu.matmul %44, %3, %cst_19 {dimension_numbers = #tpu.dot_dimension_numbers<[1], [0], [0], [1], [0, 0, 1, 1], [], []>} : vector<2x32xbf16>, vector<32x128xbf16>, vector<2x128xf32> -> vector<2x128xf32>
    %46 = arith.addf %43, %45 : vector<2x128xf32>
    %47 = vector.extract_strided_slice %46 {offsets = [0, 0], sizes = [2, 32], strides = [1, 1]} : vector<2x128xf32> to vector<2x32xf32>
    %48 = arith.negf %47 : vector<2x32xf32>
    %49 = math.exp %48 : vector<2x32xf32>
    %cst_20 = arith.constant 1.000000e+00 : f32
    %50 = vector.broadcast %cst_20 : f32 to vector<2x32xf32>
    %51 = arith.addf %50, %49 : vector<2x32xf32>
    %52 = arith.divf %50, %51 : vector<2x32xf32>
    %53 = vector.extract_strided_slice %46 {offsets = [0, 32], sizes = [2, 32], strides = [1, 1]} : vector<2x128xf32> to vector<2x32xf32>
    %54 = arith.negf %53 : vector<2x32xf32>
    %55 = math.exp %54 : vector<2x32xf32>
    %cst_21 = arith.constant 1.000000e+00 : f32
    %56 = vector.broadcast %cst_21 : f32 to vector<2x32xf32>
    %57 = arith.addf %56, %55 : vector<2x32xf32>
    %58 = arith.divf %56, %57 : vector<2x32xf32>
    %59 = vector.extract_strided_slice %46 {offsets = [0, 64], sizes = [2, 32], strides = [1, 1]} : vector<2x128xf32> to vector<2x32xf32>
    %60 = math.tanh %59 : vector<2x32xf32>
    %61 = vector.extract_strided_slice %46 {offsets = [0, 96], sizes = [2, 32], strides = [1, 1]} : vector<2x128xf32> to vector<2x32xf32>
    %62 = arith.negf %61 : vector<2x32xf32>
    %63 = math.exp %62 : vector<2x32xf32>
    %cst_22 = arith.constant 1.000000e+00 : f32
    %64 = vector.broadcast %cst_22 : f32 to vector<2x32xf32>
    %65 = arith.addf %64, %63 : vector<2x32xf32>
    %66 = arith.divf %64, %65 : vector<2x32xf32>
    %67 = arith.mulf %58, %35 : vector<2x32xf32>
    %68 = arith.mulf %52, %60 : vector<2x32xf32>
    %69 = arith.addf %67, %68 : vector<2x32xf32>
    %70 = math.tanh %69 : vector<2x32xf32>
    %71 = arith.mulf %66, %70 : vector<2x32xf32>
    %c0_23 = arith.constant 0 : index
    %c1_24 = arith.constant 1 : index
    %c0_25 = arith.constant 0 : index
    %72 = vector.load %arg4[%c0_23, %c1_24, %c0_25] : memref<2x7x32xf32, #tpu.memory_space<vmem>>, vector<2x1x32xf32>
    %73 = vector.shape_cast %72 : vector<2x1x32xf32> to vector<2x32xf32>
    %74 = vector.shape_cast %71 : vector<2x32xf32> to vector<2x1x32xf32>
    tpu.vector_store %arg4[%c0_23, %c1_24, %c0_25], %74 {strides = array<i32>} : memref<2x7x32xf32, #tpu.memory_space<vmem>>, vector<2x1x32xf32>,
    %c0_26 = arith.constant 0 : index
    %c2 = arith.constant 2 : index
    %c0_27 = arith.constant 0 : index
    %75 = vector.load %arg1[%c0_26, %c2, %c0_27] : memref<2x7x128xf32, #tpu.memory_space<vmem>>, vector<2x1x128xf32>
    %76 = vector.shape_cast %75 : vector<2x1x128xf32> to vector<2x128xf32>
    %77 = arith.addf %76, %4 : vector<2x128xf32>
    %78 = arith.truncf %71 : vector<2x32xf32> to vector<2x32xbf16>
    %cst_28 = arith.constant dense<0.000000e+00> : vector<2x128xf32>
    %79 = tpu.matmul %78, %3, %cst_28 {dimension_numbers = #tpu.dot_dimension_numbers<[1], [0], [0], [1], [0, 0, 1, 1], [], []>} : vector<2x32xbf16>, vector<32x128xbf16>, vector<2x128xf32> -> vector<2x128xf32>
    %80 = arith.addf %77, %79 : vector<2x128xf32>
    %81 = vector.extract_strided_slice %80 {offsets = [0, 0], sizes = [2, 32], strides = [1, 1]} : vector<2x128xf32> to vector<2x32xf32>
    %82 = arith.negf %81 : vector<2x32xf32>
    %83 = math.exp %82 : vector<2x32xf32>
    %cst_29 = arith.constant 1.000000e+00 : f32
    %84 = vector.broadcast %cst_29 : f32 to vector<2x32xf32>
    %85 = arith.addf %84, %83 : vector<2x32xf32>
    %86 = arith.divf %84, %85 : vector<2x32xf32>
    %87 = vector.extract_strided_slice %80 {offsets = [0, 32], sizes = [2, 32], strides = [1, 1]} : vector<2x128xf32> to vector<2x32xf32>
    %88 = arith.negf %87 : vector<2x32xf32>
    %89 = math.exp %88 : vector<2x32xf32>
    %cst_30 = arith.constant 1.000000e+00 : f32
    %90 = vector.broadcast %cst_30 : f32 to vector<2x32xf32>
    %91 = arith.addf %90, %89 : vector<2x32xf32>
    %92 = arith.divf %90, %91 : vector<2x32xf32>
    %93 = vector.extract_strided_slice %80 {offsets = [0, 64], sizes = [2, 32], strides = [1, 1]} : vector<2x128xf32> to vector<2x32xf32>
    %94 = math.tanh %93 : vector<2x32xf32>
    %95 = vector.extract_strided_slice %80 {offsets = [0, 96], sizes = [2, 32], strides = [1, 1]} : vector<2x128xf32> to vector<2x32xf32>
    %96 = arith.negf %95 : vector<2x32xf32>
    %97 = math.exp %96 : vector<2x32xf32>
    %cst_31 = arith.constant 1.000000e+00 : f32
    %98 = vector.broadcast %cst_31 : f32 to vector<2x32xf32>
    %99 = arith.addf %98, %97 : vector<2x32xf32>
    %100 = arith.divf %98, %99 : vector<2x32xf32>
    %101 = arith.mulf %92, %69 : vector<2x32xf32>
    %102 = arith.mulf %86, %94 : vector<2x32xf32>
    %103 = arith.addf %101, %102 : vector<2x32xf32>
    %104 = math.tanh %103 : vector<2x32xf32>
    %105 = arith.mulf %100, %104 : vector<2x32xf32>
    %c0_32 = arith.constant 0 : index
    %c2_33 = arith.constant 2 : index
    %c0_34 = arith.constant 0 : index
    %106 = vector.load %arg4[%c0_32, %c2_33, %c0_34] : memref<2x7x32xf32, #tpu.memory_space<vmem>>, vector<2x1x32xf32>
    %107 = vector.shape_cast %106 : vector<2x1x32xf32> to vector<2x32xf32>
    %108 = vector.shape_cast %105 : vector<2x32xf32> to vector<2x1x32xf32>
    tpu.vector_store %arg4[%c0_32, %c2_33, %c0_34], %108 {strides = array<i32>} : memref<2x7x32xf32, #tpu.memory_space<vmem>>, vector<2x1x32xf32>,
    %c0_35 = arith.constant 0 : index
    %c3 = arith.constant 3 : index
    %c0_36 = arith.constant 0 : index
    %109 = vector.load %arg1[%c0_35, %c3, %c0_36] : memref<2x7x128xf32, #tpu.memory_space<vmem>>, vector<2x1x128xf32>
    %110 = vector.shape_cast %109 : vector<2x1x128xf32> to vector<2x128xf32>
    %111 = arith.addf %110, %4 : vector<2x128xf32>
    %112 = arith.truncf %105 : vector<2x32xf32> to vector<2x32xbf16>
    %cst_37 = arith.constant dense<0.000000e+00> : vector<2x128xf32>
    %113 = tpu.matmul %112, %3, %cst_37 {dimension_numbers = #tpu.dot_dimension_numbers<[1], [0], [0], [1], [0, 0, 1, 1], [], []>} : vector<2x32xbf16>, vector<32x128xbf16>, vector<2x128xf32> -> vector<2x128xf32>
    %114 = arith.addf %111, %113 : vector<2x128xf32>
    %115 = vector.extract_strided_slice %114 {offsets = [0, 0], sizes = [2, 32], strides = [1, 1]} : vector<2x128xf32> to vector<2x32xf32>
    %116 = arith.negf %115 : vector<2x32xf32>
    %117 = math.exp %116 : vector<2x32xf32>
    %cst_38 = arith.constant 1.000000e+00 : f32
    %118 = vector.broadcast %cst_38 : f32 to vector<2x32xf32>
    %119 = arith.addf %118, %117 : vector<2x32xf32>
    %120 = arith.divf %118, %119 : vector<2x32xf32>
    %121 = vector.extract_strided_slice %114 {offsets = [0, 32], sizes = [2, 32], strides = [1, 1]} : vector<2x128xf32> to vector<2x32xf32>
    %122 = arith.negf %121 : vector<2x32xf32>
    %123 = math.exp %122 : vector<2x32xf32>
    %cst_39 = arith.constant 1.000000e+00 : f32
    %124 = vector.broadcast %cst_39 : f32 to vector<2x32xf32>
    %125 = arith.addf %124, %123 : vector<2x32xf32>
    %126 = arith.divf %124, %125 : vector<2x32xf32>
    %127 = vector.extract_strided_slice %114 {offsets = [0, 64], sizes = [2, 32], strides = [1, 1]} : vector<2x128xf32> to vector<2x32xf32>
    %128 = math.tanh %127 : vector<2x32xf32>
    %129 = vector.extract_strided_slice %114 {offsets = [0, 96], sizes = [2, 32], strides = [1, 1]} : vector<2x128xf32> to vector<2x32xf32>
    %130 = arith.negf %129 : vector<2x32xf32>
    %131 = math.exp %130 : vector<2x32xf32>
    %cst_40 = arith.constant 1.000000e+00 : f32
    %132 = vector.broadcast %cst_40 : f32 to vector<2x32xf32>
    %133 = arith.addf %132, %131 : vector<2x32xf32>
    %134 = arith.divf %132, %133 : vector<2x32xf32>
    %135 = arith.mulf %126, %103 : vector<2x32xf32>
    %136 = arith.mulf %120, %128 : vector<2x32xf32>
    %137 = arith.addf %135, %136 : vector<2x32xf32>
    %138 = math.tanh %137 : vector<2x32xf32>
    %139 = arith.mulf %134, %138 : vector<2x32xf32>
    %c0_41 = arith.constant 0 : index
    %c3_42 = arith.constant 3 : index
    %c0_43 = arith.constant 0 : index
    %140 = vector.load %arg4[%c0_41, %c3_42, %c0_43] : memref<2x7x32xf32, #tpu.memory_space<vmem>>, vector<2x1x32xf32>
    %141 = vector.shape_cast %140 : vector<2x1x32xf32> to vector<2x32xf32>
    %142 = vector.shape_cast %139 : vector<2x32xf32> to vector<2x1x32xf32>
    tpu.vector_store %arg4[%c0_41, %c3_42, %c0_43], %142 {strides = array<i32>} : memref<2x7x32xf32, #tpu.memory_space<vmem>>, vector<2x1x32xf32>,
    %c0_44 = arith.constant 0 : index
    %c4 = arith.constant 4 : index
    %c0_45 = arith.constant 0 : index
    %143 = vector.load %arg1[%c0_44, %c4, %c0_45] : memref<2x7x128xf32, #tpu.memory_space<vmem>>, vector<2x1x128xf32>
    %144 = vector.shape_cast %143 : vector<2x1x128xf32> to vector<2x128xf32>
    %145 = arith.addf %144, %4 : vector<2x128xf32>
    %146 = arith.truncf %139 : vector<2x32xf32> to vector<2x32xbf16>
    %cst_46 = arith.constant dense<0.000000e+00> : vector<2x128xf32>
    %147 = tpu.matmul %146, %3, %cst_46 {dimension_numbers = #tpu.dot_dimension_numbers<[1], [0], [0], [1], [0, 0, 1, 1], [], []>} : vector<2x32xbf16>, vector<32x128xbf16>, vector<2x128xf32> -> vector<2x128xf32>
    %148 = arith.addf %145, %147 : vector<2x128xf32>
    %149 = vector.extract_strided_slice %148 {offsets = [0, 0], sizes = [2, 32], strides = [1, 1]} : vector<2x128xf32> to vector<2x32xf32>
    %150 = arith.negf %149 : vector<2x32xf32>
    %151 = math.exp %150 : vector<2x32xf32>
    %cst_47 = arith.constant 1.000000e+00 : f32
    %152 = vector.broadcast %cst_47 : f32 to vector<2x32xf32>
    %153 = arith.addf %152, %151 : vector<2x32xf32>
    %154 = arith.divf %152, %153 : vector<2x32xf32>
    %155 = vector.extract_strided_slice %148 {offsets = [0, 32], sizes = [2, 32], strides = [1, 1]} : vector<2x128xf32> to vector<2x32xf32>
    %156 = arith.negf %155 : vector<2x32xf32>
    %157 = math.exp %156 : vector<2x32xf32>
    %cst_48 = arith.constant 1.000000e+00 : f32
    %158 = vector.broadcast %cst_48 : f32 to vector<2x32xf32>
    %159 = arith.addf %158, %157 : vector<2x32xf32>
    %160 = arith.divf %158, %159 : vector<2x32xf32>
    %161 = vector.extract_strided_slice %148 {offsets = [0, 64], sizes = [2, 32], strides = [1, 1]} : vector<2x128xf32> to vector<2x32xf32>
    %162 = math.tanh %161 : vector<2x32xf32>
    %163 = vector.extract_strided_slice %148 {offsets = [0, 96], sizes = [2, 32], strides = [1, 1]} : vector<2x128xf32> to vector<2x32xf32>
    %164 = arith.negf %163 : vector<2x32xf32>
    %165 = math.exp %164 : vector<2x32xf32>
    %cst_49 = arith.constant 1.000000e+00 : f32
    %166 = vector.broadcast %cst_49 : f32 to vector<2x32xf32>
    %167 = arith.addf %166, %165 : vector<2x32xf32>
    %168 = arith.divf %166, %167 : vector<2x32xf32>
    %169 = arith.mulf %160, %137 : vector<2x32xf32>
    %170 = arith.mulf %154, %162 : vector<2x32xf32>
    %171 = arith.addf %169, %170 : vector<2x32xf32>
    %172 = math.tanh %171 : vector<2x32xf32>
    %173 = arith.mulf %168, %172 : vector<2x32xf32>
    %c0_50 = arith.constant 0 : index
    %c4_51 = arith.constant 4 : index
    %c0_52 = arith.constant 0 : index
    %174 = vector.load %arg4[%c0_50, %c4_51, %c0_52] : memref<2x7x32xf32, #tpu.memory_space<vmem>>, vector<2x1x32xf32>
    %175 = vector.shape_cast %174 : vector<2x1x32xf32> to vector<2x32xf32>
    %176 = vector.shape_cast %173 : vector<2x32xf32> to vector<2x1x32xf32>
    tpu.vector_store %arg4[%c0_50, %c4_51, %c0_52], %176 {strides = array<i32>} : memref<2x7x32xf32, #tpu.memory_space<vmem>>, vector<2x1x32xf32>,
    %c0_53 = arith.constant 0 : index
    %c5 = arith.constant 5 : index
    %c0_54 = arith.constant 0 : index
    %177 = vector.load %arg1[%c0_53, %c5, %c0_54] : memref<2x7x128xf32, #tpu.memory_space<vmem>>, vector<2x1x128xf32>
    %178 = vector.shape_cast %177 : vector<2x1x128xf32> to vector<2x128xf32>
    %179 = arith.addf %178, %4 : vector<2x128xf32>
    %180 = arith.truncf %173 : vector<2x32xf32> to vector<2x32xbf16>
    %cst_55 = arith.constant dense<0.000000e+00> : vector<2x128xf32>
    %181 = tpu.matmul %180, %3, %cst_55 {dimension_numbers = #tpu.dot_dimension_numbers<[1], [0], [0], [1], [0, 0, 1, 1], [], []>} : vector<2x32xbf16>, vector<32x128xbf16>, vector<2x128xf32> -> vector<2x128xf32>
    %182 = arith.addf %179, %181 : vector<2x128xf32>
    %183 = vector.extract_strided_slice %182 {offsets = [0, 0], sizes = [2, 32], strides = [1, 1]} : vector<2x128xf32> to vector<2x32xf32>
    %184 = arith.negf %183 : vector<2x32xf32>
    %185 = math.exp %184 : vector<2x32xf32>
    %cst_56 = arith.constant 1.000000e+00 : f32
    %186 = vector.broadcast %cst_56 : f32 to vector<2x32xf32>
    %187 = arith.addf %186, %185 : vector<2x32xf32>
    %188 = arith.divf %186, %187 : vector<2x32xf32>
    %189 = vector.extract_strided_slice %182 {offsets = [0, 32], sizes = [2, 32], strides = [1, 1]} : vector<2x128xf32> to vector<2x32xf32>
    %190 = arith.negf %189 : vector<2x32xf32>
    %191 = math.exp %190 : vector<2x32xf32>
    %cst_57 = arith.constant 1.000000e+00 : f32
    %192 = vector.broadcast %cst_57 : f32 to vector<2x32xf32>
    %193 = arith.addf %192, %191 : vector<2x32xf32>
    %194 = arith.divf %192, %193 : vector<2x32xf32>
    %195 = vector.extract_strided_slice %182 {offsets = [0, 64], sizes = [2, 32], strides = [1, 1]} : vector<2x128xf32> to vector<2x32xf32>
    %196 = math.tanh %195 : vector<2x32xf32>
    %197 = vector.extract_strided_slice %182 {offsets = [0, 96], sizes = [2, 32], strides = [1, 1]} : vector<2x128xf32> to vector<2x32xf32>
    %198 = arith.negf %197 : vector<2x32xf32>
    %199 = math.exp %198 : vector<2x32xf32>
    %cst_58 = arith.constant 1.000000e+00 : f32
    %200 = vector.broadcast %cst_58 : f32 to vector<2x32xf32>
    %201 = arith.addf %200, %199 : vector<2x32xf32>
    %202 = arith.divf %200, %201 : vector<2x32xf32>
    %203 = arith.mulf %194, %171 : vector<2x32xf32>
    %204 = arith.mulf %188, %196 : vector<2x32xf32>
    %205 = arith.addf %203, %204 : vector<2x32xf32>
    %206 = math.tanh %205 : vector<2x32xf32>
    %207 = arith.mulf %202, %206 : vector<2x32xf32>
    %c0_59 = arith.constant 0 : index
    %c5_60 = arith.constant 5 : index
    %c0_61 = arith.constant 0 : index
    %208 = vector.load %arg4[%c0_59, %c5_60, %c0_61] : memref<2x7x32xf32, #tpu.memory_space<vmem>>, vector<2x1x32xf32>
    %209 = vector.shape_cast %208 : vector<2x1x32xf32> to vector<2x32xf32>
    %210 = vector.shape_cast %207 : vector<2x32xf32> to vector<2x1x32xf32>
    tpu.vector_store %arg4[%c0_59, %c5_60, %c0_61], %210 {strides = array<i32>} : memref<2x7x32xf32, #tpu.memory_space<vmem>>, vector<2x1x32xf32>,
    %c0_62 = arith.constant 0 : index
    %c6 = arith.constant 6 : index
    %c0_63 = arith.constant 0 : index
    %211 = vector.load %arg1[%c0_62, %c6, %c0_63] : memref<2x7x128xf32, #tpu.memory_space<vmem>>, vector<2x1x128xf32>
    %212 = vector.shape_cast %211 : vector<2x1x128xf32> to vector<2x128xf32>
    %213 = arith.addf %212, %4 : vector<2x128xf32>
    %214 = arith.truncf %207 : vector<2x32xf32> to vector<2x32xbf16>
    %cst_64 = arith.constant dense<0.000000e+00> : vector<2x128xf32>
    %215 = tpu.matmul %214, %3, %cst_64 {dimension_numbers = #tpu.dot_dimension_numbers<[1], [0], [0], [1], [0, 0, 1, 1], [], []>} : vector<2x32xbf16>, vector<32x128xbf16>, vector<2x128xf32> -> vector<2x128xf32>
    %216 = arith.addf %213, %215 : vector<2x128xf32>
    %217 = vector.extract_strided_slice %216 {offsets = [0, 0], sizes = [2, 32], strides = [1, 1]} : vector<2x128xf32> to vector<2x32xf32>
    %218 = arith.negf %217 : vector<2x32xf32>
    %219 = math.exp %218 : vector<2x32xf32>
    %cst_65 = arith.constant 1.000000e+00 : f32
    %220 = vector.broadcast %cst_65 : f32 to vector<2x32xf32>
    %221 = arith.addf %220, %219 : vector<2x32xf32>
    %222 = arith.divf %220, %221 : vector<2x32xf32>
    %223 = vector.extract_strided_slice %216 {offsets = [0, 32], sizes = [2, 32], strides = [1, 1]} : vector<2x128xf32> to vector<2x32xf32>
    %224 = arith.negf %223 : vector<2x32xf32>
    %225 = math.exp %224 : vector<2x32xf32>
    %cst_66 = arith.constant 1.000000e+00 : f32
    %226 = vector.broadcast %cst_66 : f32 to vector<2x32xf32>
    %227 = arith.addf %226, %225 : vector<2x32xf32>
    %228 = arith.divf %226, %227 : vector<2x32xf32>
    %229 = vector.extract_strided_slice %216 {offsets = [0, 64], sizes = [2, 32], strides = [1, 1]} : vector<2x128xf32> to vector<2x32xf32>
    %230 = math.tanh %229 : vector<2x32xf32>
    %231 = vector.extract_strided_slice %216 {offsets = [0, 96], sizes = [2, 32], strides = [1, 1]} : vector<2x128xf32> to vector<2x32xf32>
    %232 = arith.negf %231 : vector<2x32xf32>
    %233 = math.exp %232 : vector<2x32xf32>
    %cst_67 = arith.constant 1.000000e+00 : f32
    %234 = vector.broadcast %cst_67 : f32 to vector<2x32xf32>
    %235 = arith.addf %234, %233 : vector<2x32xf32>
    %236 = arith.divf %234, %235 : vector<2x32xf32>
    %237 = arith.mulf %228, %205 : vector<2x32xf32>
    %238 = arith.mulf %222, %230 : vector<2x32xf32>
    %239 = arith.addf %237, %238 : vector<2x32xf32>
    %240 = math.tanh %239 : vector<2x32xf32>
    %241 = arith.mulf %236, %240 : vector<2x32xf32>
    %c0_68 = arith.constant 0 : index
    %c6_69 = arith.constant 6 : index
    %c0_70 = arith.constant 0 : index
    %242 = vector.load %arg4[%c0_68, %c6_69, %c0_70] : memref<2x7x32xf32, #tpu.memory_space<vmem>>, vector<2x1x32xf32>
    %243 = vector.shape_cast %242 : vector<2x1x32xf32> to vector<2x32xf32>
    %244 = vector.shape_cast %241 : vector<2x32xf32> to vector<2x1x32xf32>
    tpu.vector_store %arg4[%c0_68, %c6_69, %c0_70], %244 {strides = array<i32>} : memref<2x7x32xf32, #tpu.memory_space<vmem>>, vector<2x1x32xf32>,
    %c0_71 = arith.constant 0 : index
    %c0_72 = arith.constant 0 : index
    %245 = vector.load %arg5[%c0_71, %c0_72] : memref<2x32xf32, #tpu.memory_space<vmem>>, vector<2x32xf32>
    tpu.vector_store %arg5[%c0_71, %c0_72], %241 {strides = array<i32>} : memref<2x32xf32, #tpu.memory_space<vmem>>, vector<2x32xf32>,
    %c0_73 = arith.constant 0 : index
    %c0_74 = arith.constant 0 : index
    %246 = vector.load %arg6[%c0_73, %c0_74] : memref<2x32xf32, #tpu.memory_space<vmem>>, vector<2x32xf32>
    tpu.vector_store %arg6[%c0_73, %c0_74], %239 {strides = array<i32>} : memref<2x32xf32, #tpu.memory_space<vmem>>, vector<2x32xf32>,
    return
  }
  func.func @transform_0(%arg0: i32) -> (i32, i32, i32) {
    %c0_i32 = arith.constant 0 : i32
    %c0_i32_0 = arith.constant 0 : i32
    %c0_i32_1 = arith.constant 0 : i32
    return %c0_i32, %arg0, %c0_i32_0 : i32, i32, i32
  }
  func.func @transform_1(%arg0: i32) -> (i32, i32) {
    %c0_i32 = arith.constant 0 : i32
    %c0_i32_0 = arith.constant 0 : i32
    %c0_i32_1 = arith.constant 0 : i32
    return %c0_i32, %c0_i32_0 : i32, i32
  }
  func.func @transform_2(%arg0: i32) -> (i32, i32) {
    %c0_i32 = arith.constant 0 : i32
    %c0_i32_0 = arith.constant 0 : i32
    %c0_i32_1 = arith.constant 0 : i32
    return %c0_i32, %c0_i32_0 : i32, i32
  }
  func.func @transform_3(%arg0: i32) -> (i32, i32, i32) {
    %c0_i32 = arith.constant 0 : i32
    %c0_i32_0 = arith.constant 0 : i32
    %c0_i32_1 = arith.constant 0 : i32
    return %c0_i32, %arg0, %c0_i32_0 : i32, i32, i32
  }
}

module attributes {stable_mosaic.version = 11 : i64} {
  func.func @_linear_kernel(%arg0: i32, %arg1: i32, %arg2: memref<14x32xf32, #tpu.memory_space<vmem>>, %arg3: memref<32x16xbf16, #tpu.memory_space<vmem>>, %arg4: memref<1x16xf32, #tpu.memory_space<vmem>>, %arg5: memref<14x16xf32, #tpu.memory_space<vmem>>) attributes {dimension_semantics = [#tpu.dimension_semantics<parallel>, #tpu.dimension_semantics<parallel>], iteration_bounds = array<i64: 1, 1>, scalar_prefetch = 0 : i64, scratch_operands = 0 : i64, tpu.core_type = #tpu.core_type<tc>, window_params = [{transform_indices = @transform_0, window_bounds = array<i64: 14, 32>}, {transform_indices = @transform_1, window_bounds = array<i64: 32, 16>}, {transform_indices = @transform_2, window_bounds = array<i64: 1, 16>}, {transform_indices = @transform_3, window_bounds = array<i64: 14, 16>}]} {
    %c0 = arith.constant 0 : index
    %c0_0 = arith.constant 0 : index
    %0 = vector.load %arg2[%c0, %c0_0] : memref<14x32xf32, #tpu.memory_space<vmem>>, vector<14x32xf32>
    %1 = arith.truncf %0 : vector<14x32xf32> to vector<14x32xbf16>
    %c0_1 = arith.constant 0 : index
    %c0_2 = arith.constant 0 : index
    %2 = vector.load %arg3[%c0_1, %c0_2] : memref<32x16xbf16, #tpu.memory_space<vmem>>, vector<32x16xbf16>
    %cst = arith.constant dense<0.000000e+00> : vector<14x16xf32>
    %3 = tpu.matmul %1, %2, %cst {dimension_numbers = #tpu.dot_dimension_numbers<[1], [0], [0], [1], [0, 0, 1, 1], [], []>} : vector<14x32xbf16>, vector<32x16xbf16>, vector<14x16xf32> -> vector<14x16xf32>
    %c0_3 = arith.constant 0 : index
    %c0_4 = arith.constant 0 : index
    %4 = vector.load %arg4[%c0_3, %c0_4] : memref<1x16xf32, #tpu.memory_space<vmem>>, vector<1x16xf32>
    %5 = vector.broadcast %4 : vector<1x16xf32> to vector<14x16xf32>
    %6 = arith.addf %3, %5 : vector<14x16xf32>
    %c0_5 = arith.constant 0 : index
    %c0_6 = arith.constant 0 : index
    %7 = vector.load %arg5[%c0_5, %c0_6] : memref<14x16xf32, #tpu.memory_space<vmem>>, vector<14x16xf32>
    tpu.vector_store %arg5[%c0_5, %c0_6], %6 {strides = array<i32>} : memref<14x16xf32, #tpu.memory_space<vmem>>, vector<14x16xf32>,
    return
  }
  func.func @transform_0(%arg0: i32, %arg1: i32) -> (i32, i32) {
    %c0_i32 = arith.constant 0 : i32
    %c0_i32_0 = arith.constant 0 : i32
    return %arg0, %c0_i32 : i32, i32
  }
  func.func @transform_1(%arg0: i32, %arg1: i32) -> (i32, i32) {
    %c0_i32 = arith.constant 0 : i32
    %c0_i32_0 = arith.constant 0 : i32
    return %c0_i32, %arg1 : i32, i32
  }
  func.func @transform_2(%arg0: i32, %arg1: i32) -> (i32, i32) {
    %c0_i32 = arith.constant 0 : i32
    %c0_i32_0 = arith.constant 0 : i32
    return %c0_i32, %arg1 : i32, i32
  }
  func.func @transform_3(%arg0: i32, %arg1: i32) -> (i32, i32) {
    %c0_i32 = arith.constant 0 : i32
    return %arg0, %arg1 : i32, i32
  }
}

</mosaic_0001>

<bundles_post_ra>
// kernel: base_attention_forward_train.8
= control target key start
LH: loop header
LB: loop body
LE: loop exit
PB: predicated region body
PF: predicated region fallthrough
CT: control target
= control target key end

     0   :  { %vm48_vm0 = vcmask 261120   ;;  %s175_s1 = inlined_call_operand.vmem [shape: bf16[32,256], index: 1, kind: input, shape index: {}]   ;;  %s176_s0 = inlined_call_operand.vmem [shape: f32[16,32], index: 0, kind: input, shape index: {}]   ;;  %s177_s2 = inlined_call_operand.vmem [shape: f32[1,256], index: 2, kind: input, shape index: {}]   ;;  %s178_s3 = inlined_call_operand.vmem [shape: f32[16,256], index: 3, kind: output, shape index: {}]  }
   0x1   :  { %v98_v0 = vld [vmem:[%s175_s1 + $0x10] sm:$0xf]  ;;  %v109_v1 = vld [vmem:[%s175_s1 + $0x14] sm:$0xf0]  ;;  %v108_v2 = vld [vmem:[%s175_s1 + $0x14] sm:$0xf] }
   0x2   :  { %v99_v3 = vor.u32 %v109_v1, %v98_v0  ;;  %v100_v4 = vld [vmem:[%s175_s1 + $0x18] sm:$0xf0]  ;;  %v90_v5 = vld [vmem:[%s175_s1] sm:$0xf]  ;;  %v107_v6 = vld [vmem:[%s175_s1 + $0x4] sm:$0xf0] }
   0x3   :  { %v103_v7 = vor.u32 %v108_v2, %v100_v4  ;;  %v106_v8 = vld [vmem:[%s175_s1 + $0x4] sm:$0xf]  ;;  %v92_v9 = vld [vmem:[%s175_s1 + $0x8] sm:$0xf0]  ;;  %v91_v10 = vor.u32 %v107_v6, %v90_v5  ;;  %v22_v15 = vld [vmem:[%s177_s2] sm:$0x3] }
   0x4   :  { %58 = vmatpush.bf16.msra.mxu0 %v99_v3  ;;  %v15_v11 = vld [vmem:[%s176_s0] sm:$0xff]  ;;  %v16_v12 = vld [vmem:[%s176_s0 + $0x8] sm:$0xff]  ;;  %v95_v13 = vor.u32 %v106_v8, %v92_v9  ;;  %v24_v16 = vperm.slane %v22_v15, 0  ;;  %v25_v17 = vperm.slane %v22_v15, 1 }
   0x5   :  { %72 = vmatpush.bf16.msra.mxu1 %v103_v7  ;;  %v17_v14 = vpack.c.bf16 %v16_v12, %v15_v11 }
   0x8   :  { %59 = vmatpush.bf16.msra.mxu0 %v91_v10 }
   0x9   :  { %73 = vmatpush.bf16.msra.mxu1 %v95_v13 }
   0xb   :  { %104 = vmatmul.msk.bf16.vlgmr.msra.gmra.mxu0 %vm48_vm0, %v17_v14 }
   0xc   :  { %105 = vmatmul.msk.bf16.vlgmr.msra.gmra.mxu1 %vm48_vm0, %v17_v14 }
  0x88   :  { %v61_v18 = vpop.f32.mrf.mxu0 }
  0x89   :  { %v62_v19 = vadd.f32 %v61_v18, %v24_v16  ;;  %v75_v20 = vpop.f32.mrf.mxu1 }
  0x8a   :  { %v76_v21 = vadd.f32 %v75_v20, %v25_v17 }
  0x8b   :  { %80 = vst [vmem:[%s178_s3] sm:$0xff] %v62_v19 }
  0x8c   :  { %81 = vst [vmem:[%s178_s3 + $0x8] sm:$0xff] %v76_v21 }
  0x90   :  { %v63_v22 = vpop.f32.mrf.mxu0 }
  0x91   :  { %v64_v23 = vadd.f32 %v63_v22, %v24_v16  ;;  %v77_v24 = vpop.f32.mrf.mxu1 }
  0x92   :  { %v78_v25 = vadd.f32 %v77_v24, %v25_v17 }
  0x93   :  { %82 = vst [vmem:[%s178_s3 + $0x10] sm:$0xff] %v64_v23 }
  0x94   :  { %83 = vst [vmem:[%s178_s3 + $0x18] sm:$0xff] %v78_v25 }

// kernel: base_attention_forward_train.7
= control target key start
LH: loop header
LB: loop body
LE: loop exit
PB: predicated region body
PF: predicated region fallthrough
CT: control target
= control target key end

     0   :  { %vm27_vm0 = vcmask 1043456   ;;  %vm23_vm1 = vcmask 64512   ;;  %vm45_vm2 = vcmask 261120   ;;  %s92_s1 = inlined_call_operand.vmem [shape: bf16[8,32], index: 1, kind: input, shape index: {}]   ;;  %s93_s0 = inlined_call_operand.vmem [shape: f32[16,8], index: 0, kind: input, shape index: {}]   ;;  %s94_s2 = inlined_call_operand.vmem [shape: f32[1,32], index: 2, kind: input, shape index: {}]   ;;  %s95_s3 = inlined_call_operand.vmem [shape: f32[16,32], index: 3, kind: output, shape index: {}]  }
   0x1   :  { %v18_v0 = vld [vmem:[%s92_s1] sm:$0xf]  ;;  %v16_v2 = vld [vmem:[%s93_s0 + $0x8] sm:$0xff] }
   0x2   :  { %v15_v1 = vld [vmem:[%s93_s0] sm:$0xff]  ;;  %v29_v3 = vsel %vm27_vm0, %v18_v0, 0 }
   0x3   :  { %v17_v4 = vpack.c.bf16 %v16_v2, %v15_v1  ;;  %38 = vmatpush.bf16.msra.mxu0 %v29_v3  ;;  %v53_v5 = vld [vmem:[%s94_s2] ss:$0 sm:$0xff] }
   0x6   :  { %52 = vmatmul.msk.bf16.vlgmr.msra.gmra.mxu0 %vm23_vm1, %v17_v4 }
  0x83   :  { %v40_v6 = vpop.f32.mrf.mxu0 }
  0x84   :  { %v41_v7 = vadd.f32 %v53_v5, %v40_v6 }
  0x86   :  { %46 = vst.msk [vmem:[%s95_s3] sm:$0xff] %vm45_vm2, %v41_v7 }
  0x8b   :  { %v42_v8 = vpop.f32.mrf.mxu0 }
  0x8c   :  { %v43_v9 = vadd.f32 %v53_v5, %v42_v8 }
  0x8e   :  { %47 = vst.msk [vmem:[%s95_s3 + $0x8] sm:$0xff] %vm45_vm2, %v43_v9 }

// kernel: base_attention_forward_train.10
= control target key start
LH: loop header
LB: loop body
LE: loop exit
PB: predicated region body
PF: predicated region fallthrough
CT: control target
= control target key end

     0   :  { %vm41_vm0 = vcmask 261120   ;;  %s168_s1 = inlined_call_operand.vmem [shape: bf16[2,32,128], index: 1, kind: input, shape index: {}]   ;;  %s169_s0 = inlined_call_operand.vmem [shape: f32[2,2,32], index: 0, kind: input, shape index: {}]   ;;  %s170_s2 = inlined_call_operand.vmem [shape: f32[1,128], index: 2, kind: input, shape index: {}]   ;;  %s171_s3 = inlined_call_operand.vmem [shape: f32[2,128], index: 3, kind: output, shape index: {}]  }
   0x1   :  { %v122_v0 = vld [vmem:[%s168_s1 + $0x18] sm:$0xff]  ;;  %v120_v1 = vld [vmem:[%s168_s1 + $0x8] sm:$0xff]  ;;  %v121_v2 = vld [vmem:[%s168_s1 + $0x10] sm:$0xff] }
   0x2   :  { %51 = vmatpush.bf16.msra.mxu0 %v122_v0  ;;  %79 = vmatpush.bf16.msra.mxu1 %v120_v1  ;;  %v119_v3 = vld [vmem:[%s168_s1] sm:$0xff] }
   0x3   :  { %v96_v4 = vld [vmem:[%s169_s0 + $0x2] sm:$0x3]  ;;  %v15_v5 = vld [vmem:[%s169_s0] sm:$0x3] }
   0x4   :  { %v23_v6 = vpack.c.bf16 %v96_v4, %v96_v4  ;;  %v16_v7 = vpack.c.bf16 %v15_v5, %v15_v5  ;;  %v123_v8 = vld [vmem:[%s170_s2] ss:$0 sm:$0xff] }
   0x6   :  { %52 = vmatpush.bf16.msra.mxu0 %v121_v2  ;;  %80 = vmatpush.bf16.msra.mxu1 %v119_v3 }
   0x9   :  { %109 = vmatmul.msk.bf16.vlgmr.msra.gmra.mxu0 %vm41_vm0, %v23_v6  ;;  %118 = vmatmul.msk.bf16.vlgmr.msra.gmra.mxu1 %vm41_vm0, %v16_v7 }
  0x86   :  { %v54_v9 = vpop.f32.mrf.mxu0  ;;  %v82_v10 = vpop.f32.mrf.mxu1 }
  0x87   :  { %v83_v11 = vadd.f32 %v82_v10, %v54_v9 }
  0x89   :  { %v90_v12 = vadd.f32 %v123_v8, %v83_v11 }
  0x8b   :  { %91 = vst [vmem:[%s171_s3] sm:$0x3] %v90_v12 }
  0x8e   :  { %v56_v13 = vpop.f32.mrf.mxu0  ;;  %v84_v14 = vpop.f32.mrf.mxu1 }

// kernel: base_attention_forward_train.11
= control target key start
LH: loop header
LB: loop body
LE: loop exit
PB: predicated region body
PF: predicated region fallthrough
CT: control target
= control target key end

     0   :  { %vm38_vm0 = vcmask 261120   ;;  %s115_s1 = inlined_call_operand.vmem [shape: bf16[32,128], index: 1, kind: input, shape index: {}]   ;;  %s116_s0 = inlined_call_operand.vmem [shape: f32[14,32], index: 0, kind: input, shape index: {}]   ;;  %s117_s2 = inlined_call_operand.vmem [shape: f32[1,128], index: 2, kind: input, shape index: {}]   ;;  %s118_s3 = inlined_call_operand.vmem [shape: f32[14,128], index: 3, kind: output, shape index: {}]  }
   0x1   :  { %v72_v0 = vld [vmem:[%s115_s1 + $0x8] sm:$0xff]  ;;  %v71_v1 = vld [vmem:[%s115_s1] sm:$0xff] }
   0x2   :  { %48 = vmatpush.bf16.msra.mxu0 %v72_v0  ;;  %v15_v2 = vld [vmem:[%s116_s0] sm:$0xff]  ;;  %v16_v3 = vld [vmem:[%s116_s0 + $0x8] sm:$0x3f] }
   0x3   :  { %v17_v4 = vpack.c.bf16 %v16_v3, %v15_v2  ;;  %v73_v5 = vld [vmem:[%s117_s2] ss:$0 sm:$0xff] }
   0x6   :  { %49 = vmatpush.bf16.msra.mxu0 %v71_v1 }
   0x9   :  { %70 = vmatmul.msk.bf16.vlgmr.msra.gmra.mxu0 %vm38_vm0, %v17_v4 }
  0x86   :  { %v51_v6 = vpop.f32.mrf.mxu0 }
  0x87   :  { %v52_v7 = vadd.f32 %v73_v5, %v51_v6 }
  0x89   :  { %56 = vst [vmem:[%s118_s3] sm:$0xff] %v52_v7 }
  0x8e   :  { %v53_v8 = vpop.f32.mrf.mxu0 }
  0x8f   :  { %v54_v9 = vadd.f32 %v73_v5, %v53_v8 }
  0x91   :  { %57 = vst [vmem:[%s118_s3 + $0x8] sm:$0x3f] %v54_v9 }

// kernel: base_attention_forward_train.13
= control target key start
LH: loop header
LB: loop body
LE: loop exit
PB: predicated region body
PF: predicated region fallthrough
CT: control target
= control target key end

     0   :  { %vm38_vm0 = vcmask 261120   ;;  %vm56_vm1 = vcmask 130048   ;;  %vm58_vm2 = vcmask 128000   ;;  %s117_s1 = inlined_call_operand.vmem [shape: bf16[32,16], index: 1, kind: input, shape index: {}]   ;;  %s118_s0 = inlined_call_operand.vmem [shape: f32[14,32], index: 0, kind: input, shape index: {}]   ;;  %s119_s2 = inlined_call_operand.vmem [shape: f32[1,16], index: 2, kind: input, shape index: {}]   ;;  %s120_s3 = inlined_call_operand.vmem [shape: f32[14,16], index: 3, kind: output, shape index: {}]  }
   0x1   :  { %v74_v0 = vld [vmem:[%s117_s1 + $0x8] sm:$0xff]  ;;  %v73_v1 = vld [vmem:[%s117_s1] sm:$0xff] }
   0x2   :  { %48 = vmatpush.bf16.msra.mxu0 %v74_v0  ;;  %v15_v2 = vld [vmem:[%s118_s0] sm:$0xff]  ;;  %v16_v3 = vld [vmem:[%s118_s0 + $0x8] sm:$0x3f] }
   0x3   :  { %v17_v4 = vpack.c.bf16 %v16_v3, %v15_v2  ;;  %v75_v5 = vld [vmem:[%s119_s2] ss:$0 sm:$0xff] }
   0x6   :  { %49 = vmatpush.bf16.msra.mxu0 %v73_v1 }
   0x9   :  { %72 = vmatmul.msk.bf16.vlgmr.msra.gmra.mxu0 %vm38_vm0, %v17_v4 }
  0x86   :  { %v51_v6 = vpop.f32.mrf.mxu0 }
  0x87   :  { %v52_v7 = vadd.f32 %v75_v5, %v51_v6 }
  0x89   :  { %57 = vst.msk [vmem:[%s120_s3] sm:$0xff] %vm56_vm1, %v52_v7 }
  0x8e   :  { %v53_v8 = vpop.f32.mrf.mxu0 }
  0x8f   :  { %v54_v9 = vadd.f32 %v75_v5, %v53_v8 }
  0x91   :  { %59 = vst.msk [vmem:[%s120_s3 + $0x8] sm:$0x3f] %vm58_vm2, %v54_v9 }

// kernel: base_attention_forward_train.9
= control target key start
LH: loop header
LB: loop body
LE: loop exit
PB: predicated region body
PF: predicated region fallthrough
CT: control target
= control target key end

     0   :  { %s1549_s9 = smov 0   ;;  %s1551_s10 = smov 0   ;;  %s1792_s0 = inlined_call_operand.vmem [shape: f32[2,2,8,128], index: 0, kind: input, shape index: {}]   ;;  %s1793_s1 = inlined_call_operand.vmem [shape: bf16[2,32,128], index: 1, kind: input, shape index: {}]   ;;  %s1794_s2 = inlined_call_operand.vmem [shape: f32[2,2,32], index: 2, kind: output, shape index: {}]  }
   0x1   :  { %s1553_s11 = smov 0  }
   0x2 LB: > { %s24_s12 = sadd.s32 1, %s1524_s10  ;;  %p1306_p0 = scmp.ge.s32.totalorder %s1528_s11, 1  ;;  %s1528_s11 = sphi %s1553_s11, %s12_s11   ;;  %s1524_s10 = sphi %s1551_s10, %s1796_s10   ;;  %s1520_s9 = sphi %s1549_s9, %s1795_s9  }
   0x3   : > { %p26_p1 = scmp.ge.s32.totalorder %s24_s12, 2  ;;  %p139_p2 = scmp.lt.s32.totalorder %s1528_s11, 3 }
   0x5   : > { %s1798_s12 = smov (%p26_p1, %s24_s12), 0  ;;  %p140_p3 = pnand %p1306_p0, %p139_p2 }
   0x6   : > { %p168_p4 = scmp.lt.s32.totalorder (!%p140_p3), %s1520_s9, 1  ;;  %s1531_s17 = smov (!%p140_p3), 32  }
   0x7   : > { %143 = sbr.rel (%p140_p3) target bundleno = 4738 (0x1282), region = 28  ;;  %s1532_s21 = smov (!%p140_p3), 64  }
   0x8   : > { %s1533_s26 = smov (!%p140_p3), 96  }
   0xc   : > { %vm190_vm0 = vcmask 254976   ;;  %v1530_v0 = vmov 0.0   ;;  %s1800_s9 = smov (!%p168_p4, %s1520_s9), 1  ;;  %vm217_vm1 = vcmask 261120   ;;  %vm331_vm10 = vcmask 1041409  }
   0xd   : > { %191 = vst.msk [vmem:[#allocation2] sm:$0x3] %vm190_vm0, %v1530_v0  ;;  %s1346_s13 = sshll.u32 %s1800_s9, 4  ;;  %s1311_s22 = sshll.u32 %s1800_s9, 1 }
   0xe   : > { %192 = vst.msk [vmem:[#allocation3] sm:$0x3] %vm190_vm0, %v1530_v0  ;;  %s180_s16 = scalar_lea.vmem %s1793_s1, %s1346_s13  ;;  %s1587_s20 = scalar_lea.vmem %s1792_s0, %s1346_s13 }
   0xf   : > { %v1349_v1 = vld [vmem:[%s180_s16 + $0x8] sm:$0xff]  ;;  %v1348_v2 = vld [vmem:[%s180_s16] sm:$0xff]  ;;  %s1749_s25 = scalar_lea.vmem %s1794_s2, %s1311_s22 }
  0x10   : > { %227 = vmatpush.bf16.msra.mxu0 %v1349_v1  ;;  %360 = vmatpush.bf16.msra.mxu1 %v1349_v1  ;;  %v203_v7 = vld [vmem:[%s1587_s20 + $0x8] sm:$0x1]  ;;  %v202_v11 = vld [vmem:[%s1587_s20] sm:$0x1]  ;;  %193 = vst.msk [vmem:[%s1749_s25] sm:$0x3] %vm190_vm0, %v1530_v0 }
  0x11   : > { %484 = vmatpush.bf16.msra.mxu2 %v1349_v1  ;;  %608 = vmatpush.bf16.msra.mxu3 %v1349_v1 }
  0x14   : > { %v198_v3 = vld [vmem:[#allocation2] sm:$0x3]  ;;  %228 = vmatpush.bf16.msra.mxu0 %v1348_v2  ;;  %361 = vmatpush.bf16.msra.mxu1 %v1348_v2 }
  0x15   : > { %v199_v4 = vld [vmem:[#allocation3] sm:$0x3]  ;;  %v204_v6 = vpack.c.bf16 %v198_v3, %v198_v3  ;;  %485 = vmatpush.bf16.msra.mxu2 %v1348_v2  ;;  %609 = vmatpush.bf16.msra.mxu3 %v1348_v2 }
  0x16   : > { %v281_v5 = vrot.slane %v199_v4, 1 }
  0x17   : > { %1320 = vmatmul.msk.bf16.vlgmr.msra.gmra.mxu0 %vm217_vm1, %v204_v6 }
  0x18   : > { %284 = vrot.lane.b32.xlu1 %v281_v5, %s1531_s17  ;;  %732 = vmatpush.bf16.msrb.mxu0 %v1349_v1 }
  0x19   : > { %856 = vmatpush.bf16.msrb.mxu1 %v1349_v1  ;;  %980 = vmatpush.bf16.msrb.mxu2 %v1349_v1 }
  0x1a   : > { %1104 = vmatpush.bf16.msrb.mxu3 %v1349_v1 }
  0x1c   : > { %733 = vmatpush.bf16.msrb.mxu0 %v1348_v2 }
  0x1d   : > { %857 = vmatpush.bf16.msrb.mxu1 %v1348_v2  ;;  %981 = vmatpush.bf16.msrb.mxu2 %v1348_v2 }
  0x1e   : > { %1105 = vmatpush.bf16.msrb.mxu3 %v1348_v2 }
  0x20   : > { %282 = vrot.lane.b32.xlu1 %v199_v4, %s1531_s17 }
  0x8a   : > { %v285_v46 = vpop.permute.xlu1 %284 }
  0x92   : > { %v283_v50 = vpop.permute.xlu1 %282 }
  0x94   : > { %v230_v8 = vpop.f32.mrf.mxu0 }
  0x95   : > { %v235_v9 = vrot.slane %v230_v8, 1  ;;  %v238_v13 = vadd.f32 %v230_v8, %v202_v11  ;;  %v339_v8 = vld [vmem:[%s1587_s20 + $0x9] sm:$0x1] }
  0x97   : > { %v239_v10 = vadd.f32 %v235_v9, %v203_v7  ;;  %v1321_v17 = vmul.f32 -1.442695, %v238_v13  ;;  %v338_v7 = vld [vmem:[%s1587_s20 + $0x1] sm:$0x1] }
  0x99   : > { %1378 = vtanh.f32 %v239_v10  ;;  %v1322_v16 = vmul.f32 -1.442695, %v239_v10 }
  0x9a   : > { %1380 = vtanh.f32 %v238_v13 }
  0x9b   : > { %1382 = vpow2.f32 %v1322_v16 }
  0x9c   : > { %v232_v12 = vpop.f32.mrf.mxu0  ;;  %1384 = vpow2.f32 %v1321_v17 }
  0x9f   : > { %v1379_v14 = vpop.eup %1378 }
  0xa0   : > { %294 = vrot.lane.b32.xlu0 %v1379_v14, %s1532_s21  ;;  %v1381_v15 = vpop.eup %1380 }
  0xa1   : > { %v1383_v18 = vpop.eup %1382 }
  0xa2   : > { %v247_v19 = vadd.f32 1.0, %v1383_v18  ;;  %v1385_v20 = vpop.eup %1384 }
  0xa3   : > { %v246_v21 = vadd.f32 1.0, %v1385_v20 }
  0xa4   : > { %1386 = vrcp.f32 %v247_v19  ;;  %v274_v30 = vand.u32 2147483648, %v247_v19  ;;  %vm268_vm3 = vweird.f32 %v247_v19  ;;  %v272_v31 = vand.u32 2147483647, %v247_v19 }
  0xa5   : > { %1388 = vrcp.f32 %v246_v21  ;;  %v259_v39 = vand.u32 2147483648, %v246_v21  ;;  %vm253_vm7 = vweird.f32 %v246_v21  ;;  %v257_v40 = vand.u32 2147483647, %v246_v21 }
  0xa6   : > { %v275_v34 = vor.u32 1.1754944e-38, %v274_v30  ;;  %vm273_vm5 = vcmp.eq.f32.partialorder %v272_v31, 8.507059e+37 }
  0xa7   : > { %v260_v42 = vor.u32 1.1754944e-38, %v259_v39  ;;  %vm258_vm9 = vcmp.eq.f32.partialorder %v257_v40, 8.507059e+37 }
  0xa8   : > { %292 = vrot.lane.b32.xlu0 %v1381_v15, %s1532_s21 }
  0xaa   : > { %v1387_v22 = vpop.eup %1386 }
  0xab   : > { %v264_v23 = vmul.f32 %v1387_v22, %v247_v19  ;;  %v1389_v25 = vpop.eup %1388  ;;  %vm269_vm2 = vweird.f32 %v1387_v22 }
  0xac   : > { %v249_v27 = vmul.f32 %v1389_v25, %v246_v21  ;;  %vm270_vm4 = vmor %vm268_vm3, %vm269_vm2  ;;  %vm254_vm6 = vweird.f32 %v1389_v25 }
  0xad   : > { %v265_v24 = vsub.f32 1.0, %v264_v23  ;;  %vm255_vm8 = vmor %vm253_vm7, %vm254_vm6 }
  0xae   : > { %v250_v29 = vsub.f32 1.0, %v249_v27 }
  0xaf   : > { %v266_v26 = vmul.f32 %v1387_v22, %v265_v24 }
  0xb0   : > { %v251_v33 = vmul.f32 %v1389_v25, %v250_v29 }
  0xb1   : > { %v267_v28 = vadd.f32 %v1387_v22, %v266_v26 }
  0xb2   : > { %v252_v37 = vadd.f32 %v1389_v25, %v251_v33 }
  0xb3   : > { %v271_v32 = vsel %vm270_vm4, %v1387_v22, %v267_v28 }
  0xb4   : > { %v276_v35 = vsel %vm273_vm5, %v275_v34, %v271_v32  ;;  %v256_v41 = vsel %vm255_vm8, %v1389_v25, %v252_v37 }
  0xb5   : > { %v261_v43 = vsel %vm258_vm9, %v260_v42, %v256_v41  ;;  %v289_v47 = vmul.f32 %v285_v46, %v276_v35 }
  0xb6   : > { %v288_v51 = vmul.f32 %v283_v50, %v261_v43 }
 0x112   : > { %v295_v36 = vpop.permute.xlu0 %294 }
 0x113   : > { %v299_v38 = vmul.f32 %v295_v36, %v276_v35 }
 0x115   : > { %304 = vrot.lane.b32.xlu2 %v299_v38, %s1531_s17 }
 0x11a   : > { %v293_v44 = vpop.permute.xlu0 %292 }
 0x11b   : > { %v298_v45 = vmul.f32 %v293_v44, %v261_v43 }
 0x11d   : > { %302 = vrot.lane.b32.xlu2 %v298_v45, %s1531_s17 }
 0x16f   : > { %v305_v48 = vpop.permute.xlu2 %304 }
 0x170   : > { %v1595_v49 = vadd.f32 %v305_v48, %v289_v47 }
 0x172   : > { %1390 = vtanh.f32 %v1595_v49 }
 0x177   : > { %v303_v52 = vpop.permute.xlu2 %302 }
 0x178   : > { %v1391_v53 = vpop.eup %1390  ;;  %v1598_v54 = vadd.f32 %v303_v52, %v288_v51 }
 0x179   : > { %316 = vrot.lane.b32.xlu0 %v1391_v53, %s1532_s21 }
 0x17a   : > { %1392 = vtanh.f32 %v1598_v54 }
 0x180   : > { %v1393_v55 = vpop.eup %1392 }
 0x181   : > { %314 = vrot.lane.b32.xlu1 %v1393_v55, %s1532_s21 }
 0x1eb   : > { %v317_v56 = vpop.permute.xlu0 %316 }
 0x1ec   : > { %v321_v57 = vmul.f32 %v317_v56, %v276_v35 }
 0x1ee   : > { %v341_v58 = vpack.c.bf16 %v321_v57, %v321_v57  ;;  %v330_v60 = vrot.slane %v321_v57, 7 }
 0x1f0   : > { %v345_v61 = vunpack.c.l.b16 %v341_v58 }
 0x1f2   : > { %v346_v2 = vrot.slane %v345_v61, 7 }
 0x1f3   : > { %v315_v59 = vpop.permute.xlu1 %314 }
 0x1f4   : > { %v320_v62 = vmul.f32 %v315_v59, %v261_v43 }
 0x1f6   : > { %v340_v63 = vpack.c.bf16 %v320_v62, %v320_v62  ;;  %v1604_v1 = vsel %vm331_vm10, %v330_v60, %v320_v62 }
 0x1f8   : > { %v344_v3 = vunpack.c.l.b16 %v340_v63 }
 0x1fa   : > { %v347_v4 = vsel %vm331_vm10, %v346_v2, %v344_v3 }
 0x1fb   : > { %v348_v5 = vpack.c.b16 %v347_v4, %v347_v4 }
 0x1fd   : > { %349 = vrot.lane.b32.xlu2 %v348_v5, %s1531_s17 }
 0x257   : > { %v350_v6 = vpop.permute.xlu2 %349 }
 0x258   : > { %1323 = vmatmul.msk.bf16.vlgmr.msra.gmra.mxu1 %vm217_vm1, %v350_v6  ;;  %v462_v6 = vld [vmem:[%s1587_s20 + $0x2] sm:$0x1] }
 0x2d5   : > { %v363_v9 = vpop.f32.mrf.mxu1 }
 0x2d6   : > { %v368_v10 = vrot.slane %v363_v9, 1  ;;  %v371_v11 = vadd.f32 %v363_v9, %v338_v7  ;;  %v463_v7 = vld [vmem:[%s1587_s20 + $0xa] sm:$0x1] }
 0x2d8   : > { %v372_v12 = vadd.f32 %v368_v10, %v339_v8  ;;  %1394 = vtanh.f32 %v371_v11  ;;  %v1324_v16 = vmul.f32 -1.442695, %v371_v11 }
 0x2da   : > { %1396 = vtanh.f32 %v372_v12  ;;  %v1325_v17 = vmul.f32 -1.442695, %v372_v12 }
 0x2db   : > { %1398 = vpow2.f32 %v1324_v16 }
 0x2dc   : > { %1400 = vpow2.f32 %v1325_v17 }
 0x2dd   : > { %v365_v13 = vpop.f32.mrf.mxu1 }
 0x2de   : > { %v1395_v14 = vpop.eup %1394 }
 0x2df   : > { %417 = vrot.lane.b32.xlu1 %v1395_v14, %s1532_s21 }
 0x2e0   : > { %v1397_v15 = vpop.eup %1396 }
 0x2e1   : > { %419 = vrot.lane.b32.xlu0 %v1397_v15, %s1532_s21  ;;  %v1399_v18 = vpop.eup %1398 }
 0x2e2   : > { %v1401_v19 = vpop.eup %1400  ;;  %v379_v20 = vadd.f32 1.0, %v1399_v18 }
 0x2e3   : > { %v380_v21 = vadd.f32 1.0, %v1401_v19 }
 0x2e4   : > { %1402 = vrcp.f32 %v379_v20  ;;  %v392_v31 = vand.u32 2147483648, %v379_v20  ;;  %vm386_vm12 = vweird.f32 %v379_v20  ;;  %v390_v32 = vand.u32 2147483647, %v379_v20 }
 0x2e5   : > { %1404 = vrcp.f32 %v380_v21  ;;  %v407_v35 = vand.u32 2147483648, %v380_v21  ;;  %vm401_vm15 = vweird.f32 %v380_v21  ;;  %v405_v37 = vand.u32 2147483647, %v380_v21 }
 0x2e6   : > { %v393_v36 = vor.u32 1.1754944e-38, %v392_v31  ;;  %vm391_vm2 = vcmp.eq.f32.partialorder %v390_v32, 8.507059e+37 }
 0x2e7   : > { %v408_v42 = vor.u32 1.1754944e-38, %v407_v35  ;;  %vm406_vm4 = vcmp.eq.f32.partialorder %v405_v37, 8.507059e+37 }
 0x2ea   : > { %v1403_v22 = vpop.eup %1402 }
 0x2eb   : > { %v1405_v23 = vpop.eup %1404  ;;  %v382_v24 = vmul.f32 %v1403_v22, %v379_v20  ;;  %vm387_vm11 = vweird.f32 %v1403_v22 }
 0x2ec   : > { %v397_v25 = vmul.f32 %v1405_v23, %v380_v21  ;;  %vm388_vm13 = vmor %vm386_vm12, %vm387_vm11  ;;  %vm402_vm14 = vweird.f32 %v1405_v23 }
 0x2ed   : > { %v383_v26 = vsub.f32 1.0, %v382_v24  ;;  %vm403_vm3 = vmor %vm401_vm15, %vm402_vm14 }
 0x2ee   : > { %v398_v27 = vsub.f32 1.0, %v397_v25 }
 0x2ef   : > { %v384_v28 = vmul.f32 %v1403_v22, %v383_v26 }
 0x2f0   : > { %v399_v29 = vmul.f32 %v1405_v23, %v398_v27 }
 0x2f1   : > { %v385_v30 = vadd.f32 %v1403_v22, %v384_v28 }
 0x2f2   : > { %v400_v33 = vadd.f32 %v1405_v23, %v399_v29 }
 0x2f3   : > { %v389_v34 = vsel %vm388_vm13, %v1403_v22, %v385_v30 }
 0x2f4   : > { %v394_v39 = vsel %vm391_vm2, %v393_v36, %v389_v34  ;;  %v404_v40 = vsel %vm403_vm3, %v1405_v23, %v400_v33 }
 0x2f5   : > { %v409_v44 = vsel %vm406_vm4, %v408_v42, %v404_v40  ;;  %v413_v51 = vmul.f32 %v394_v39, %v1598_v54 }
 0x2f6   : > { %v414_v46 = vmul.f32 %v409_v44, %v1595_v49 }
 0x351   : > { %v418_v38 = vpop.permute.xlu1 %417 }
 0x352   : > { %v423_v41 = vmul.f32 %v418_v38, %v394_v39 }
 0x353   : > { %v420_v43 = vpop.permute.xlu0 %419 }
 0x354   : > { %427 = vrot.lane.b32.xlu0 %v423_v41, %s1531_s17  ;;  %v424_v45 = vmul.f32 %v420_v43, %v409_v44 }
 0x356   : > { %429 = vrot.lane.b32.xlu2 %v424_v45, %s1531_s17 }
 0x3b0   : > { %v430_v47 = vpop.permute.xlu2 %429 }
 0x3b1   : > { %v1616_v48 = vadd.f32 %v430_v47, %v414_v46 }
 0x3b3   : > { %1406 = vtanh.f32 %v1616_v48 }
 0x3b9   : > { %v1407_v50 = vpop.eup %1406 }
 0x3ba   : > { %441 = vrot.lane.b32.xlu1 %v1407_v50, %s1532_s21 }
 0x3c6   : > { %v428_v52 = vpop.permute.xlu0 %427 }
 0x3c7   : > { %v1621_v53 = vadd.f32 %v428_v52, %v413_v51 }
 0x3c9   : > { %1408 = vtanh.f32 %v1621_v53 }
 0x3cf   : > { %v1409_v55 = vpop.eup %1408 }
 0x3d0   : > { %439 = vrot.lane.b32.xlu2 %v1409_v55, %s1532_s21 }
 0x42a   : > { %v440_v56 = vpop.permute.xlu2 %439 }
 0x42b   : > { %v445_v49 = vmul.f32 %v440_v56, %v394_v39 }
 0x42c   : > { %v442_v57 = vpop.permute.xlu1 %441 }
 0x42d   : > { %v446_v58 = vmul.f32 %v442_v57, %v409_v44  ;;  %v464_v59 = vpack.c.bf16 %v445_v49, %v445_v49 }
 0x42f   : > { %v455_v60 = vrot.slane %v446_v58, 7  ;;  %v465_v61 = vpack.c.bf16 %v446_v58, %v446_v58  ;;  %v468_v63 = vunpack.c.l.b16 %v464_v59 }
 0x431   : > { %v469_v62 = vunpack.c.l.b16 %v465_v61  ;;  %v1626_v54 = vsel %vm331_vm10, %v455_v60, %v445_v49 }
 0x433   : > { %v470_v2 = vrot.slane %v469_v62, 7 }
 0x435   : > { %v471_v3 = vsel %vm331_vm10, %v470_v2, %v468_v63 }
 0x436   : > { %v472_v4 = vpack.c.b16 %v471_v3, %v471_v3 }
 0x438   : > { %473 = vrot.lane.b32.xlu0 %v472_v4, %s1531_s17 }
 0x4aa   : > { %v474_v5 = vpop.permute.xlu0 %473 }
 0x4ab   : > { %1326 = vmatmul.msk.bf16.vlgmr.msra.gmra.mxu2 %vm217_vm1, %v474_v5 }
 0x52e   : > { %v487_v8 = vpop.f32.mrf.mxu2 }
 0x52f   : > { %v492_v9 = vrot.slane %v487_v8, 1  ;;  %v495_v10 = vadd.f32 %v487_v8, %v462_v6  ;;  %v586_v6 = vld [vmem:[%s1587_s20 + $0x3] sm:$0x1] }
 0x531   : > { %v496_v11 = vadd.f32 %v492_v9, %v463_v7  ;;  %1410 = vtanh.f32 %v495_v10  ;;  %v1327_v15 = vmul.f32 -1.442695, %v495_v10  ;;  %v587_v7 = vld [vmem:[%s1587_s20 + $0xb] sm:$0x1] }
 0x533   : > { %1412 = vtanh.f32 %v496_v11  ;;  %v1328_v20 = vmul.f32 -1.442695, %v496_v11 }
 0x534   : > { %1414 = vpow2.f32 %v1327_v15 }
 0x536   : > { %v489_v12 = vpop.f32.mrf.mxu2 }
 0x537   : > { %v1411_v13 = vpop.eup %1410 }
 0x538   : > { %541 = vrot.lane.b32.xlu2 %v1411_v13, %s1532_s21 }
 0x539   : > { %v1413_v14 = vpop.eup %1412 }
 0x53a   : > { %543 = vrot.lane.b32.xlu1 %v1413_v14, %s1532_s21  ;;  %v1415_v16 = vpop.eup %1414 }
 0x53b   : > { %v503_v17 = vadd.f32 1.0, %v1415_v16 }
 0x53d   : > { %1416 = vrcp.f32 %v503_v17  ;;  %v516_v25 = vand.u32 2147483648, %v503_v17  ;;  %vm510_vm6 = vweird.f32 %v503_v17  ;;  %v514_v27 = vand.u32 2147483647, %v503_v17 }
 0x53e   : > { %1418 = vpow2.f32 %v1328_v20 }
 0x53f   : > { %v517_v29 = vor.u32 1.1754944e-38, %v516_v25  ;;  %vm515_vm8 = vcmp.eq.f32.partialorder %v514_v27, 8.507059e+37 }
 0x543   : > { %v1417_v18 = vpop.eup %1416 }
 0x544   : > { %v506_v19 = vmul.f32 %v1417_v18, %v503_v17  ;;  %v1419_v23 = vpop.eup %1418  ;;  %vm511_vm5 = vweird.f32 %v1417_v18 }
 0x545   : > { %v504_v26 = vadd.f32 1.0, %v1419_v23  ;;  %vm512_vm7 = vmor %vm510_vm6, %vm511_vm5 }
 0x546   : > { %v507_v21 = vsub.f32 1.0, %v506_v19 }
 0x547   : > { %1420 = vrcp.f32 %v504_v26  ;;  %v531_v38 = vand.u32 2147483648, %v504_v26  ;;  %vm525_vm11 = vweird.f32 %v504_v26  ;;  %v529_v39 = vand.u32 2147483647, %v504_v26 }
 0x548   : > { %v508_v22 = vmul.f32 %v1417_v18, %v507_v21 }
 0x549   : > { %v532_v41 = vor.u32 1.1754944e-38, %v531_v38  ;;  %vm530_vm13 = vcmp.eq.f32.partialorder %v529_v39, 8.507059e+37 }
 0x54a   : > { %v509_v24 = vadd.f32 %v1417_v18, %v508_v22 }
 0x54c   : > { %v513_v28 = vsel %vm512_vm7, %v1417_v18, %v509_v24 }
 0x54d   : > { %v518_v31 = vsel %vm515_vm8, %v517_v29, %v513_v28  ;;  %v1421_v33 = vpop.eup %1420 }
 0x54e   : > { %v521_v34 = vmul.f32 %v1421_v33, %v504_v26  ;;  %vm526_vm9 = vweird.f32 %v1421_v33  ;;  %v537_v45 = vmul.f32 %v518_v31, %v1621_v53 }
 0x54f   : > { %vm527_vm12 = vmor %vm525_vm11, %vm526_vm9 }
 0x550   : > { %v522_v35 = vsub.f32 1.0, %v521_v34 }
 0x552   : > { %v523_v36 = vmul.f32 %v1421_v33, %v522_v35 }
 0x554   : > { %v524_v37 = vadd.f32 %v1421_v33, %v523_v36 }
 0x556   : > { %v528_v40 = vsel %vm527_vm12, %v1421_v33, %v524_v37 }
 0x557   : > { %v533_v43 = vsel %vm530_vm13, %v532_v41, %v528_v40 }
 0x558   : > { %v538_v51 = vmul.f32 %v533_v43, %v1616_v48 }
 0x592   : > { %v542_v30 = vpop.permute.xlu2 %541 }
 0x593   : > { %v547_v32 = vmul.f32 %v542_v30, %v518_v31 }
 0x595   : > { %551 = vrot.lane.b32.xlu1 %v547_v32, %s1531_s17 }
 0x5ac   : > { %v544_v42 = vpop.permute.xlu1 %543 }
 0x5ad   : > { %v548_v44 = vmul.f32 %v544_v42, %v533_v43 }
 0x5af   : > { %553 = vrot.lane.b32.xlu0 %v548_v44, %s1531_s17 }
 0x607   : > { %v552_v46 = vpop.permute.xlu1 %551 }
 0x608   : > { %v1638_v47 = vadd.f32 %v552_v46, %v537_v45 }
 0x60a   : > { %1422 = vtanh.f32 %v1638_v47 }
 0x610   : > { %v1423_v50 = vpop.eup %1422 }
 0x611   : > { %563 = vrot.lane.b32.xlu0 %v1423_v50, %s1532_s21 }
 0x621   : > { %v554_v52 = vpop.permute.xlu0 %553 }
 0x622   : > { %v1643_v55 = vadd.f32 %v554_v52, %v538_v51 }
 0x624   : > { %1424 = vtanh.f32 %v1643_v55 }
 0x62a   : > { %v1425_v56 = vpop.eup %1424 }
 0x62b   : > { %565 = vrot.lane.b32.xlu2 %v1425_v56, %s1532_s21 }
 0x683   : > { %v564_v49 = vpop.permute.xlu0 %563 }
 0x684   : > { %v569_v53 = vmul.f32 %v564_v49, %v518_v31 }
 0x685   : > { %v566_v57 = vpop.permute.xlu2 %565 }
 0x686   : > { %v570_v58 = vmul.f32 %v566_v57, %v533_v43  ;;  %v588_v59 = vpack.c.bf16 %v569_v53, %v569_v53 }
 0x688   : > { %v579_v60 = vrot.slane %v570_v58, 7  ;;  %v589_v61 = vpack.c.bf16 %v570_v58, %v570_v58  ;;  %v592_v63 = vunpack.c.l.b16 %v588_v59 }
 0x68a   : > { %v593_v62 = vunpack.c.l.b16 %v589_v61  ;;  %v1648_v48 = vsel %vm331_vm10, %v579_v60, %v569_v53 }
 0x68c   : > { %v594_v2 = vrot.slane %v593_v62, 7 }
 0x68e   : > { %v595_v3 = vsel %vm331_vm10, %v594_v2, %v592_v63 }
 0x68f   : > { %v596_v4 = vpack.c.b16 %v595_v3, %v595_v3 }
 0x691   : > { %597 = vrot.lane.b32.xlu1 %v596_v4, %s1531_s17 }
 0x703   : > { %v598_v5 = vpop.permute.xlu1 %597 }
 0x704   : > { %1329 = vmatmul.msk.bf16.vlgmr.msra.gmra.mxu3 %vm217_vm1, %v598_v5 }
 0x787   : > { %v611_v8 = vpop.f32.mrf.mxu3 }
 0x788   : > { %v616_v9 = vrot.slane %v611_v8, 1  ;;  %v619_v10 = vadd.f32 %v611_v8, %v586_v6  ;;  %v711_v8 = vld [vmem:[%s1587_s20 + $0xc] sm:$0x1] }
 0x78a   : > { %v620_v11 = vadd.f32 %v616_v9, %v587_v7  ;;  %1426 = vtanh.f32 %v619_v10  ;;  %v1330_v18 = vmul.f32 -1.442695, %v619_v10  ;;  %v710_v7 = vld [vmem:[%s1587_s20 + $0x4] sm:$0x1] }
 0x78c   : > { %1428 = vtanh.f32 %v620_v11  ;;  %v1331_v15 = vmul.f32 -1.442695, %v620_v11 }
 0x78e   : > { %1430 = vpow2.f32 %v1331_v15 }
 0x78f   : > { %v613_v12 = vpop.f32.mrf.mxu3 }
 0x790   : > { %v1427_v13 = vpop.eup %1426 }
 0x791   : > { %665 = vrot.lane.b32.xlu0 %v1427_v13, %s1532_s21 }
 0x792   : > { %v1429_v14 = vpop.eup %1428 }
 0x793   : > { %667 = vrot.lane.b32.xlu2 %v1429_v14, %s1532_s21 }
 0x794   : > { %v1431_v16 = vpop.eup %1430 }
 0x795   : > { %v628_v17 = vadd.f32 1.0, %v1431_v16 }
 0x797   : > { %1432 = vrcp.f32 %v628_v17  ;;  %v655_v26 = vand.u32 2147483648, %v628_v17  ;;  %vm649_vm15 = vweird.f32 %v628_v17  ;;  %v653_v27 = vand.u32 2147483647, %v628_v17 }
 0x798   : > { %1434 = vpow2.f32 %v1330_v18 }
 0x799   : > { %v656_v29 = vor.u32 1.1754944e-38, %v655_v26  ;;  %vm654_vm3 = vcmp.eq.f32.partialorder %v653_v27, 8.507059e+37 }
 0x79d   : > { %v1433_v19 = vpop.eup %1432 }
 0x79e   : > { %v645_v20 = vmul.f32 %v1433_v19, %v628_v17  ;;  %v1435_v22 = vpop.eup %1434  ;;  %vm650_vm14 = vweird.f32 %v1433_v19 }
 0x79f   : > { %v627_v23 = vadd.f32 1.0, %v1435_v22  ;;  %vm651_vm2 = vmor %vm649_vm15, %vm650_vm14 }
 0x7a0   : > { %v646_v21 = vsub.f32 1.0, %v645_v20 }
 0x7a1   : > { %1436 = vrcp.f32 %v627_v23  ;;  %v640_v38 = vand.u32 2147483648, %v627_v23  ;;  %vm634_vm5 = vweird.f32 %v627_v23  ;;  %v638_v39 = vand.u32 2147483647, %v627_v23 }
 0x7a2   : > { %v647_v24 = vmul.f32 %v1433_v19, %v646_v21 }
 0x7a3   : > { %v641_v41 = vor.u32 1.1754944e-38, %v640_v38  ;;  %vm639_vm7 = vcmp.eq.f32.partialorder %v638_v39, 8.507059e+37 }
 0x7a4   : > { %v648_v25 = vadd.f32 %v1433_v19, %v647_v24 }
 0x7a6   : > { %v652_v28 = vsel %vm651_vm2, %v1433_v19, %v648_v25 }
 0x7a7   : > { %v1437_v30 = vpop.eup %1436  ;;  %v657_v32 = vsel %vm654_vm3, %v656_v29, %v652_v28 }
 0x7a8   : > { %v630_v34 = vmul.f32 %v1437_v30, %v627_v23  ;;  %vm635_vm4 = vweird.f32 %v1437_v30  ;;  %v662_v51 = vmul.f32 %v657_v32, %v1643_v55 }
 0x7a9   : > { %vm636_vm6 = vmor %vm634_vm5, %vm635_vm4 }
 0x7aa   : > { %v631_v35 = vsub.f32 1.0, %v630_v34 }
 0x7ac   : > { %v632_v36 = vmul.f32 %v1437_v30, %v631_v35 }
 0x7ae   : > { %v633_v37 = vadd.f32 %v1437_v30, %v632_v36 }
 0x7b0   : > { %v637_v40 = vsel %vm636_vm6, %v1437_v30, %v633_v37 }
 0x7b1   : > { %v642_v43 = vsel %vm639_vm7, %v641_v41, %v637_v40 }
 0x7b2   : > { %v661_v45 = vmul.f32 %v642_v43, %v1638_v47 }
 0x7ed   : > { %v668_v31 = vpop.permute.xlu2 %667 }
 0x7ee   : > { %v672_v33 = vmul.f32 %v668_v31, %v657_v32 }
 0x7f0   : > { %677 = vrot.lane.b32.xlu1 %v672_v33, %s1531_s17 }
 0x803   : > { %v666_v42 = vpop.permute.xlu0 %665 }
 0x804   : > { %v671_v44 = vmul.f32 %v666_v42, %v642_v43 }
 0x806   : > { %675 = vrot.lane.b32.xlu2 %v671_v44, %s1531_s17 }
 0x860   : > { %v676_v46 = vpop.permute.xlu2 %675 }
 0x861   : > { %v1660_v50 = vadd.f32 %v676_v46, %v661_v45 }
 0x862   : > { %v678_v52 = vpop.permute.xlu1 %677 }
 0x863   : > { %1438 = vtanh.f32 %v1660_v50  ;;  %v1664_v56 = vadd.f32 %v678_v52, %v662_v51 }
 0x865   : > { %1440 = vtanh.f32 %v1664_v56 }
 0x869   : > { %v1439_v49 = vpop.eup %1438 }
 0x86a   : > { %687 = vrot.lane.b32.xlu1 %v1439_v49, %s1532_s21 }
 0x86b   : > { %v1441_v53 = vpop.eup %1440 }
 0x86c   : > { %689 = vrot.lane.b32.xlu0 %v1441_v53, %s1532_s21 }
 0x8dc   : > { %v688_v57 = vpop.permute.xlu1 %687 }
 0x8dd   : > { %v693_v47 = vmul.f32 %v688_v57, %v642_v43 }
 0x8de   : > { %v690_v58 = vpop.permute.xlu0 %689 }
 0x8df   : > { %v694_v59 = vmul.f32 %v690_v58, %v657_v32  ;;  %v712_v55 = vpack.c.bf16 %v693_v47, %v693_v47 }
 0x8e1   : > { %v703_v60 = vrot.slane %v694_v59, 7  ;;  %v713_v61 = vpack.c.bf16 %v694_v59, %v694_v59  ;;  %v716_v2 = vunpack.c.l.b16 %v712_v55 }
 0x8e3   : > { %v717_v62 = vunpack.c.l.b16 %v713_v61  ;;  %v1670_v63 = vsel %vm331_vm10, %v703_v60, %v693_v47 }
 0x8e5   : > { %v718_v3 = vrot.slane %v717_v62, 7 }
 0x8e7   : > { %v719_v4 = vsel %vm331_vm10, %v718_v3, %v716_v2 }
 0x8e8   : > { %v720_v5 = vpack.c.b16 %v719_v4, %v719_v4 }
 0x8ea   : > { %721 = vrot.lane.b32.xlu2 %v720_v5, %s1531_s17 }
 0x944   : > { %v722_v6 = vpop.permute.xlu2 %721 }
 0x945   : > { %1332 = vmatmul.msk.bf16.vlgmr.msrb.gmra.mxu0 %vm217_vm1, %v722_v6 }
 0x9c2   : > { %v735_v9 = vpop.f32.mrf.mxu0 }
 0x9c3   : > { %v740_v10 = vrot.slane %v735_v9, 1  ;;  %v743_v11 = vadd.f32 %v735_v9, %v710_v7  ;;  %v834_v9 = vld [vmem:[%s1587_s20 + $0x5] sm:$0x1] }
 0x9c5   : > { %v744_v12 = vadd.f32 %v740_v10, %v711_v8  ;;  %1442 = vtanh.f32 %v743_v11  ;;  %v1333_v16 = vmul.f32 -1.442695, %v743_v11  ;;  %v835_v10 = vld [vmem:[%s1587_s20 + $0xd] sm:$0x1] }
 0x9c7   : > { %1444 = vtanh.f32 %v744_v12  ;;  %v1334_v17 = vmul.f32 -1.442695, %v744_v12 }
 0x9c8   : > { %1446 = vpow2.f32 %v1333_v16 }
 0x9c9   : > { %1448 = vpow2.f32 %v1334_v17 }
 0x9ca   : > { %v737_v13 = vpop.f32.mrf.mxu0 }
 0x9cb   : > { %v1443_v14 = vpop.eup %1442 }
 0x9cc   : > { %789 = vrot.lane.b32.xlu1 %v1443_v14, %s1532_s21 }
 0x9cd   : > { %v1445_v15 = vpop.eup %1444 }
 0x9ce   : > { %791 = vrot.lane.b32.xlu0 %v1445_v15, %s1532_s21  ;;  %v1447_v18 = vpop.eup %1446 }
 0x9cf   : > { %v1449_v19 = vpop.eup %1448  ;;  %v751_v20 = vadd.f32 1.0, %v1447_v18 }
 0x9d0   : > { %v752_v21 = vadd.f32 1.0, %v1449_v19 }
 0x9d1   : > { %1450 = vrcp.f32 %v751_v20  ;;  %v764_v31 = vand.u32 2147483648, %v751_v20  ;;  %vm758_vm9 = vweird.f32 %v751_v20  ;;  %v762_v32 = vand.u32 2147483647, %v751_v20 }
 0x9d2   : > { %1452 = vrcp.f32 %v752_v21  ;;  %v779_v35 = vand.u32 2147483648, %v752_v21  ;;  %vm773_vm13 = vweird.f32 %v752_v21  ;;  %v777_v37 = vand.u32 2147483647, %v752_v21 }
 0x9d3   : > { %v765_v36 = vor.u32 1.1754944e-38, %v764_v31  ;;  %vm763_vm14 = vcmp.eq.f32.partialorder %v762_v32, 8.507059e+37 }
 0x9d4   : > { %v780_v42 = vor.u32 1.1754944e-38, %v779_v35  ;;  %vm778_vm2 = vcmp.eq.f32.partialorder %v777_v37, 8.507059e+37 }
 0x9d7   : > { %v1451_v22 = vpop.eup %1450 }
 0x9d8   : > { %v1453_v23 = vpop.eup %1452  ;;  %v754_v24 = vmul.f32 %v1451_v22, %v751_v20  ;;  %vm759_vm8 = vweird.f32 %v1451_v22 }
 0x9d9   : > { %v769_v25 = vmul.f32 %v1453_v23, %v752_v21  ;;  %vm760_vm11 = vmor %vm758_vm9, %vm759_vm8  ;;  %vm774_vm12 = vweird.f32 %v1453_v23 }
 0x9da   : > { %v755_v26 = vsub.f32 1.0, %v754_v24  ;;  %vm775_vm15 = vmor %vm773_vm13, %vm774_vm12 }
 0x9db   : > { %v770_v27 = vsub.f32 1.0, %v769_v25 }
 0x9dc   : > { %v756_v28 = vmul.f32 %v1451_v22, %v755_v26 }
 0x9dd   : > { %v771_v29 = vmul.f32 %v1453_v23, %v770_v27 }
 0x9de   : > { %v757_v30 = vadd.f32 %v1451_v22, %v756_v28 }
 0x9df   : > { %v772_v33 = vadd.f32 %v1453_v23, %v771_v29 }
 0x9e0   : > { %v761_v34 = vsel %vm760_vm11, %v1451_v22, %v757_v30 }
 0x9e1   : > { %v766_v39 = vsel %vm763_vm14, %v765_v36, %v761_v34  ;;  %v776_v40 = vsel %vm775_vm15, %v1453_v23, %v772_v33 }
 0x9e2   : > { %v781_v44 = vsel %vm778_vm2, %v780_v42, %v776_v40  ;;  %v785_v53 = vmul.f32 %v766_v39, %v1660_v50 }
 0x9e3   : > { %v786_v46 = vmul.f32 %v781_v44, %v1664_v56 }
 0xa3e   : > { %v790_v38 = vpop.permute.xlu1 %789 }
 0xa3f   : > { %v795_v41 = vmul.f32 %v790_v38, %v766_v39 }
 0xa40   : > { %v792_v43 = vpop.permute.xlu0 %791 }
 0xa41   : > { %799 = vrot.lane.b32.xlu0 %v795_v41, %s1531_s17  ;;  %v796_v45 = vmul.f32 %v792_v43, %v781_v44 }
 0xa43   : > { %801 = vrot.lane.b32.xlu2 %v796_v45, %s1531_s17 }
 0xa9d   : > { %v802_v51 = vpop.permute.xlu2 %801 }
 0xa9e   : > { %v1682_v52 = vadd.f32 %v802_v51, %v786_v46 }
 0xaa0   : > { %1454 = vtanh.f32 %v1682_v52 }
 0xaa6   : > { %v1455_v49 = vpop.eup %1454 }
 0xaa7   : > { %813 = vrot.lane.b32.xlu1 %v1455_v49, %s1532_s21 }
 0xab3   : > { %v800_v57 = vpop.permute.xlu0 %799 }
 0xab4   : > { %v1687_v47 = vadd.f32 %v800_v57, %v785_v53 }
 0xab6   : > { %1456 = vtanh.f32 %v1687_v47 }
 0xabc   : > { %v1457_v58 = vpop.eup %1456 }
 0xabd   : > { %811 = vrot.lane.b32.xlu2 %v1457_v58, %s1532_s21 }
 0xb17   : > { %v812_v59 = vpop.permute.xlu2 %811 }
 0xb18   : > { %v817_v56 = vmul.f32 %v812_v59, %v766_v39 }
 0xb19   : > { %v814_v55 = vpop.permute.xlu1 %813 }
 0xb1a   : > { %v818_v60 = vmul.f32 %v814_v55, %v781_v44  ;;  %v836_v61 = vpack.c.bf16 %v817_v56, %v817_v56 }
 0xb1c   : > { %v827_v62 = vrot.slane %v818_v60, 7  ;;  %v837_v2 = vpack.c.bf16 %v818_v60, %v818_v60  ;;  %v840_v4 = vunpack.c.l.b16 %v836_v61 }
 0xb1e   : > { %v841_v3 = vunpack.c.l.b16 %v837_v2  ;;  %v1692_v50 = vsel %vm331_vm10, %v827_v62, %v817_v56 }
 0xb20   : > { %v842_v5 = vrot.slane %v841_v3, 7 }
 0xb22   : > { %v843_v6 = vsel %vm331_vm10, %v842_v5, %v840_v4 }
 0xb23   : > { %v844_v7 = vpack.c.b16 %v843_v6, %v843_v6 }
 0xb25   : > { %845 = vrot.lane.b32.xlu0 %v844_v7, %s1531_s17 }
 0xb97   : > { %v846_v8 = vpop.permute.xlu0 %845 }
 0xb98   : > { %1335 = vmatmul.msk.bf16.vlgmr.msrb.gmra.mxu1 %vm217_vm1, %v846_v8 }
 0xc15   : > { %v859_v11 = vpop.f32.mrf.mxu1 }
 0xc16   : > { %v864_v12 = vrot.slane %v859_v11, 1  ;;  %v867_v13 = vadd.f32 %v859_v11, %v834_v9 }
 0xc18   : > { %v868_v14 = vadd.f32 %v864_v12, %v835_v10  ;;  %1458 = vtanh.f32 %v867_v13  ;;  %v1336_v18 = vmul.f32 -1.442695, %v867_v13  ;;  %v958_v12 = vld [vmem:[%s1587_s20 + $0x6] sm:$0x1]  ;;  %v959_v13 = vld [vmem:[%s1587_s20 + $0xe] sm:$0x1] }
 0xc1a   : > { %1460 = vtanh.f32 %v868_v14  ;;  %v1337_v23 = vmul.f32 -1.442695, %v868_v14 }
 0xc1b   : > { %1462 = vpow2.f32 %v1336_v18 }
 0xc1d   : > { %v861_v15 = vpop.f32.mrf.mxu1 }
 0xc1e   : > { %v1459_v16 = vpop.eup %1458 }
 0xc1f   : > { %913 = vrot.lane.b32.xlu2 %v1459_v16, %s1532_s21 }
 0xc20   : > { %v1461_v17 = vpop.eup %1460 }
 0xc21   : > { %915 = vrot.lane.b32.xlu1 %v1461_v17, %s1532_s21  ;;  %v1463_v19 = vpop.eup %1462 }
 0xc22   : > { %v875_v20 = vadd.f32 1.0, %v1463_v19 }
 0xc24   : > { %1464 = vrcp.f32 %v875_v20  ;;  %v888_v28 = vand.u32 2147483648, %v875_v20  ;;  %vm882_vm4 = vweird.f32 %v875_v20  ;;  %v886_v30 = vand.u32 2147483647, %v875_v20 }
 0xc25   : > { %1466 = vpow2.f32 %v1337_v23 }
 0xc26   : > { %v889_v32 = vor.u32 1.1754944e-38, %v888_v28  ;;  %vm887_vm6 = vcmp.eq.f32.partialorder %v886_v30, 8.507059e+37 }
 0xc2a   : > { %v1465_v21 = vpop.eup %1464 }
 0xc2b   : > { %v878_v22 = vmul.f32 %v1465_v21, %v875_v20  ;;  %v1467_v26 = vpop.eup %1466  ;;  %vm883_vm3 = vweird.f32 %v1465_v21 }
 0xc2c   : > { %v876_v29 = vadd.f32 1.0, %v1467_v26  ;;  %vm884_vm5 = vmor %vm882_vm4, %vm883_vm3 }
 0xc2d   : > { %v879_v24 = vsub.f32 1.0, %v878_v22 }
 0xc2e   : > { %1468 = vrcp.f32 %v876_v29  ;;  %v903_v41 = vand.u32 2147483648, %v876_v29  ;;  %vm897_vm8 = vweird.f32 %v876_v29  ;;  %v901_v42 = vand.u32 2147483647, %v876_v29 }
 0xc2f   : > { %v880_v25 = vmul.f32 %v1465_v21, %v879_v24 }
 0xc30   : > { %v904_v44 = vor.u32 1.1754944e-38, %v903_v41  ;;  %vm902_vm11 = vcmp.eq.f32.partialorder %v901_v42, 8.507059e+37 }
 0xc31   : > { %v881_v27 = vadd.f32 %v1465_v21, %v880_v25 }
 0xc33   : > { %v885_v31 = vsel %vm884_vm5, %v1465_v21, %v881_v27 }
 0xc34   : > { %v890_v34 = vsel %vm887_vm6, %v889_v32, %v885_v31  ;;  %v1469_v36 = vpop.eup %1468 }
 0xc35   : > { %v893_v37 = vmul.f32 %v1469_v36, %v876_v29  ;;  %vm898_vm7 = vweird.f32 %v1469_v36  ;;  %v909_v49 = vmul.f32 %v890_v34, %v1687_v47 }
 0xc36   : > { %vm899_vm9 = vmor %vm897_vm8, %vm898_vm7 }
 0xc37   : > { %v894_v38 = vsub.f32 1.0, %v893_v37 }
 0xc39   : > { %v895_v39 = vmul.f32 %v1469_v36, %v894_v38 }
 0xc3b   : > { %v896_v40 = vadd.f32 %v1469_v36, %v895_v39 }
 0xc3d   : > { %v900_v43 = vsel %vm899_vm9, %v1469_v36, %v896_v40 }
 0xc3e   : > { %v905_v46 = vsel %vm902_vm11, %v904_v44, %v900_v43 }
 0xc3f   : > { %v910_v59 = vmul.f32 %v905_v46, %v1682_v52 }
 0xc79   : > { %v914_v33 = vpop.permute.xlu2 %913 }
 0xc7a   : > { %v919_v35 = vmul.f32 %v914_v33, %v890_v34 }
 0xc7c   : > { %923 = vrot.lane.b32.xlu1 %v919_v35, %s1531_s17 }
 0xc93   : > { %v916_v45 = vpop.permute.xlu1 %915 }
 0xc94   : > { %v920_v51 = vmul.f32 %v916_v45, %v905_v46 }
 0xc96   : > { %925 = vrot.lane.b32.xlu0 %v920_v51, %s1531_s17 }
 0xcee   : > { %v924_v53 = vpop.permute.xlu1 %923 }
 0xcef   : > { %v1704_v57 = vadd.f32 %v924_v53, %v909_v49 }
 0xcf1   : > { %1470 = vtanh.f32 %v1704_v57 }
 0xcf7   : > { %v1471_v58 = vpop.eup %1470 }
 0xcf8   : > { %935 = vrot.lane.b32.xlu0 %v1471_v58, %s1532_s21 }
 0xd08   : > { %v926_v56 = vpop.permute.xlu0 %925 }
 0xd09   : > { %v1709_v55 = vadd.f32 %v926_v56, %v910_v59 }
 0xd0b   : > { %1472 = vtanh.f32 %v1709_v55 }
 0xd11   : > { %v1473_v60 = vpop.eup %1472 }
 0xd12   : > { %937 = vrot.lane.b32.xlu2 %v1473_v60, %s1532_s21 }
 0xd6a   : > { %v936_v61 = vpop.permute.xlu0 %935 }
 0xd6b   : > { %v941_v47 = vmul.f32 %v936_v61, %v890_v34 }
 0xd6c   : > { %v938_v62 = vpop.permute.xlu2 %937 }
 0xd6d   : > { %v942_v2 = vmul.f32 %v938_v62, %v905_v46  ;;  %v960_v3 = vpack.c.bf16 %v941_v47, %v941_v47 }
 0xd6f   : > { %v951_v4 = vrot.slane %v942_v2, 7  ;;  %v961_v5 = vpack.c.bf16 %v942_v2, %v942_v2  ;;  %v964_v7 = vunpack.c.l.b16 %v960_v3 }
 0xd71   : > { %v965_v6 = vunpack.c.l.b16 %v961_v5  ;;  %v1714_v52 = vsel %vm331_vm10, %v951_v4, %v941_v47 }
 0xd73   : > { %v966_v8 = vrot.slane %v965_v6, 7 }
 0xd75   : > { %v967_v9 = vsel %vm331_vm10, %v966_v8, %v964_v7 }
 0xd76   : > { %v968_v10 = vpack.c.b16 %v967_v9, %v967_v9 }
 0xd78   : > { %969 = vrot.lane.b32.xlu1 %v968_v10, %s1531_s17 }
 0xdea   : > { %v970_v11 = vpop.permute.xlu1 %969 }
 0xdeb   : > { %1338 = vmatmul.msk.bf16.vlgmr.msrb.gmra.mxu2 %vm217_vm1, %v970_v11 }
 0xe6e   : > { %v983_v14 = vpop.f32.mrf.mxu2 }
 0xe6f   : > { %v988_v15 = vrot.slane %v983_v14, 1  ;;  %v991_v16 = vadd.f32 %v983_v14, %v958_v12 }
 0xe71   : > { %v992_v17 = vadd.f32 %v988_v15, %v959_v13  ;;  %1474 = vtanh.f32 %v991_v16  ;;  %v1339_v24 = vmul.f32 -1.442695, %v991_v16  ;;  %v1082_v16 = vld [vmem:[%s1587_s20 + $0x7] sm:$0x1] }
 0xe73   : > { %1476 = vtanh.f32 %v992_v17  ;;  %v1340_v21 = vmul.f32 -1.442695, %v992_v17  ;;  %v1083_v17 = vld [vmem:[%s1587_s20 + $0xf] sm:$0x1] }
 0xe75   : > { %1478 = vpow2.f32 %v1340_v21 }
 0xe76   : > { %v985_v18 = vpop.f32.mrf.mxu2 }
 0xe77   : > { %v1475_v19 = vpop.eup %1474 }
 0xe78   : > { %1037 = vrot.lane.b32.xlu0 %v1475_v19, %s1532_s21 }
 0xe79   : > { %v1477_v20 = vpop.eup %1476 }
 0xe7a   : > { %1039 = vrot.lane.b32.xlu2 %v1477_v20, %s1532_s21 }
 0xe7b   : > { %v1479_v22 = vpop.eup %1478 }
 0xe7c   : > { %v1000_v23 = vadd.f32 1.0, %v1479_v22 }
 0xe7e   : > { %1480 = vrcp.f32 %v1000_v23  ;;  %v1027_v32 = vand.u32 2147483648, %v1000_v23  ;;  %vm1021_vm13 = vweird.f32 %v1000_v23  ;;  %v1025_v33 = vand.u32 2147483647, %v1000_v23 }
 0xe7f   : > { %1482 = vpow2.f32 %v1339_v24 }
 0xe80   : > { %v1028_v35 = vor.u32 1.1754944e-38, %v1027_v32  ;;  %vm1026_vm15 = vcmp.eq.f32.partialorder %v1025_v33, 8.507059e+37 }
 0xe84   : > { %v1481_v25 = vpop.eup %1480 }
 0xe85   : > { %v1017_v26 = vmul.f32 %v1481_v25, %v1000_v23  ;;  %v1483_v28 = vpop.eup %1482  ;;  %vm1022_vm12 = vweird.f32 %v1481_v25 }
 0xe86   : > { %v999_v29 = vadd.f32 1.0, %v1483_v28  ;;  %vm1023_vm14 = vmor %vm1021_vm13, %vm1022_vm12 }
 0xe87   : > { %v1018_v27 = vsub.f32 1.0, %v1017_v26 }
 0xe88   : > { %1484 = vrcp.f32 %v999_v29  ;;  %v1012_v44 = vand.u32 2147483648, %v999_v29  ;;  %vm1006_vm3 = vweird.f32 %v999_v29  ;;  %v1010_v45 = vand.u32 2147483647, %v999_v29 }
 0xe89   : > { %v1019_v30 = vmul.f32 %v1481_v25, %v1018_v27 }
 0xe8a   : > { %v1013_v51 = vor.u32 1.1754944e-38, %v1012_v44  ;;  %vm1011_vm5 = vcmp.eq.f32.partialorder %v1010_v45, 8.507059e+37 }
 0xe8b   : > { %v1020_v31 = vadd.f32 %v1481_v25, %v1019_v30 }
 0xe8d   : > { %v1024_v34 = vsel %vm1023_vm14, %v1481_v25, %v1020_v31 }
 0xe8e   : > { %v1485_v36 = vpop.eup %1484  ;;  %v1029_v38 = vsel %vm1026_vm15, %v1028_v35, %v1024_v34 }
 0xe8f   : > { %v1002_v40 = vmul.f32 %v1485_v36, %v999_v29  ;;  %vm1007_vm2 = vweird.f32 %v1485_v36  ;;  %v1034_v61 = vmul.f32 %v1029_v38, %v1709_v55 }
 0xe90   : > { %vm1008_vm4 = vmor %vm1006_vm3, %vm1007_vm2 }
 0xe91   : > { %v1003_v41 = vsub.f32 1.0, %v1002_v40 }
 0xe93   : > { %v1004_v42 = vmul.f32 %v1485_v36, %v1003_v41 }
 0xe95   : > { %v1005_v43 = vadd.f32 %v1485_v36, %v1004_v42 }
 0xe97   : > { %v1009_v46 = vsel %vm1008_vm4, %v1485_v36, %v1005_v43 }
 0xe98   : > { %v1014_v53 = vsel %vm1011_vm5, %v1013_v51, %v1009_v46 }
 0xe99   : > { %v1033_v59 = vmul.f32 %v1014_v53, %v1704_v57 }
 0xed4   : > { %v1040_v37 = vpop.permute.xlu2 %1039 }
 0xed5   : > { %v1044_v39 = vmul.f32 %v1040_v37, %v1029_v38 }
 0xed7   : > { %1049 = vrot.lane.b32.xlu1 %v1044_v39, %s1531_s17 }
 0xeea   : > { %v1038_v49 = vpop.permute.xlu0 %1037 }
 0xeeb   : > { %v1043_v58 = vmul.f32 %v1038_v49, %v1014_v53 }
 0xeed   : > { %1047 = vrot.lane.b32.xlu2 %v1043_v58, %s1531_s17 }
 0xf47   : > { %v1048_v56 = vpop.permute.xlu2 %1047 }
 0xf48   : > { %v1726_v60 = vadd.f32 %v1048_v56, %v1033_v59 }
 0xf49   : > { %v1050_v47 = vpop.permute.xlu1 %1049 }
 0xf4a   : > { %1486 = vtanh.f32 %v1726_v60  ;;  %v1730_v62 = vadd.f32 %v1050_v47, %v1034_v61 }
 0xf4c   : > { %1488 = vtanh.f32 %v1730_v62 }
 0xf50   : > { %v1487_v2 = vpop.eup %1486 }
 0xf51   : > { %1059 = vrot.lane.b32.xlu1 %v1487_v2, %s1532_s21 }
 0xf52   : > { %v1489_v3 = vpop.eup %1488 }
 0xf53   : > { %1061 = vrot.lane.b32.xlu0 %v1489_v3, %s1532_s21 }
 0xfc3   : > { %v1060_v4 = vpop.permute.xlu1 %1059 }
 0xfc4   : > { %v1065_v57 = vmul.f32 %v1060_v4, %v1014_v53 }
 0xfc5   : > { %v1062_v5 = vpop.permute.xlu0 %1061 }
 0xfc6   : > { %v1066_v6 = vmul.f32 %v1062_v5, %v1029_v38  ;;  %v1084_v55 = vpack.c.bf16 %v1065_v57, %v1065_v57 }
 0xfc8   : > { %v1075_v7 = vrot.slane %v1066_v6, 7  ;;  %v1085_v8 = vpack.c.bf16 %v1066_v6, %v1066_v6  ;;  %v1088_v11 = vunpack.c.l.b16 %v1084_v55 }
 0xfca   : > { %v1089_v9 = vunpack.c.l.b16 %v1085_v8  ;;  %v1736_v10 = vsel %vm331_vm10, %v1075_v7, %v1065_v57 }
 0xfcc   : > { %v1090_v12 = vrot.slane %v1089_v9, 7 }
 0xfce   : > { %v1091_v13 = vsel %vm331_vm10, %v1090_v12, %v1088_v11  ;;  %v200_v11 = vld [vmem:[%s1749_s25] sm:$0x3] }
 0xfcf   : > { %v1092_v14 = vpack.c.b16 %v1091_v13, %v1091_v13 }
 0xfd1   : > { %1093 = vrot.lane.b32.xlu2 %v1092_v14, %s1531_s17 }
0x102b   : > { %v1094_v15 = vpop.permute.xlu2 %1093 }
0x102c   : > { %1341 = vmatmul.msk.bf16.vlgmr.msrb.gmra.mxu3 %vm217_vm1, %v1094_v15 }
0x10af   : > { %v1107_v18 = vpop.f32.mrf.mxu3 }
0x10b0   : > { %v1112_v19 = vrot.slane %v1107_v18, 1  ;;  %v1115_v20 = vadd.f32 %v1107_v18, %v1082_v16 }
0x10b2   : > { %v1116_v21 = vadd.f32 %v1112_v19, %v1083_v17  ;;  %1490 = vtanh.f32 %v1115_v20  ;;  %v1342_v25 = vmul.f32 -1.442695, %v1115_v20 }
0x10b4   : > { %1492 = vtanh.f32 %v1116_v21  ;;  %v1343_v26 = vmul.f32 -1.442695, %v1116_v21 }
0x10b5   : > { %1494 = vpow2.f32 %v1342_v25 }
0x10b6   : > { %1496 = vpow2.f32 %v1343_v26 }
0x10b7   : > { %v1109_v22 = vpop.f32.mrf.mxu3 }
0x10b8   : > { %v1491_v23 = vpop.eup %1490 }
0x10b9   : > { %1161 = vrot.lane.b32.xlu1 %v1491_v23, %s1532_s21 }
0x10ba   : > { %v1493_v24 = vpop.eup %1492 }
0x10bb   : > { %1163 = vrot.lane.b32.xlu0 %v1493_v24, %s1532_s21  ;;  %v1495_v27 = vpop.eup %1494 }
0x10bc   : > { %v1497_v28 = vpop.eup %1496  ;;  %v1123_v29 = vadd.f32 1.0, %v1495_v27 }
0x10bd   : > { %v1124_v30 = vadd.f32 1.0, %v1497_v28 }
0x10be   : > { %1498 = vrcp.f32 %v1123_v29  ;;  %v1136_v40 = vand.u32 2147483648, %v1123_v29  ;;  %vm1130_vm6 = vweird.f32 %v1123_v29  ;;  %v1134_v41 = vand.u32 2147483647, %v1123_v29 }
0x10bf   : > { %1500 = vrcp.f32 %v1124_v30  ;;  %v1151_v44 = vand.u32 2147483648, %v1124_v30  ;;  %vm1145_vm9 = vweird.f32 %v1124_v30  ;;  %v1149_v46 = vand.u32 2147483647, %v1124_v30 }
0x10c0   : > { %v1137_v45 = vor.u32 1.1754944e-38, %v1136_v40  ;;  %vm1135_vm11 = vcmp.eq.f32.partialorder %v1134_v41, 8.507059e+37 }
0x10c1   : > { %v1152_v58 = vor.u32 1.1754944e-38, %v1151_v44  ;;  %vm1150_vm13 = vcmp.eq.f32.partialorder %v1149_v46, 8.507059e+37 }
0x10c4   : > { %v1499_v31 = vpop.eup %1498 }
0x10c5   : > { %v1501_v32 = vpop.eup %1500  ;;  %v1126_v33 = vmul.f32 %v1499_v31, %v1123_v29  ;;  %vm1131_vm1 = vweird.f32 %v1499_v31 }
0x10c6   : > { %v1141_v34 = vmul.f32 %v1501_v32, %v1124_v30  ;;  %vm1132_vm7 = vmor %vm1130_vm6, %vm1131_vm1  ;;  %vm1146_vm8 = vweird.f32 %v1501_v32 }
0x10c7   : > { %v1127_v35 = vsub.f32 1.0, %v1126_v33  ;;  %vm1147_vm12 = vmor %vm1145_vm9, %vm1146_vm8 }
0x10c8   : > { %v1142_v36 = vsub.f32 1.0, %v1141_v34 }
0x10c9   : > { %v1128_v37 = vmul.f32 %v1499_v31, %v1127_v35 }
0x10ca   : > { %v1143_v38 = vmul.f32 %v1501_v32, %v1142_v36 }
0x10cb   : > { %v1129_v39 = vadd.f32 %v1499_v31, %v1128_v37 }
0x10cc   : > { %v1144_v42 = vadd.f32 %v1501_v32, %v1143_v38 }
0x10cd   : > { %v1133_v43 = vsel %vm1132_vm7, %v1499_v31, %v1129_v39 }
0x10ce   : > { %v1138_v49 = vsel %vm1135_vm11, %v1137_v45, %v1133_v43  ;;  %v1148_v53 = vsel %vm1147_vm12, %v1501_v32, %v1144_v42 }
0x10cf   : > { %v1153_v56 = vsel %vm1150_vm13, %v1152_v58, %v1148_v53  ;;  %v1157_v57 = vmul.f32 %v1138_v49, %v1726_v60 }
0x10d0   : > { %v1158_v47 = vmul.f32 %v1153_v56, %v1730_v62 }
0x112b   : > { %v1162_v51 = vpop.permute.xlu1 %1161 }
0x112c   : > { %v1167_v0 = vmul.f32 %v1162_v51, %v1138_v49 }
0x112d   : > { %v1164_v59 = vpop.permute.xlu0 %1163 }
0x112e   : > { %1171 = vrot.lane.b32.xlu0 %v1167_v0, %s1531_s17  ;;  %v1168_v61 = vmul.f32 %v1164_v59, %v1153_v56 }
0x1130   : > { %1173 = vrot.lane.b32.xlu2 %v1168_v61, %s1531_s17 }
0x1136   : > { %333 = vrot.lane.b32.xlu0 %v1604_v1, %s1531_s17 }
0x113e   : > { %705 = vrot.lane.b32.xlu0 %v1670_v63, %s1531_s17 }
0x1146   : > { %1077 = vrot.lane.b32.xlu0 %v1736_v10, %s1531_s17 }
0x118a   : > { %v1174_v2 = vpop.permute.xlu2 %1173 }
0x118b   : > { %v1178_v3 = vadd.f32 %v1174_v2, %v1158_v47 }
0x118d   : > { %1502 = vtanh.f32 %v1178_v3  ;;  %v1216_v5 = vrot.slane %v1178_v3, 7 }
0x1193   : > { %v1503_v4 = vpop.eup %1502 }
0x1194   : > { %1185 = vrot.lane.b32.xlu1 %v1503_v4, %s1532_s21 }
0x119c   : > { %457 = vrot.lane.b32.xlu1 %v1626_v54, %s1531_s17 }
0x11a0   : > { %v1172_v1 = vpop.permute.xlu0 %1171 }
0x11a1   : > { %v1177_v6 = vadd.f32 %v1172_v1, %v1157_v57 }
0x11a3   : > { %1504 = vtanh.f32 %v1177_v6  ;;  %v1217_v63 = vsel %vm331_vm10, %v1216_v5, %v1177_v6 }
0x11a4   : > { %1218 = vrot.lane.b32.xlu0 %v1217_v63, %s1533_s26  ;;  %829 = vrot.lane.b32.xlu1 %v1692_v50, %s1531_s17 }
0x11a8   : > { %v334_v54 = vpop.permute.xlu0 %333 }
0x11a9   : > { %v1505_v62 = vpop.eup %1504  ;;  %v336_v50 = vadd.f32 %v334_v54, %v200_v11 }
0x11aa   : > { %1183 = vrot.lane.b32.xlu2 %v1505_v62, %s1532_s21 }
0x11b0   : > { %v706_v60 = vpop.permute.xlu0 %705 }
0x11b2   : > { %581 = vrot.lane.b32.xlu2 %v1648_v48, %s1531_s17 }
0x11b8   : > { %v1078_v13 = vpop.permute.xlu0 %1077 }
0x11ba   : > { %953 = vrot.lane.b32.xlu2 %v1714_v52, %s1531_s17 }
0x1204   : > { %v1184_v55 = vpop.permute.xlu2 %1183 }
0x1205   : > { %v1189_v9 = vmul.f32 %v1184_v55, %v1138_v49 }
0x1206   : > { %v1186_v7 = vpop.permute.xlu1 %1185 }
0x1207   : > { %v1190_v8 = vmul.f32 %v1186_v7, %v1153_v56 }
0x1209   : > { %v1199_v10 = vrot.slane %v1190_v8, 7 }
0x120b   : > { %v1200_v12 = vsel %vm331_vm10, %v1199_v10, %v1189_v9 }
0x120c   : > { %1201 = vrot.lane.b32.xlu1 %v1200_v12, %s1531_s17  ;;  %1209 = vrot.lane.b32.xlu2 %v1200_v12, %s1531_s17  ;;  %v582_v48 = vpop.permute.xlu2 %581 }
0x120e   : > { %v458_v14 = vpop.permute.xlu1 %457 }
0x120f   : > { %v460_v52 = vadd.f32 %v458_v14, %v336_v50 }
0x1211   : > { %v584_v15 = vadd.f32 %v582_v48, %v460_v52 }
0x1213   : > { %v708_v16 = vadd.f32 %v706_v60, %v584_v15 }
0x1214   : > { %v954_v20 = vpop.permute.xlu2 %953 }
0x1216   : > { %v1219_v17 = vpop.permute.xlu0 %1218  ;;  %v830_v18 = vpop.permute.xlu1 %829 }
0x1217   : > { %1221 = vst.msk [vmem:[#allocation3] sm:$0x3] %vm190_vm0, %v1219_v17  ;;  %v832_v19 = vadd.f32 %v830_v18, %v708_v16 }
0x1219   : > { %v956_v21 = vadd.f32 %v954_v20, %v832_v19 }
0x121b   : > { %v1080_v22 = vadd.f32 %v1078_v13, %v956_v21 }
0x1266   : > { %v1210_v23 = vpop.permute.xlu2 %1209 }
0x1267   : > { %1213 = vst.msk [vmem:[#allocation2] sm:$0x3] %vm190_vm0, %v1210_v23 }
0x127e   : > { %v1202_v24 = vpop.permute.xlu1 %1201 }
0x127f   : > { %v1204_v25 = vadd.f32 %v1202_v24, %v1080_v22 }
0x1281   : > { %1222 = vst.msk [vmem:[%s1749_s25] sm:$0x3] %vm190_vm0, %v1204_v25 }
0x1282 PF: > { %s12_s11 = sadd.s32 1, %s1528_s11   ;;  %s1795_s9 = smov %s1524_s10 }
0x1283   : > { %p9_p5 = scmp.ge.s32.totalorder %s12_s11, 4   ;;  %s1796_s10 = smov %s1798_s12 }
0x1285   :  { %11 = sbr.rel (!%p9_p5) target bundleno = 2 (0x2), region = 65 }

// kernel: base_attention_forward_train.12
= control target key start
LH: loop header
LB: loop body
LE: loop exit
PB: predicated region body
PF: predicated region fallthrough
CT: control target
= control target key end

     0   :  { %vm19_vm0 = vcmask 254976   ;;  %v1060_v1 = vmov 0.0   ;;  %vm50_vm1 = vcmask 261120   ;;  %s1061_s16 = smov 32   ;;  %s1062_s22 = smov 64   ;;  %vm177_vm10 = vcmask 1041409   ;;  %s1404_s2 = inlined_call_operand.vmem [shape: bf16[32,128], index: 2, kind: input, shape index: {}]   ;;  %s1405_s1 = inlined_call_operand.vmem [shape: f32[2,128], index: 1, kind: input, shape index: {}]   ;;  %s1406_s0 = inlined_call_operand.vmem [shape: f32[2,7,128], index: 0, kind: input, shape index: {}]   ;;  %s1407_s3 = inlined_call_operand.vmem [shape: f32[2,7,32], index: 3, kind: output, shape index: {}]  }
   0x1   :  { %v942_v0 = vld [vmem:[%s1404_s2 + $0x8] sm:$0xff]  ;;  %20 = vst.msk [vmem:[#allocation2] sm:$0x3] %vm19_vm0, %v1060_v1  ;;  %v941_v2 = vld [vmem:[%s1404_s2] sm:$0xff]  ;;  %s1063_s30 = smov 96  }
   0x2   :  { %21 = vst.msk [vmem:[#allocation3] sm:$0x3] %vm19_vm0, %v1060_v1  ;;  %60 = vmatpush.bf16.msra.mxu0 %v942_v0  ;;  %191 = vmatpush.bf16.msra.mxu1 %v942_v0  ;;  %v1098_v7 = vld [vmem:[%s1405_s1] sm:$0x3]  ;;  %v30_v9 = vld [vmem:[%s1406_s0 + $0x8] sm:$0x1] }
   0x3   :  { %312 = vmatpush.bf16.msra.mxu2 %v942_v0  ;;  %433 = vmatpush.bf16.msra.mxu3 %v942_v0  ;;  %v1101_v8 = vrot.slane %v1098_v7, 1  ;;  %v29_v13 = vld [vmem:[%s1406_s0] sm:$0x1] }
   0x4   :  { %v35_v15 = vadd.f32 %v29_v13, %v1098_v7 }
   0x5   :  { %v36_v10 = vadd.f32 %v1101_v8, %v30_v9 }
   0x6   :  { %61 = vmatpush.bf16.msra.mxu0 %v941_v2  ;;  %192 = vmatpush.bf16.msra.mxu1 %v941_v2 }
   0x7   :  { %313 = vmatpush.bf16.msra.mxu2 %v941_v2  ;;  %434 = vmatpush.bf16.msra.mxu3 %v941_v2 }
   0x8   :  { %v27_v3 = vld [vmem:[#allocation2] sm:$0x3] }
   0x9   :  { %v37_v4 = vpack.c.bf16 %v27_v3, %v27_v3  ;;  %v28_v5 = vld [vmem:[#allocation3] sm:$0x3] }
   0xa   :  { %554 = vmatpush.bf16.msrb.mxu0 %v942_v0  ;;  %675 = vmatpush.bf16.msrb.mxu1 %v942_v0  ;;  %v114_v6 = vrot.slane %v28_v5, 1 }
   0xb   :  { %796 = vmatpush.bf16.msrb.mxu2 %v942_v0  ;;  %920 = vmatmul.msk.bf16.vlgmr.msra.gmra.mxu0 %vm50_vm1, %v37_v4 }
   0xc   :  { %117 = vrot.lane.b32.xlu1 %v114_v6, %s1061_s16 }
   0xe   :  { %555 = vmatpush.bf16.msrb.mxu0 %v941_v2  ;;  %676 = vmatpush.bf16.msrb.mxu1 %v941_v2 }
   0xf   :  { %797 = vmatpush.bf16.msrb.mxu2 %v941_v2 }
  0x14   :  { %115 = vrot.lane.b32.xlu1 %v28_v5, %s1061_s16 }
  0x7e   :  { %v118_v50 = vpop.permute.xlu1 %117 }
  0x86   :  { %v116_v54 = vpop.permute.xlu1 %115 }
  0x88   :  { %v63_v11 = vpop.f32.mrf.mxu0 }
  0x89   :  { %v68_v12 = vrot.slane %v63_v11, 1  ;;  %v71_v17 = vadd.f32 %v63_v11, %v35_v15  ;;  %v167_v11 = vld [vmem:[%s1406_s0 + $0x9] sm:$0x1] }
  0x8a   :  { %v169_v13 = vadd.f32 %v167_v11, %v1101_v8  ;;  %v288_v11 = vld [vmem:[%s1406_s0 + $0x2] sm:$0x1] }
  0x8b   :  { %v72_v14 = vadd.f32 %v68_v12, %v36_v10  ;;  %v921_v21 = vmul.f32 -1.442695, %v71_v17  ;;  %v166_v10 = vld [vmem:[%s1406_s0 + $0x1] sm:$0x1] }
  0x8c   :  { %v168_v12 = vadd.f32 %v166_v10, %v1098_v7 }
  0x8d   :  { %947 = vtanh.f32 %v72_v14  ;;  %v922_v20 = vmul.f32 -1.442695, %v72_v14 }
  0x8e   :  { %949 = vtanh.f32 %v71_v17 }
  0x8f   :  { %951 = vpow2.f32 %v922_v20 }
  0x90   :  { %v65_v16 = vpop.f32.mrf.mxu0  ;;  %953 = vpow2.f32 %v921_v21 }
  0x93   :  { %v948_v18 = vpop.eup %947 }
  0x94   :  { %127 = vrot.lane.b32.xlu0 %v948_v18, %s1062_s22  ;;  %v950_v19 = vpop.eup %949 }
  0x95   :  { %v952_v22 = vpop.eup %951 }
  0x96   :  { %v80_v23 = vadd.f32 1.0, %v952_v22  ;;  %v954_v24 = vpop.eup %953 }
  0x97   :  { %v79_v25 = vadd.f32 1.0, %v954_v24 }
  0x98   :  { %955 = vrcp.f32 %v80_v23  ;;  %v107_v34 = vand.u32 2147483648, %v80_v23  ;;  %vm101_vm3 = vweird.f32 %v80_v23  ;;  %v105_v35 = vand.u32 2147483647, %v80_v23 }
  0x99   :  { %957 = vrcp.f32 %v79_v25  ;;  %v92_v43 = vand.u32 2147483648, %v79_v25  ;;  %vm86_vm7 = vweird.f32 %v79_v25  ;;  %v90_v44 = vand.u32 2147483647, %v79_v25 }
  0x9a   :  { %v108_v38 = vor.u32 1.1754944e-38, %v107_v34  ;;  %vm106_vm5 = vcmp.eq.f32.partialorder %v105_v35, 8.507059e+37 }
  0x9b   :  { %v93_v46 = vor.u32 1.1754944e-38, %v92_v43  ;;  %vm91_vm9 = vcmp.eq.f32.partialorder %v90_v44, 8.507059e+37 }
  0x9c   :  { %125 = vrot.lane.b32.xlu0 %v950_v19, %s1062_s22 }
  0x9e   :  { %v956_v26 = vpop.eup %955 }
  0x9f   :  { %v97_v27 = vmul.f32 %v956_v26, %v80_v23  ;;  %v958_v29 = vpop.eup %957  ;;  %vm102_vm2 = vweird.f32 %v956_v26 }
  0xa0   :  { %v82_v31 = vmul.f32 %v958_v29, %v79_v25  ;;  %vm103_vm4 = vmor %vm101_vm3, %vm102_vm2  ;;  %vm87_vm6 = vweird.f32 %v958_v29 }
  0xa1   :  { %v98_v28 = vsub.f32 1.0, %v97_v27  ;;  %vm88_vm8 = vmor %vm86_vm7, %vm87_vm6 }
  0xa2   :  { %v83_v33 = vsub.f32 1.0, %v82_v31 }
  0xa3   :  { %v99_v30 = vmul.f32 %v956_v26, %v98_v28 }
  0xa4   :  { %v84_v37 = vmul.f32 %v958_v29, %v83_v33 }
  0xa5   :  { %v100_v32 = vadd.f32 %v956_v26, %v99_v30 }
  0xa6   :  { %v85_v41 = vadd.f32 %v958_v29, %v84_v37 }
  0xa7   :  { %v104_v36 = vsel %vm103_vm4, %v956_v26, %v100_v32 }
  0xa8   :  { %v109_v39 = vsel %vm106_vm5, %v108_v38, %v104_v36  ;;  %v89_v45 = vsel %vm88_vm8, %v958_v29, %v85_v41 }
  0xa9   :  { %v94_v47 = vsel %vm91_vm9, %v93_v46, %v89_v45  ;;  %v122_v51 = vmul.f32 %v118_v50, %v109_v39 }
  0xaa   :  { %v121_v55 = vmul.f32 %v116_v54, %v94_v47 }
 0x106   :  { %v128_v40 = vpop.permute.xlu0 %127 }
 0x107   :  { %v132_v42 = vmul.f32 %v128_v40, %v109_v39 }
 0x109   :  { %137 = vrot.lane.b32.xlu2 %v132_v42, %s1061_s16 }
 0x10e   :  { %v126_v48 = vpop.permute.xlu0 %125 }
 0x10f   :  { %v131_v49 = vmul.f32 %v126_v48, %v94_v47 }
 0x111   :  { %135 = vrot.lane.b32.xlu2 %v131_v49, %s1061_s16 }
 0x163   :  { %v138_v52 = vpop.permute.xlu2 %137 }
 0x164   :  { %v1115_v53 = vadd.f32 %v138_v52, %v122_v51 }
 0x166   :  { %959 = vtanh.f32 %v1115_v53 }
 0x16b   :  { %v136_v56 = vpop.permute.xlu2 %135 }
 0x16c   :  { %v960_v57 = vpop.eup %959  ;;  %v1118_v58 = vadd.f32 %v136_v56, %v121_v55 }
 0x16d   :  { %149 = vrot.lane.b32.xlu0 %v960_v57, %s1062_s22 }
 0x16e   :  { %961 = vtanh.f32 %v1118_v58 }
 0x174   :  { %v962_v59 = vpop.eup %961 }
 0x175   :  { %147 = vrot.lane.b32.xlu1 %v962_v59, %s1062_s22 }
 0x1df   :  { %v150_v60 = vpop.permute.xlu0 %149 }
 0x1e0   :  { %v1123_v61 = vmul.f32 %v150_v60, %v109_v39 }
 0x1e2   :  { %v171_v62 = vpack.c.bf16 %v1123_v61, %v1123_v61 }
 0x1e4   :  { %v175_v0 = vunpack.c.l.b16 %v171_v62 }
 0x1e6   :  { %v176_v3 = vrot.slane %v175_v0, 7 }
 0x1e7   :  { %v148_v63 = vpop.permute.xlu1 %147 }
 0x1e8   :  { %v1127_v1 = vmul.f32 %v148_v63, %v94_v47 }
 0x1ea   :  { %v170_v2 = vpack.c.bf16 %v1127_v1, %v1127_v1 }
 0x1ec   :  { %v174_v4 = vunpack.c.l.b16 %v170_v2 }
 0x1ee   :  { %v178_v5 = vsel %vm177_vm10, %v176_v3, %v174_v4 }
 0x1ef   :  { %v179_v6 = vpack.c.b16 %v178_v5, %v178_v5 }
 0x1f1   :  { %180 = vrot.lane.b32.xlu2 %v179_v6, %s1061_s16 }
 0x24b   :  { %v181_v9 = vpop.permute.xlu2 %180 }
 0x24c   :  { %923 = vmatmul.msk.bf16.vlgmr.msra.gmra.mxu1 %vm50_vm1, %v181_v9 }
 0x2c9   :  { %v194_v14 = vpop.f32.mrf.mxu1 }
 0x2ca   :  { %v199_v15 = vrot.slane %v194_v14, 1  ;;  %v202_v16 = vadd.f32 %v194_v14, %v168_v12  ;;  %v289_v12 = vld [vmem:[%s1406_s0 + $0xa] sm:$0x1] }
 0x2cb   :  { %v291_v14 = vadd.f32 %v289_v12, %v1101_v8 }
 0x2cc   :  { %v203_v17 = vadd.f32 %v199_v15, %v169_v13  ;;  %963 = vtanh.f32 %v202_v16  ;;  %v924_v21 = vmul.f32 -1.442695, %v202_v16  ;;  %v290_v13 = vadd.f32 %v288_v11, %v1098_v7 }
 0x2ce   :  { %965 = vtanh.f32 %v203_v17  ;;  %v925_v22 = vmul.f32 -1.442695, %v203_v17 }
 0x2cf   :  { %967 = vpow2.f32 %v924_v21 }
 0x2d0   :  { %969 = vpow2.f32 %v925_v22 }
 0x2d1   :  { %v196_v18 = vpop.f32.mrf.mxu1 }
 0x2d2   :  { %v964_v19 = vpop.eup %963 }
 0x2d3   :  { %248 = vrot.lane.b32.xlu1 %v964_v19, %s1062_s22 }
 0x2d4   :  { %v966_v20 = vpop.eup %965 }
 0x2d5   :  { %250 = vrot.lane.b32.xlu0 %v966_v20, %s1062_s22  ;;  %v968_v23 = vpop.eup %967 }
 0x2d6   :  { %v970_v24 = vpop.eup %969  ;;  %v210_v25 = vadd.f32 1.0, %v968_v23 }
 0x2d7   :  { %v211_v26 = vadd.f32 1.0, %v970_v24 }
 0x2d8   :  { %971 = vrcp.f32 %v210_v25  ;;  %v223_v36 = vand.u32 2147483648, %v210_v25  ;;  %vm217_vm12 = vweird.f32 %v210_v25  ;;  %v221_v37 = vand.u32 2147483647, %v210_v25 }
 0x2d9   :  { %973 = vrcp.f32 %v211_v26  ;;  %v238_v40 = vand.u32 2147483648, %v211_v26  ;;  %vm232_vm15 = vweird.f32 %v211_v26  ;;  %v236_v42 = vand.u32 2147483647, %v211_v26 }
 0x2da   :  { %v224_v41 = vor.u32 1.1754944e-38, %v223_v36  ;;  %vm222_vm2 = vcmp.eq.f32.partialorder %v221_v37, 8.507059e+37 }
 0x2db   :  { %v239_v47 = vor.u32 1.1754944e-38, %v238_v40  ;;  %vm237_vm4 = vcmp.eq.f32.partialorder %v236_v42, 8.507059e+37 }
 0x2de   :  { %v972_v27 = vpop.eup %971 }
 0x2df   :  { %v974_v28 = vpop.eup %973  ;;  %v213_v29 = vmul.f32 %v972_v27, %v210_v25  ;;  %vm218_vm11 = vweird.f32 %v972_v27 }
 0x2e0   :  { %v228_v30 = vmul.f32 %v974_v28, %v211_v26  ;;  %vm219_vm13 = vmor %vm217_vm12, %vm218_vm11  ;;  %vm233_vm14 = vweird.f32 %v974_v28 }
 0x2e1   :  { %v214_v31 = vsub.f32 1.0, %v213_v29  ;;  %vm234_vm3 = vmor %vm232_vm15, %vm233_vm14 }
 0x2e2   :  { %v229_v32 = vsub.f32 1.0, %v228_v30 }
 0x2e3   :  { %v215_v33 = vmul.f32 %v972_v27, %v214_v31 }
 0x2e4   :  { %v230_v34 = vmul.f32 %v974_v28, %v229_v32 }
 0x2e5   :  { %v216_v35 = vadd.f32 %v972_v27, %v215_v33 }
 0x2e6   :  { %v231_v38 = vadd.f32 %v974_v28, %v230_v34 }
 0x2e7   :  { %v220_v39 = vsel %vm219_vm13, %v972_v27, %v216_v35 }
 0x2e8   :  { %v225_v44 = vsel %vm222_vm2, %v224_v41, %v220_v39  ;;  %v235_v45 = vsel %vm234_vm3, %v974_v28, %v231_v38 }
 0x2e9   :  { %v240_v49 = vsel %vm237_vm4, %v239_v47, %v235_v45  ;;  %v244_v56 = vmul.f32 %v225_v44, %v1118_v58 }
 0x2ea   :  { %v245_v51 = vmul.f32 %v240_v49, %v1115_v53 }
 0x345   :  { %v249_v43 = vpop.permute.xlu1 %248 }
 0x346   :  { %v254_v46 = vmul.f32 %v249_v43, %v225_v44 }
 0x347   :  { %v251_v48 = vpop.permute.xlu0 %250 }
 0x348   :  { %258 = vrot.lane.b32.xlu0 %v254_v46, %s1061_s16  ;;  %v255_v50 = vmul.f32 %v251_v48, %v240_v49 }
 0x34a   :  { %260 = vrot.lane.b32.xlu2 %v255_v50, %s1061_s16 }
 0x3a4   :  { %v261_v52 = vpop.permute.xlu2 %260 }
 0x3a5   :  { %v1147_v54 = vadd.f32 %v261_v52, %v245_v51 }
 0x3a7   :  { %975 = vtanh.f32 %v1147_v54 }
 0x3ad   :  { %v976_v55 = vpop.eup %975 }
 0x3ae   :  { %272 = vrot.lane.b32.xlu1 %v976_v55, %s1062_s22 }
 0x3ba   :  { %v259_v57 = vpop.permute.xlu0 %258 }
 0x3bb   :  { %v1152_v59 = vadd.f32 %v259_v57, %v244_v56 }
 0x3bd   :  { %977 = vtanh.f32 %v1152_v59 }
 0x3c3   :  { %v978_v60 = vpop.eup %977 }
 0x3c4   :  { %270 = vrot.lane.b32.xlu2 %v978_v60, %s1062_s22 }
 0x41e   :  { %v271_v62 = vpop.permute.xlu2 %270 }
 0x41f   :  { %v1156_v53 = vmul.f32 %v271_v62, %v225_v44 }
 0x420   :  { %v273_v63 = vpop.permute.xlu1 %272 }
 0x421   :  { %v1158_v0 = vmul.f32 %v273_v63, %v240_v49  ;;  %v292_v2 = vpack.c.bf16 %v1156_v53, %v1156_v53 }
 0x423   :  { %v293_v58 = vpack.c.bf16 %v1158_v0, %v1158_v0  ;;  %v296_v4 = vunpack.c.l.b16 %v292_v2 }
 0x425   :  { %v297_v3 = vunpack.c.l.b16 %v293_v58 }
 0x427   :  { %v298_v5 = vrot.slane %v297_v3, 7 }
 0x429   :  { %v299_v6 = vsel %vm177_vm10, %v298_v5, %v296_v4 }
 0x42a   :  { %v300_v9 = vpack.c.b16 %v299_v6, %v299_v6 }
 0x42c   :  { %301 = vrot.lane.b32.xlu0 %v300_v9, %s1061_s16 }
 0x49e   :  { %v302_v10 = vpop.permute.xlu0 %301 }
 0x49f   :  { %926 = vmatmul.msk.bf16.vlgmr.msra.gmra.mxu2 %vm50_vm1, %v302_v10 }
 0x522   :  { %v315_v15 = vpop.f32.mrf.mxu2 }
 0x523   :  { %v320_v16 = vrot.slane %v315_v15, 1  ;;  %v323_v17 = vadd.f32 %v315_v15, %v290_v13  ;;  %v410_v15 = vld [vmem:[%s1406_s0 + $0xb] sm:$0x1] }
 0x525   :  { %v324_v18 = vadd.f32 %v320_v16, %v291_v14  ;;  %979 = vtanh.f32 %v323_v17  ;;  %v927_v22 = vmul.f32 -1.442695, %v323_v17  ;;  %v409_v14 = vld [vmem:[%s1406_s0 + $0x3] sm:$0x1]  ;;  %v412_v17 = vadd.f32 %v410_v15, %v1101_v8 }
 0x526   :  { %v411_v16 = vadd.f32 %v409_v14, %v1098_v7 }
 0x527   :  { %981 = vtanh.f32 %v324_v18  ;;  %v928_v27 = vmul.f32 -1.442695, %v324_v18 }
 0x528   :  { %983 = vpow2.f32 %v927_v22 }
 0x52a   :  { %v317_v19 = vpop.f32.mrf.mxu2 }
 0x52b   :  { %v980_v20 = vpop.eup %979 }
 0x52c   :  { %369 = vrot.lane.b32.xlu2 %v980_v20, %s1062_s22 }
 0x52d   :  { %v982_v21 = vpop.eup %981 }
 0x52e   :  { %371 = vrot.lane.b32.xlu1 %v982_v21, %s1062_s22  ;;  %v984_v23 = vpop.eup %983 }
 0x52f   :  { %v331_v24 = vadd.f32 1.0, %v984_v23 }
 0x531   :  { %985 = vrcp.f32 %v331_v24  ;;  %v344_v32 = vand.u32 2147483648, %v331_v24  ;;  %vm338_vm6 = vweird.f32 %v331_v24  ;;  %v342_v34 = vand.u32 2147483647, %v331_v24 }
 0x532   :  { %987 = vpow2.f32 %v928_v27 }
 0x533   :  { %v345_v36 = vor.u32 1.1754944e-38, %v344_v32  ;;  %vm343_vm8 = vcmp.eq.f32.partialorder %v342_v34, 8.507059e+37 }
 0x537   :  { %v986_v25 = vpop.eup %985 }
 0x538   :  { %v334_v26 = vmul.f32 %v986_v25, %v331_v24  ;;  %v988_v30 = vpop.eup %987  ;;  %vm339_vm5 = vweird.f32 %v986_v25 }
 0x539   :  { %v332_v33 = vadd.f32 1.0, %v988_v30  ;;  %vm340_vm7 = vmor %vm338_vm6, %vm339_vm5 }
 0x53a   :  { %v335_v28 = vsub.f32 1.0, %v334_v26 }
 0x53b   :  { %989 = vrcp.f32 %v332_v33  ;;  %v359_v45 = vand.u32 2147483648, %v332_v33  ;;  %vm353_vm11 = vweird.f32 %v332_v33  ;;  %v357_v46 = vand.u32 2147483647, %v332_v33 }
 0x53c   :  { %v336_v29 = vmul.f32 %v986_v25, %v335_v28 }
 0x53d   :  { %v360_v48 = vor.u32 1.1754944e-38, %v359_v45  ;;  %vm358_vm13 = vcmp.eq.f32.partialorder %v357_v46, 8.507059e+37 }
 0x53e   :  { %v337_v31 = vadd.f32 %v986_v25, %v336_v29 }
 0x540   :  { %v341_v35 = vsel %vm340_vm7, %v986_v25, %v337_v31 }
 0x541   :  { %v346_v38 = vsel %vm343_vm8, %v345_v36, %v341_v35  ;;  %v990_v40 = vpop.eup %989 }
 0x542   :  { %v349_v41 = vmul.f32 %v990_v40, %v332_v33  ;;  %vm354_vm9 = vweird.f32 %v990_v40  ;;  %v365_v52 = vmul.f32 %v346_v38, %v1152_v59 }
 0x543   :  { %vm355_vm12 = vmor %vm353_vm11, %vm354_vm9 }
 0x544   :  { %v350_v42 = vsub.f32 1.0, %v349_v41 }
 0x546   :  { %v351_v43 = vmul.f32 %v990_v40, %v350_v42 }
 0x548   :  { %v352_v44 = vadd.f32 %v990_v40, %v351_v43 }
 0x54a   :  { %v356_v47 = vsel %vm355_vm12, %v990_v40, %v352_v44 }
 0x54b   :  { %v361_v50 = vsel %vm358_vm13, %v360_v48, %v356_v47 }
 0x54c   :  { %v366_v60 = vmul.f32 %v361_v50, %v1147_v54 }
 0x586   :  { %v370_v37 = vpop.permute.xlu2 %369 }
 0x587   :  { %v375_v39 = vmul.f32 %v370_v37, %v346_v38 }
 0x589   :  { %379 = vrot.lane.b32.xlu1 %v375_v39, %s1061_s16 }
 0x5a0   :  { %v372_v49 = vpop.permute.xlu1 %371 }
 0x5a1   :  { %v376_v51 = vmul.f32 %v372_v49, %v361_v50 }
 0x5a3   :  { %381 = vrot.lane.b32.xlu0 %v376_v51, %s1061_s16 }
 0x5fb   :  { %v380_v55 = vpop.permute.xlu1 %379 }
 0x5fc   :  { %v1180_v56 = vadd.f32 %v380_v55, %v365_v52 }
 0x5fe   :  { %991 = vtanh.f32 %v1180_v56 }
 0x604   :  { %v992_v57 = vpop.eup %991 }
 0x605   :  { %391 = vrot.lane.b32.xlu0 %v992_v57, %s1062_s22 }
 0x615   :  { %v382_v62 = vpop.permute.xlu0 %381 }
 0x616   :  { %v1185_v63 = vadd.f32 %v382_v62, %v366_v60 }
 0x618   :  { %993 = vtanh.f32 %v1185_v63 }
 0x61e   :  { %v994_v2 = vpop.eup %993 }
 0x61f   :  { %393 = vrot.lane.b32.xlu2 %v994_v2, %s1062_s22 }
 0x677   :  { %v392_v58 = vpop.permute.xlu0 %391 }
 0x678   :  { %v1189_v59 = vmul.f32 %v392_v58, %v346_v38 }
 0x679   :  { %v394_v3 = vpop.permute.xlu2 %393 }
 0x67a   :  { %v1191_v4 = vmul.f32 %v394_v3, %v361_v50  ;;  %v413_v5 = vpack.c.bf16 %v1189_v59, %v1189_v59 }
 0x67c   :  { %v414_v54 = vpack.c.bf16 %v1191_v4, %v1191_v4  ;;  %v417_v9 = vunpack.c.l.b16 %v413_v5 }
 0x67e   :  { %v418_v6 = vunpack.c.l.b16 %v414_v54 }
 0x680   :  { %v419_v10 = vrot.slane %v418_v6, 7 }
 0x682   :  { %v420_v11 = vsel %vm177_vm10, %v419_v10, %v417_v9 }
 0x683   :  { %v421_v12 = vpack.c.b16 %v420_v11, %v420_v11 }
 0x685   :  { %422 = vrot.lane.b32.xlu1 %v421_v12, %s1061_s16 }
 0x6f7   :  { %v423_v13 = vpop.permute.xlu1 %422 }
 0x6f8   :  { %929 = vmatmul.msk.bf16.vlgmr.msra.gmra.mxu3 %vm50_vm1, %v423_v13 }
 0x77b   :  { %v436_v18 = vpop.f32.mrf.mxu3 }
 0x77c   :  { %v441_v19 = vrot.slane %v436_v18, 1  ;;  %v444_v20 = vadd.f32 %v436_v18, %v411_v16 }
 0x77e   :  { %v445_v21 = vadd.f32 %v441_v19, %v412_v17  ;;  %995 = vtanh.f32 %v444_v20  ;;  %v930_v28 = vmul.f32 -1.442695, %v444_v20  ;;  %v530_v19 = vld [vmem:[%s1406_s0 + $0x4] sm:$0x1]  ;;  %v531_v20 = vld [vmem:[%s1406_s0 + $0xc] sm:$0x1] }
 0x780   :  { %997 = vtanh.f32 %v445_v21  ;;  %v931_v25 = vmul.f32 -1.442695, %v445_v21  ;;  %v532_v21 = vadd.f32 %v530_v19, %v1098_v7 }
 0x782   :  { %999 = vpow2.f32 %v931_v25 }
 0x783   :  { %v438_v22 = vpop.f32.mrf.mxu3 }
 0x784   :  { %v996_v23 = vpop.eup %995  ;;  %v533_v22 = vadd.f32 %v531_v20, %v1101_v8 }
 0x785   :  { %490 = vrot.lane.b32.xlu0 %v996_v23, %s1062_s22 }
 0x786   :  { %v998_v24 = vpop.eup %997 }
 0x787   :  { %492 = vrot.lane.b32.xlu2 %v998_v24, %s1062_s22 }
 0x788   :  { %v1000_v26 = vpop.eup %999 }
 0x789   :  { %v453_v27 = vadd.f32 1.0, %v1000_v26 }
 0x78b   :  { %1001 = vrcp.f32 %v453_v27  ;;  %v480_v36 = vand.u32 2147483648, %v453_v27  ;;  %vm474_vm15 = vweird.f32 %v453_v27  ;;  %v478_v37 = vand.u32 2147483647, %v453_v27 }
 0x78c   :  { %1003 = vpow2.f32 %v930_v28 }
 0x78d   :  { %v481_v39 = vor.u32 1.1754944e-38, %v480_v36  ;;  %vm479_vm3 = vcmp.eq.f32.partialorder %v478_v37, 8.507059e+37 }
 0x791   :  { %v1002_v29 = vpop.eup %1001 }
 0x792   :  { %v470_v30 = vmul.f32 %v1002_v29, %v453_v27  ;;  %v1004_v32 = vpop.eup %1003  ;;  %vm475_vm14 = vweird.f32 %v1002_v29 }
 0x793   :  { %v452_v33 = vadd.f32 1.0, %v1004_v32  ;;  %vm476_vm2 = vmor %vm474_vm15, %vm475_vm14 }
 0x794   :  { %v471_v31 = vsub.f32 1.0, %v470_v30 }
 0x795   :  { %1005 = vrcp.f32 %v452_v33  ;;  %v465_v48 = vand.u32 2147483648, %v452_v33  ;;  %vm459_vm5 = vweird.f32 %v452_v33  ;;  %v463_v49 = vand.u32 2147483647, %v452_v33 }
 0x796   :  { %v472_v34 = vmul.f32 %v1002_v29, %v471_v31 }
 0x797   :  { %v466_v51 = vor.u32 1.1754944e-38, %v465_v48  ;;  %vm464_vm7 = vcmp.eq.f32.partialorder %v463_v49, 8.507059e+37 }
 0x798   :  { %v473_v35 = vadd.f32 %v1002_v29, %v472_v34 }
 0x79a   :  { %v477_v38 = vsel %vm476_vm2, %v1002_v29, %v473_v35 }
 0x79b   :  { %v1006_v40 = vpop.eup %1005  ;;  %v482_v42 = vsel %vm479_vm3, %v481_v39, %v477_v38 }
 0x79c   :  { %v455_v44 = vmul.f32 %v1006_v40, %v452_v33  ;;  %vm460_vm4 = vweird.f32 %v1006_v40  ;;  %v487_v58 = vmul.f32 %v482_v42, %v1185_v63 }
 0x79d   :  { %vm461_vm6 = vmor %vm459_vm5, %vm460_vm4 }
 0x79e   :  { %v456_v45 = vsub.f32 1.0, %v455_v44 }
 0x7a0   :  { %v457_v46 = vmul.f32 %v1006_v40, %v456_v45 }
 0x7a2   :  { %v458_v47 = vadd.f32 %v1006_v40, %v457_v46 }
 0x7a4   :  { %v462_v50 = vsel %vm461_vm6, %v1006_v40, %v458_v47 }
 0x7a5   :  { %v467_v55 = vsel %vm464_vm7, %v466_v51, %v462_v50 }
 0x7a6   :  { %v486_v60 = vmul.f32 %v467_v55, %v1180_v56 }
 0x7e1   :  { %v493_v41 = vpop.permute.xlu2 %492 }
 0x7e2   :  { %v497_v43 = vmul.f32 %v493_v41, %v482_v42 }
 0x7e4   :  { %502 = vrot.lane.b32.xlu1 %v497_v43, %s1061_s16 }
 0x7f7   :  { %v491_v52 = vpop.permute.xlu0 %490 }
 0x7f8   :  { %v496_v57 = vmul.f32 %v491_v52, %v467_v55 }
 0x7fa   :  { %500 = vrot.lane.b32.xlu2 %v496_v57, %s1061_s16 }
 0x854   :  { %v501_v62 = vpop.permute.xlu2 %500 }
 0x855   :  { %v1213_v2 = vadd.f32 %v501_v62, %v486_v60 }
 0x856   :  { %v503_v3 = vpop.permute.xlu1 %502 }
 0x857   :  { %1007 = vtanh.f32 %v1213_v2  ;;  %v1217_v5 = vadd.f32 %v503_v3, %v487_v58 }
 0x859   :  { %1009 = vtanh.f32 %v1217_v5 }
 0x85d   :  { %v1008_v54 = vpop.eup %1007 }
 0x85e   :  { %512 = vrot.lane.b32.xlu1 %v1008_v54, %s1062_s22 }
 0x85f   :  { %v1010_v6 = vpop.eup %1009 }
 0x860   :  { %514 = vrot.lane.b32.xlu0 %v1010_v6, %s1062_s22 }
 0x8d0   :  { %v513_v9 = vpop.permute.xlu1 %512 }
 0x8d1   :  { %v1222_v56 = vmul.f32 %v513_v9, %v467_v55 }
 0x8d2   :  { %v515_v10 = vpop.permute.xlu0 %514 }
 0x8d3   :  { %v1224_v11 = vmul.f32 %v515_v10, %v482_v42  ;;  %v534_v63 = vpack.c.bf16 %v1222_v56, %v1222_v56 }
 0x8d5   :  { %v535_v12 = vpack.c.bf16 %v1224_v11, %v1224_v11  ;;  %v538_v14 = vunpack.c.l.b16 %v534_v63 }
 0x8d7   :  { %v539_v13 = vunpack.c.l.b16 %v535_v12 }
 0x8d9   :  { %v540_v15 = vrot.slane %v539_v13, 7 }
 0x8db   :  { %v541_v16 = vsel %vm177_vm10, %v540_v15, %v538_v14 }
 0x8dc   :  { %v542_v17 = vpack.c.b16 %v541_v16, %v541_v16 }
 0x8de   :  { %543 = vrot.lane.b32.xlu2 %v542_v17, %s1061_s16 }
 0x938   :  { %v544_v18 = vpop.permute.xlu2 %543 }
 0x939   :  { %932 = vmatmul.msk.bf16.vlgmr.msrb.gmra.mxu0 %vm50_vm1, %v544_v18 }
 0x9b6   :  { %v557_v23 = vpop.f32.mrf.mxu0 }
 0x9b7   :  { %v562_v24 = vrot.slane %v557_v23, 1  ;;  %v565_v25 = vadd.f32 %v557_v23, %v532_v21 }
 0x9b9   :  { %v566_v26 = vadd.f32 %v562_v24, %v533_v22  ;;  %1011 = vtanh.f32 %v565_v25  ;;  %v933_v30 = vmul.f32 -1.442695, %v565_v25 }
 0x9bb   :  { %1013 = vtanh.f32 %v566_v26  ;;  %v934_v31 = vmul.f32 -1.442695, %v566_v26  ;;  %v651_v26 = vld [vmem:[%s1406_s0 + $0x5] sm:$0x1] }
 0x9bc   :  { %1015 = vpow2.f32 %v933_v30 }
 0x9bd   :  { %1017 = vpow2.f32 %v934_v31 }
 0x9be   :  { %v559_v27 = vpop.f32.mrf.mxu0 }
 0x9bf   :  { %v1012_v28 = vpop.eup %1011  ;;  %v652_v27 = vld [vmem:[%s1406_s0 + $0xd] sm:$0x1] }
 0x9c0   :  { %611 = vrot.lane.b32.xlu1 %v1012_v28, %s1062_s22  ;;  %v653_v28 = vadd.f32 %v651_v26, %v1098_v7 }
 0x9c1   :  { %v1014_v29 = vpop.eup %1013 }
 0x9c2   :  { %613 = vrot.lane.b32.xlu0 %v1014_v29, %s1062_s22  ;;  %v1016_v32 = vpop.eup %1015  ;;  %v654_v29 = vadd.f32 %v652_v27, %v1101_v8 }
 0x9c3   :  { %v1018_v33 = vpop.eup %1017  ;;  %v573_v34 = vadd.f32 1.0, %v1016_v32 }
 0x9c4   :  { %v574_v35 = vadd.f32 1.0, %v1018_v33 }
 0x9c5   :  { %1019 = vrcp.f32 %v573_v34  ;;  %v586_v45 = vand.u32 2147483648, %v573_v34  ;;  %vm580_vm9 = vweird.f32 %v573_v34  ;;  %v584_v46 = vand.u32 2147483647, %v573_v34 }
 0x9c6   :  { %1021 = vrcp.f32 %v574_v35  ;;  %v601_v49 = vand.u32 2147483648, %v574_v35  ;;  %vm595_vm13 = vweird.f32 %v574_v35  ;;  %v599_v51 = vand.u32 2147483647, %v574_v35 }
 0x9c7   :  { %v587_v50 = vor.u32 1.1754944e-38, %v586_v45  ;;  %vm585_vm14 = vcmp.eq.f32.partialorder %v584_v46, 8.507059e+37 }
 0x9c8   :  { %v602_v62 = vor.u32 1.1754944e-38, %v601_v49  ;;  %vm600_vm2 = vcmp.eq.f32.partialorder %v599_v51, 8.507059e+37 }
 0x9cb   :  { %v1020_v36 = vpop.eup %1019 }
 0x9cc   :  { %v1022_v37 = vpop.eup %1021  ;;  %v576_v38 = vmul.f32 %v1020_v36, %v573_v34  ;;  %vm581_vm8 = vweird.f32 %v1020_v36 }
 0x9cd   :  { %v591_v39 = vmul.f32 %v1022_v37, %v574_v35  ;;  %vm582_vm11 = vmor %vm580_vm9, %vm581_vm8  ;;  %vm596_vm12 = vweird.f32 %v1022_v37 }
 0x9ce   :  { %v577_v40 = vsub.f32 1.0, %v576_v38  ;;  %vm597_vm15 = vmor %vm595_vm13, %vm596_vm12 }
 0x9cf   :  { %v592_v41 = vsub.f32 1.0, %v591_v39 }
 0x9d0   :  { %v578_v42 = vmul.f32 %v1020_v36, %v577_v40 }
 0x9d1   :  { %v593_v43 = vmul.f32 %v1022_v37, %v592_v41 }
 0x9d2   :  { %v579_v44 = vadd.f32 %v1020_v36, %v578_v42 }
 0x9d3   :  { %v594_v47 = vadd.f32 %v1022_v37, %v593_v43 }
 0x9d4   :  { %v583_v48 = vsel %vm582_vm11, %v1020_v36, %v579_v44 }
 0x9d5   :  { %v588_v55 = vsel %vm585_vm14, %v587_v50, %v583_v48  ;;  %v598_v57 = vsel %vm597_vm15, %v1022_v37, %v594_v47 }
 0x9d6   :  { %v603_v3 = vsel %vm600_vm2, %v602_v62, %v598_v57  ;;  %v607_v12 = vmul.f32 %v588_v55, %v1213_v2 }
 0x9d7   :  { %v608_v6 = vmul.f32 %v603_v3, %v1217_v5 }
 0xa32   :  { %v612_v52 = vpop.permute.xlu1 %611 }
 0xa33   :  { %v617_v60 = vmul.f32 %v612_v52, %v588_v55 }
 0xa34   :  { %v614_v58 = vpop.permute.xlu0 %613 }
 0xa35   :  { %621 = vrot.lane.b32.xlu0 %v617_v60, %s1061_s16  ;;  %v618_v54 = vmul.f32 %v614_v58, %v603_v3 }
 0xa37   :  { %623 = vrot.lane.b32.xlu2 %v618_v54, %s1061_s16 }
 0xa91   :  { %v624_v9 = vpop.permute.xlu2 %623 }
 0xa92   :  { %v1246_v10 = vadd.f32 %v624_v9, %v608_v6 }
 0xa94   :  { %1023 = vtanh.f32 %v1246_v10 }
 0xa9a   :  { %v1024_v63 = vpop.eup %1023 }
 0xa9b   :  { %635 = vrot.lane.b32.xlu1 %v1024_v63, %s1062_s22 }
 0xaa7   :  { %v622_v13 = vpop.permute.xlu0 %621 }
 0xaa8   :  { %v1251_v14 = vadd.f32 %v622_v13, %v607_v12 }
 0xaaa   :  { %1025 = vtanh.f32 %v1251_v14 }
 0xab0   :  { %v1026_v15 = vpop.eup %1025 }
 0xab1   :  { %633 = vrot.lane.b32.xlu2 %v1026_v15, %s1062_s22 }
 0xb0b   :  { %v634_v16 = vpop.permute.xlu2 %633 }
 0xb0c   :  { %v1255_v5 = vmul.f32 %v634_v16, %v588_v55 }
 0xb0d   :  { %v636_v17 = vpop.permute.xlu1 %635 }
 0xb0e   :  { %v1257_v18 = vmul.f32 %v636_v17, %v603_v3  ;;  %v655_v19 = vpack.c.bf16 %v1255_v5, %v1255_v5 }
 0xb10   :  { %v656_v2 = vpack.c.bf16 %v1257_v18, %v1257_v18  ;;  %v659_v21 = vunpack.c.l.b16 %v655_v19 }
 0xb12   :  { %v660_v20 = vunpack.c.l.b16 %v656_v2 }
 0xb14   :  { %v661_v22 = vrot.slane %v660_v20, 7 }
 0xb16   :  { %v662_v23 = vsel %vm177_vm10, %v661_v22, %v659_v21 }
 0xb17   :  { %v663_v24 = vpack.c.b16 %v662_v23, %v662_v23 }
 0xb19   :  { %664 = vrot.lane.b32.xlu0 %v663_v24, %s1061_s16 }
 0xb8b   :  { %v665_v25 = vpop.permute.xlu0 %664 }
 0xb8c   :  { %935 = vmatmul.msk.bf16.vlgmr.msrb.gmra.mxu1 %vm50_vm1, %v665_v25 }
 0xc09   :  { %v678_v30 = vpop.f32.mrf.mxu1 }
 0xc0a   :  { %v683_v31 = vrot.slane %v678_v30, 1  ;;  %v686_v32 = vadd.f32 %v678_v30, %v653_v28 }
 0xc0c   :  { %v687_v33 = vadd.f32 %v683_v31, %v654_v29  ;;  %1027 = vtanh.f32 %v686_v32  ;;  %v936_v37 = vmul.f32 -1.442695, %v686_v32 }
 0xc0e   :  { %1029 = vtanh.f32 %v687_v33  ;;  %v937_v41 = vmul.f32 -1.442695, %v687_v33 }
 0xc0f   :  { %1031 = vpow2.f32 %v936_v37 }
 0xc11   :  { %v680_v34 = vpop.f32.mrf.mxu1 }
 0xc12   :  { %v1028_v35 = vpop.eup %1027  ;;  %v772_v34 = vld [vmem:[%s1406_s0 + $0x6] sm:$0x1] }
 0xc13   :  { %732 = vrot.lane.b32.xlu2 %v1028_v35, %s1062_s22  ;;  %v773_v35 = vld [vmem:[%s1406_s0 + $0xe] sm:$0x1] }
 0xc14   :  { %v1030_v36 = vpop.eup %1029 }
 0xc15   :  { %734 = vrot.lane.b32.xlu1 %v1030_v36, %s1062_s22  ;;  %v1032_v38 = vpop.eup %1031  ;;  %v1059_v36 = vld [vmem:[%s1405_s1] sm:$0x3] }
 0xc16   :  { %v694_v39 = vadd.f32 1.0, %v1032_v38  ;;  %v774_v37 = vadd.f32 %v1059_v36, %v772_v34  ;;  %v775_v38 = vadd.f32 %v773_v35, %v1101_v8 }
 0xc18   :  { %1033 = vrcp.f32 %v694_v39  ;;  %v707_v46 = vand.u32 2147483648, %v694_v39  ;;  %vm701_vm4 = vweird.f32 %v694_v39  ;;  %v705_v48 = vand.u32 2147483647, %v694_v39 }
 0xc19   :  { %1035 = vpow2.f32 %v937_v41 }
 0xc1a   :  { %v708_v50 = vor.u32 1.1754944e-38, %v707_v46  ;;  %vm706_vm6 = vcmp.eq.f32.partialorder %v705_v48, 8.507059e+37 }
 0xc1e   :  { %v1034_v7 = vpop.eup %1033 }
 0xc1f   :  { %v697_v40 = vmul.f32 %v1034_v7, %v694_v39  ;;  %v1036_v44 = vpop.eup %1035  ;;  %vm702_vm3 = vweird.f32 %v1034_v7 }
 0xc20   :  { %v695_v47 = vadd.f32 1.0, %v1036_v44  ;;  %vm703_vm5 = vmor %vm701_vm4, %vm702_vm3 }
 0xc21   :  { %v698_v42 = vsub.f32 1.0, %v697_v40 }
 0xc22   :  { %1037 = vrcp.f32 %v695_v47  ;;  %v722_v54 = vand.u32 2147483648, %v695_v47  ;;  %vm716_vm8 = vweird.f32 %v695_v47  ;;  %v720_v6 = vand.u32 2147483647, %v695_v47 }
 0xc23   :  { %v699_v43 = vmul.f32 %v1034_v7, %v698_v42 }
 0xc24   :  { %v723_v63 = vor.u32 1.1754944e-38, %v722_v54  ;;  %vm721_vm11 = vcmp.eq.f32.partialorder %v720_v6, 8.507059e+37 }
 0xc25   :  { %v700_v45 = vadd.f32 %v1034_v7, %v699_v43 }
 0xc27   :  { %v704_v49 = vsel %vm703_vm5, %v1034_v7, %v700_v45  ;;  %vm163_vm5 = vcmask 253952  }
 0xc28   :  { %v709_v52 = vsel %vm706_vm6, %v708_v50, %v704_v49  ;;  %v1038_v57 = vpop.eup %1037 }
 0xc29   :  { %v712_v60 = vmul.f32 %v1038_v57, %v695_v47  ;;  %vm717_vm7 = vweird.f32 %v1038_v57  ;;  %v728_v16 = vmul.f32 %v709_v52, %v1251_v14 }
 0xc2a   :  { %vm718_vm9 = vmor %vm716_vm8, %vm717_vm7 }
 0xc2b   :  { %v713_v62 = vsub.f32 1.0, %v712_v60 }
 0xc2d   :  { %v714_v58 = vmul.f32 %v1038_v57, %v713_v62 }
 0xc2f   :  { %v715_v3 = vadd.f32 %v1038_v57, %v714_v58 }
 0xc31   :  { %v719_v9 = vsel %vm718_vm9, %v1038_v57, %v715_v3 }
 0xc32   :  { %v724_v13 = vsel %vm721_vm11, %v723_v63, %v719_v9 }
 0xc33   :  { %v729_v20 = vmul.f32 %v724_v13, %v1246_v10 }
 0xc6d   :  { %v733_v51 = vpop.permute.xlu2 %732 }
 0xc6e   :  { %v738_v55 = vmul.f32 %v733_v51, %v709_v52 }
 0xc70   :  { %742 = vrot.lane.b32.xlu1 %v738_v55, %s1061_s16 }
 0xc87   :  { %v735_v12 = vpop.permute.xlu1 %734 }
 0xc88   :  { %v739_v15 = vmul.f32 %v735_v12, %v724_v13 }
 0xc8a   :  { %744 = vrot.lane.b32.xlu0 %v739_v15, %s1061_s16 }
 0xce2   :  { %v743_v17 = vpop.permute.xlu1 %742 }
 0xce3   :  { %v1279_v19 = vadd.f32 %v743_v17, %v728_v16 }
 0xce5   :  { %1039 = vtanh.f32 %v1279_v19 }
 0xceb   :  { %v1040_v2 = vpop.eup %1039 }
 0xcec   :  { %754 = vrot.lane.b32.xlu0 %v1040_v2, %s1062_s22 }
 0xcfc   :  { %v745_v21 = vpop.permute.xlu0 %744 }
 0xcfd   :  { %v1284_v22 = vadd.f32 %v745_v21, %v729_v20 }
 0xcff   :  { %1041 = vtanh.f32 %v1284_v22 }
 0xd05   :  { %v1042_v23 = vpop.eup %1041 }
 0xd06   :  { %756 = vrot.lane.b32.xlu2 %v1042_v23, %s1062_s22 }
 0xd5e   :  { %v755_v24 = vpop.permute.xlu0 %754 }
 0xd5f   :  { %v1288_v14 = vmul.f32 %v755_v24, %v709_v52 }
 0xd60   :  { %v757_v25 = vpop.permute.xlu2 %756 }
 0xd61   :  { %v1290_v26 = vmul.f32 %v757_v25, %v724_v13  ;;  %v776_v27 = vpack.c.bf16 %v1288_v14, %v1288_v14 }
 0xd63   :  { %v777_v10 = vpack.c.bf16 %v1290_v26, %v1290_v26  ;;  %v780_v29 = vunpack.c.l.b16 %v776_v27 }
 0xd65   :  { %v781_v28 = vunpack.c.l.b16 %v777_v10 }
 0xd67   :  { %v782_v30 = vrot.slane %v781_v28, 7 }
 0xd69   :  { %v783_v31 = vsel %vm177_vm10, %v782_v30, %v780_v29 }
 0xd6a   :  { %v784_v32 = vpack.c.b16 %v783_v31, %v783_v31 }
 0xd6c   :  { %785 = vrot.lane.b32.xlu1 %v784_v32, %s1061_s16 }
 0xdde   :  { %v786_v33 = vpop.permute.xlu1 %785 }
 0xddf   :  { %938 = vmatmul.msk.bf16.vlgmr.msrb.gmra.mxu2 %vm50_vm1, %v786_v33 }
 0xe62   :  { %v799_v39 = vpop.f32.mrf.mxu2 }
 0xe63   :  { %v804_v7 = vrot.slane %v799_v39, 1  ;;  %v807_v40 = vadd.f32 %v799_v39, %v774_v37 }
 0xe65   :  { %v808_v41 = vadd.f32 %v804_v7, %v775_v38  ;;  %1043 = vtanh.f32 %v807_v40  ;;  %v939_v48 = vmul.f32 -1.442695, %v807_v40 }
 0xe67   :  { %1045 = vtanh.f32 %v808_v41  ;;  %v940_v45 = vmul.f32 -1.442695, %v808_v41 }
 0xe69   :  { %1047 = vpow2.f32 %v940_v45 }
 0xe6a   :  { %v801_v42 = vpop.f32.mrf.mxu2 }
 0xe6b   :  { %v1044_v43 = vpop.eup %1043 }
 0xe6c   :  { %853 = vrot.lane.b32.xlu0 %v1044_v43, %s1062_s22 }
 0xe6d   :  { %v1046_v44 = vpop.eup %1045 }
 0xe6e   :  { %855 = vrot.lane.b32.xlu2 %v1046_v44, %s1062_s22 }
 0xe6f   :  { %v1048_v46 = vpop.eup %1047 }
 0xe70   :  { %v816_v47 = vadd.f32 1.0, %v1048_v46 }
 0xe72   :  { %1049 = vrcp.f32 %v816_v47  ;;  %v843_v60 = vand.u32 2147483648, %v816_v47  ;;  %vm837_vm12 = vweird.f32 %v816_v47  ;;  %v841_v62 = vand.u32 2147483647, %v816_v47 }
 0xe73   :  { %1051 = vpow2.f32 %v939_v48 }
 0xe74   :  { %v844_v3 = vor.u32 1.1754944e-38, %v843_v60  ;;  %vm842_vm14 = vcmp.eq.f32.partialorder %v841_v62, 8.507059e+37 }
 0xe78   :  { %v1050_v8 = vpop.eup %1049 }
 0xe79   :  { %v833_v49 = vmul.f32 %v1050_v8, %v816_v47  ;;  %v1052_v51 = vpop.eup %1051  ;;  %vm838_vm1 = vweird.f32 %v1050_v8 }
 0xe7a   :  { %v815_v52 = vadd.f32 1.0, %v1052_v51  ;;  %vm839_vm13 = vmor %vm837_vm12, %vm838_vm1 }
 0xe7b   :  { %v834_v50 = vsub.f32 1.0, %v833_v49 }
 0xe7c   :  { %1053 = vrcp.f32 %v815_v52  ;;  %v828_v17 = vand.u32 2147483648, %v815_v52  ;;  %vm822_vm2 = vweird.f32 %v815_v52  ;;  %v826_v2 = vand.u32 2147483647, %v815_v52 }
 0xe7d   :  { %v835_v55 = vmul.f32 %v1050_v8, %v834_v50 }
 0xe7e   :  { %v829_v21 = vor.u32 1.1754944e-38, %v828_v17  ;;  %vm827_vm4 = vcmp.eq.f32.partialorder %v826_v2, 8.507059e+37 }
 0xe7f   :  { %v836_v57 = vadd.f32 %v1050_v8, %v835_v55 }
 0xe81   :  { %v840_v58 = vsel %vm839_vm13, %v1050_v8, %v836_v57 }
 0xe82   :  { %v1054_v54 = vpop.eup %1053  ;;  %v845_v9 = vsel %vm842_vm14, %v844_v3, %v840_v58 }
 0xe83   :  { %v818_v12 = vmul.f32 %v1054_v54, %v815_v52  ;;  %vm823_vm15 = vweird.f32 %v1054_v54  ;;  %v850_v29 = vmul.f32 %v845_v9, %v1284_v22 }
 0xe84   :  { %vm824_vm3 = vmor %vm822_vm2, %vm823_vm15 }
 0xe85   :  { %v819_v13 = vsub.f32 1.0, %v818_v12 }
 0xe87   :  { %v820_v15 = vmul.f32 %v1054_v54, %v819_v13 }
 0xe89   :  { %v821_v16 = vadd.f32 %v1054_v54, %v820_v15 }
 0xe8b   :  { %v825_v20 = vsel %vm824_vm3, %v1054_v54, %v821_v16 }
 0xe8c   :  { %v830_v24 = vsel %vm827_vm4, %v829_v21, %v825_v20 }
 0xe8d   :  { %v849_v27 = vmul.f32 %v830_v24, %v1279_v19 }
 0xec8   :  { %v856_v6 = vpop.permute.xlu2 %855 }
 0xec9   :  { %v860_v63 = vmul.f32 %v856_v6, %v845_v9 }
 0xecb   :  { %865 = vrot.lane.b32.xlu1 %v860_v63, %s1061_s16 }
 0xede   :  { %v854_v23 = vpop.permute.xlu0 %853 }
 0xedf   :  { %v859_v25 = vmul.f32 %v854_v23, %v830_v24 }
 0xee1   :  { %863 = vrot.lane.b32.xlu2 %v859_v25, %s1061_s16 }
 0xee9   :  { %157 = vrot.lane.b32.xlu2 %v1127_v1, %s1061_s16 }
 0xef1   :  { %282 = vrot.lane.b32.xlu2 %v1158_v0, %s1061_s16 }
 0xef9   :  { %522 = vrot.lane.b32.xlu2 %v1222_v56, %s1061_s16 }
 0xf01   :  { %645 = vrot.lane.b32.xlu2 %v1257_v18, %s1061_s16 }
 0xf3b   :  { %v864_v10 = vpop.permute.xlu2 %863 }
 0xf3c   :  { %v869_v28 = vadd.f32 %v864_v10, %v849_v27 }
 0xf3d   :  { %v866_v30 = vpop.permute.xlu1 %865 }
 0xf3e   :  { %1055 = vtanh.f32 %v869_v28  ;;  %v870_v31 = vadd.f32 %v866_v30, %v850_v29 }
 0xf40   :  { %1057 = vtanh.f32 %v870_v31  ;;  %v902_v1 = vrot.slane %v870_v31, 7 }
 0xf42   :  { %v903_v0 = vsel %vm177_vm10, %v902_v1, %v869_v28 }
 0xf43   :  { %v158_v32 = vpop.permute.xlu2 %157 }
 0xf44   :  { %v1056_v33 = vpop.eup %1055  ;;  %164 = vst.msk [vmem:[%s1407_s3] sm:$0x1] %vm163_vm5, %v158_v32 }
 0xf45   :  { %875 = vrot.lane.b32.xlu1 %v1056_v33, %s1062_s22 }
 0xf46   :  { %v1058_v56 = vpop.eup %1057 }
 0xf47   :  { %877 = vrot.lane.b32.xlu0 %v1058_v56, %s1062_s22 }
 0xf4b   :  { %v283_v18 = vpop.permute.xlu2 %282 }
 0xf4c   :  { %287 = vst.msk [vmem:[%s1407_s3 + $0x9] sm:$0x1] %vm163_vm5, %v283_v18 }
 0xf4d   :  { %280 = vrot.lane.b32.xlu1 %v1156_v53, %s1061_s16 }
 0xf4f   :  { %159 = vrot.lane.b32.xlu0 %v1123_v61, %s1061_s16 }
 0xf53   :  { %v523_v19 = vpop.permute.xlu2 %522 }
 0xf54   :  { %528 = vst.msk [vmem:[%s1407_s3 + $0x3] sm:$0x1] %vm163_vm5, %v523_v19 }
 0xf55   :  { %403 = vrot.lane.b32.xlu1 %v1191_v4, %s1061_s16 }
 0xf57   :  { %401 = vrot.lane.b32.xlu0 %v1189_v59, %s1061_s16 }
 0xf5b   :  { %v646_v22 = vpop.permute.xlu2 %645 }
 0xf5c   :  { %650 = vst.msk [vmem:[%s1407_s3 + $0xc] sm:$0x1] %vm163_vm5, %v646_v22 }
 0xf5d   :  { %643 = vrot.lane.b32.xlu1 %v1255_v5, %s1061_s16 }
 0xf5f   :  { %524 = vrot.lane.b32.xlu0 %v1224_v11, %s1061_s16 }
 0xf65   :  { %766 = vrot.lane.b32.xlu1 %v1290_v26, %s1061_s16 }
 0xf67   :  { %764 = vrot.lane.b32.xlu0 %v1288_v14, %s1061_s16 }
 0xfb7   :  { %v876_v61 = vpop.permute.xlu1 %875 }
 0xfb8   :  { %v881_v53 = vmul.f32 %v876_v61, %v830_v24 }
 0xfb9   :  { %v878_v59 = vpop.permute.xlu0 %877 }
 0xfba   :  { %885 = vrot.lane.b32.xlu2 %v881_v53, %s1061_s16  ;;  %v882_v4 = vmul.f32 %v878_v59, %v845_v9 }
 0xfbc   :  { %v893_v34 = vrot.slane %v882_v4, 7  ;;  %887 = vrot.lane.b32.xlu0 %v882_v4, %s1061_s16 }
 0xfbe   :  { %v894_v5 = vsel %vm177_vm10, %v893_v34, %v881_v53 }
 0xfbf   :  { %v281_v35 = vpop.permute.xlu1 %280  ;;  %895 = vrot.lane.b32.xlu1 %v894_v5, %s1061_s16 }
 0xfc0   :  { %286 = vst.msk [vmem:[%s1407_s3 + $0x1] sm:$0x1] %vm163_vm5, %v281_v35 }
 0xfc1   :  { %v160_v11 = vpop.permute.xlu0 %159 }
 0xfc2   :  { %904 = vrot.lane.b32.xlu2 %v903_v0, %s1063_s30  ;;  %165 = vst.msk [vmem:[%s1407_s3 + $0x8] sm:$0x1] %vm163_vm5, %v160_v11 }
 0xfc7   :  { %v404_v14 = vpop.permute.xlu1 %403 }
 0xfc8   :  { %408 = vst.msk [vmem:[%s1407_s3 + $0xa] sm:$0x1] %vm163_vm5, %v404_v14 }
 0xfc9   :  { %v402_v26 = vpop.permute.xlu0 %401 }
 0xfca   :  { %407 = vst.msk [vmem:[%s1407_s3 + $0x2] sm:$0x1] %vm163_vm5, %v402_v26 }
 0xfcf   :  { %v644_v36 = vpop.permute.xlu1 %643 }
 0xfd0   :  { %649 = vst.msk [vmem:[%s1407_s3 + $0x4] sm:$0x1] %vm163_vm5, %v644_v36 }
 0xfd1   :  { %v525_v37 = vpop.permute.xlu0 %524 }
 0xfd2   :  { %529 = vst.msk [vmem:[%s1407_s3 + $0xb] sm:$0x1] %vm163_vm5, %v525_v37 }
 0xfd7   :  { %v767_v38 = vpop.permute.xlu1 %766 }
 0xfd8   :  { %771 = vst.msk [vmem:[%s1407_s3 + $0xd] sm:$0x1] %vm163_vm5, %v767_v38 }
 0xfd9   :  { %v765_v39 = vpop.permute.xlu0 %764 }
 0xfda   :  { %770 = vst.msk [vmem:[%s1407_s3 + $0x5] sm:$0x1] %vm163_vm5, %v765_v39 }
0x1014   :  { %v886_v7 = vpop.permute.xlu2 %885 }
0x1015   :  { %891 = vst.msk [vmem:[%s1407_s3 + $0x6] sm:$0x1] %vm163_vm5, %v886_v7 }
0x101c   :  { %v905_v40 = vpop.permute.xlu2 %904 }
0x101d   :  { %907 = vst.msk [vmem:[#allocation3] sm:$0x3] %vm19_vm0, %v905_v40 }
0x102e   :  { %v888_v41 = vpop.permute.xlu0 %887 }
0x102f   :  { %892 = vst.msk [vmem:[%s1407_s3 + $0xe] sm:$0x1] %vm163_vm5, %v888_v41 }
0x1031   :  { %v896_v42 = vpop.permute.xlu1 %895 }
0x1032   :  { %899 = vst.msk [vmem:[#allocation2] sm:$0x3] %vm19_vm0, %v896_v42 }

</bundles_post_ra>
